<compile_context>
chip_gen: v6e
topology: v6e:2x2x1
jax: 0.10.0
libtpu: 0.0.40
codegen_flags: <defaults>
</compile_context>

<pallas_src>
import functools

import jax
import jax.numpy as jnp
from jax.experimental import pallas as pl
from jax.experimental.pallas import tpu as pltpu


# ---------------------------------------------------------------------------
# Layer dimension plumbing (matches the PyTorch module).
# ---------------------------------------------------------------------------
def _layer_dims(input_dim, latent_dim):
    enc = [input_dim, 1024, 512, 256, latent_dim]
    dec = [latent_dim, 256, 512, 1024, input_dim]
    return list(zip(enc[:-1], enc[1:])) + list(zip(dec[:-1], dec[1:]))  # 8 pairs


def _bias_slices(dims):
    """Static (offset, size) pairs into the concatenated per-path bias blob."""
    slices, off = [], 0
    for _, d_out in dims:
        slices.append((off, d_out))
        off += d_out
    return tuple(slices), off


# ---------------------------------------------------------------------------
# Pallas kernel: full 8-layer chain (4 encoder + 4 decoder linears) + tanh,
# for one path selected by the grid index.  Weights bf16, activations carried
# bf16 between layers, MXU accumulation + bias add + tanh in f32.
# ---------------------------------------------------------------------------
def _fused_kernel(bias_slices, x_ref, b_ref, *rest):
    *w_refs, out_ref = rest
    n_layers = len(w_refs)

    h = x_ref[...]                                       # (1, input_dim) bf16
    acc = None
    for i, (w_ref, (off, size)) in enumerate(zip(w_refs, bias_slices)):
        acc = jnp.dot(h, w_ref[...], preferred_element_type=jnp.float32)
        acc = acc + b_ref[:, off:off + size]             # f32 bias add
        if i + 1 < n_layers:
            h = acc.astype(jnp.bfloat16)                 # bf16 feed to next MXU
    out_ref[...] = jnp.tanh(acc)                         # final f32 tanh


def fused_autoencoder(x_stacked, bias_blob, weights, *, input_dim, latent_dim):
    """Run both paths in one pallas_call.

    x_stacked: (2, 1, input_dim) bf16   (row 0 = x, row 1 = y)
    bias_blob: (2, 1, total_bias) f32   (8 biases concatenated per path)
    weights:   list of 8 arrays, each (2, in, out) bf16
    returns    (2, 1, input_dim) f32
    """
    dims = _layer_dims(input_dim, latent_dim)
    bias_slices, total_bias = _bias_slices(dims)

    in_specs = [
        pl.BlockSpec((None, 1, input_dim), lambda p: (p, 0, 0)),      # x / y row
        pl.BlockSpec((None, 1, total_bias), lambda p: (p, 0, 0)),     # bias blob
    ]
    for d_in, d_out in dims:
        in_specs.append(pl.BlockSpec((None, d_in, d_out), lambda p: (p, 0, 0)))
    out_spec = pl.BlockSpec((None, 1, input_dim), lambda p: (p, 0, 0))

    weight_elems = sum(di * do for di, do in dims)
    cost = pl.CostEstimate(
        flops=2 * 2 * weight_elems,                       # 2 paths, 2*in*out each
        transcendentals=2 * input_dim,                    # final tanh per path
        bytes_accessed=(2 * weight_elems * 2              # bf16 weights
                        + 2 * total_bias * 4              # f32 bias blob
                        + 2 * input_dim * 2               # bf16 input rows
                        + 2 * input_dim * 4))             # f32 output rows

    kernel = functools.partial(_fused_kernel, bias_slices)

    return pl.pallas_call(
        kernel,
        out_shape=jax.ShapeDtypeStruct((2, 1, input_dim), jnp.float32),
        grid_spec=pltpu.PrefetchScalarGridSpec(
            num_scalar_prefetch=0,
            grid=(2,),
            in_specs=in_specs,
            out_specs=out_spec,
        ),
        compiler_params=pltpu.CompilerParams(
            dimension_semantics=("parallel",),
            vmem_limit_bytes=32 << 20,
        ),
        cost_estimate=cost,
    )(x_stacked, bias_blob, *weights)


# ---------------------------------------------------------------------------
# Parameter construction (PyTorch-Linear-like uniform init), stacked per path.
# ---------------------------------------------------------------------------
def make_linear_params(key, in_dim, out_dim):
    kw, kb = jax.random.split(key)
    bound = 1.0 / jnp.sqrt(jnp.float32(in_dim))
    w = jax.random.uniform(kw, (in_dim, out_dim), jnp.float32, -bound, bound)
    b = jax.random.uniform(kb, (1, out_dim), jnp.float32, -bound, bound)
    return w, b


def make_path_params(key, input_dim, latent_dim):
    dims = _layer_dims(input_dim, latent_dim)
    keys = jax.random.split(key, len(dims))
    ws, bs = [], []
    for k, (d_in, d_out) in zip(keys, dims):
        w, b = make_linear_params(k, d_in, d_out)
        ws.append(w)
        bs.append(b)
    return ws, bs


def stack_path_params(real, fake):
    """weights -> list of (2,in,out) bf16; biases -> one (2,1,total) f32 blob."""
    (rws, rbs), (fws, fbs) = real, fake
    weights = [jnp.stack([rw, fw]).astype(jnp.bfloat16)
               for rw, fw in zip(rws, fws)]
    rb_cat = jnp.concatenate(rbs, axis=-1)                # (1, total_bias)
    fb_cat = jnp.concatenate(fbs, axis=-1)
    bias_blob = jnp.stack([rb_cat, fb_cat]).astype(jnp.float32)   # (2,1,total)
    return weights, bias_blob


# ---------------------------------------------------------------------------
# The `Simple.forward` equivalent.
# ---------------------------------------------------------------------------
@functools.partial(jax.jit, static_argnames=("input_shape", "latent_dim"))
def simple_forward(x, y, weights, bias_blob, input_shape, latent_dim):
    input_dim = 1
    for d in input_shape:
        input_dim *= d
    # Lane alignment insurance (review item 9): current configs are multiples
    # of 128; pad here if other shapes are ever used.
    assert input_dim % 128 == 0 and latent_dim % 128 == 0, (
        "pad input_dim / latent_dim to multiples of 128")
    xy = jnp.stack([x.reshape(1, input_dim),
                    y.reshape(1, input_dim)]).astype(jnp.bfloat16)
    out = fused_autoencoder(xy, bias_blob, weights,
                            input_dim=input_dim, latent_dim=latent_dim)
    return out[0].reshape(input_shape), out[1].reshape(input_shape)


# Pure-JAX reference mirroring the kernel's numerics
# (bf16 weights & activations, f32 accumulation + bias + tanh).
def _ref_chain(x_row, ws_bf16, bs_f32):
    h = x_row.astype(jnp.bfloat16)
    acc = None
    for i, (w, b) in enumerate(zip(ws_bf16, bs_f32)):
        acc = jnp.dot(h, w, preferred_element_type=jnp.float32) + b
        if i + 1 < len(ws_bf16):
            h = acc.astype(jnp.bfloat16)
    return jnp.tanh(acc)


if __name__ == "__main__":
    # Small configuration consistent with the module: input_dim = prod(shape) = 256,
    # latent_dim = 128 (all dims lane-aligned multiples of 128).
    input_shape = (1, 1, 16, 16)
    latent_dim = 128
    input_dim = 256

    key = jax.random.PRNGKey(0)
    k_real, k_fake, kx, ky = jax.random.split(key, 4)

    real_params = make_path_params(k_real, input_dim, latent_dim)
    fake_params = make_path_params(k_fake, input_dim, latent_dim)
    weights, bias_blob = stack_path_params(real_params, fake_params)

    x = jax.random.normal(kx, input_shape, jnp.float32)
    y = jax.random.normal(ky, input_shape, jnp.float32)

    x_hat, y_hat = simple_forward(x, y, weights, bias_blob,
                                  input_shape, latent_dim)
    jax.block_until_ready((x_hat, y_hat))

    # Correctness check against a plain-JAX reference using the same bf16 weights.
    dims = _layer_dims(input_dim, latent_dim)
    slices, _ = _bias_slices(dims)
    ws_real = [w[0] for w in weights]
    ws_fake = [w[1] for w in weights]
    bs_real = [bias_blob[0, :, off:off + sz] for off, sz in slices]
    bs_fake = [bias_blob[1, :, off:off + sz] for off, sz in slices]
    x_ref = _ref_chain(x.reshape(1, -1), ws_real, bs_real).reshape(input_shape)
    y_ref = _ref_chain(y.reshape(1, -1), ws_fake, bs_fake).reshape(input_shape)

    assert x_hat.shape == input_shape and y_hat.shape == input_shape
    assert jnp.allclose(x_hat, x_ref, atol=1e-2, rtol=1e-2)
    assert jnp.allclose(y_hat, y_ref, atol=1e-2, rtol=1e-2)

    print("KERNEL_OK")
</pallas_src>

<mosaic_0001>
module attributes {stable_mosaic.version = 11 : i64} {
  func.func @_fused_kernel(%arg0: i32, %arg1: memref<1x1x256xbf16, #tpu.memory_space<vmem>>, %arg2: memref<1x1x3968xf32, #tpu.memory_space<vmem>>, %arg3: memref<1x256x1024xbf16, #tpu.memory_space<vmem>>, %arg4: memref<1x1024x512xbf16, #tpu.memory_space<vmem>>, %arg5: memref<1x512x256xbf16, #tpu.memory_space<vmem>>, %arg6: memref<1x256x128xbf16, #tpu.memory_space<vmem>>, %arg7: memref<1x128x256xbf16, #tpu.memory_space<vmem>>, %arg8: memref<1x256x512xbf16, #tpu.memory_space<vmem>>, %arg9: memref<1x512x1024xbf16, #tpu.memory_space<vmem>>, %arg10: memref<1x1024x256xbf16, #tpu.memory_space<vmem>>, %arg11: memref<1x1x256xf32, #tpu.memory_space<vmem>>) attributes {dimension_semantics = [#tpu.dimension_semantics<parallel>], iteration_bounds = array<i64: 2>, scalar_prefetch = 0 : i64, scratch_operands = 0 : i64, tpu.core_type = #tpu.core_type<tc>, window_params = [{transform_indices = @transform_0, window_bounds = array<i64: 1, 1, 256>}, {transform_indices = @transform_1, window_bounds = array<i64: 1, 1, 3968>}, {transform_indices = @transform_2, window_bounds = array<i64: 1, 256, 1024>}, {transform_indices = @transform_3, window_bounds = array<i64: 1, 1024, 512>}, {transform_indices = @transform_4, window_bounds = array<i64: 1, 512, 256>}, {transform_indices = @transform_5, window_bounds = array<i64: 1, 256, 128>}, {transform_indices = @transform_6, window_bounds = array<i64: 1, 128, 256>}, {transform_indices = @transform_7, window_bounds = array<i64: 1, 256, 512>}, {transform_indices = @transform_8, window_bounds = array<i64: 1, 512, 1024>}, {transform_indices = @transform_9, window_bounds = array<i64: 1, 1024, 256>}, {transform_indices = @transform_10, window_bounds = array<i64: 1, 1, 256>}]} {
    %c0 = arith.constant 0 : index
    %c0_0 = arith.constant 0 : index
    %c0_1 = arith.constant 0 : index
    %0 = vector.load %arg1[%c0, %c0_0, %c0_1] : memref<1x1x256xbf16, #tpu.memory_space<vmem>>, vector<1x1x256xbf16>
    %1 = vector.shape_cast %0 : vector<1x1x256xbf16> to vector<1x256xbf16>
    %c0_2 = arith.constant 0 : index
    %c0_3 = arith.constant 0 : index
    %c0_4 = arith.constant 0 : index
    %2 = vector.load %arg3[%c0_2, %c0_3, %c0_4] : memref<1x256x1024xbf16, #tpu.memory_space<vmem>>, vector<1x256x1024xbf16>
    %3 = vector.shape_cast %2 : vector<1x256x1024xbf16> to vector<256x1024xbf16>
    %cst = arith.constant dense<0.000000e+00> : vector<1x1024xf32>
    %4 = tpu.matmul %1, %3, %cst {dimension_numbers = #tpu.dot_dimension_numbers<[1], [0], [0], [1], [0, 0, 1, 1], [], []>} : vector<1x256xbf16>, vector<256x1024xbf16>, vector<1x1024xf32> -> vector<1x1024xf32>
    %c0_5 = arith.constant 0 : index
    %c0_6 = arith.constant 0 : index
    %c0_7 = arith.constant 0 : index
    %5 = vector.load %arg2[%c0_5, %c0_6, %c0_7] : memref<1x1x3968xf32, #tpu.memory_space<vmem>>, vector<1x1x1024xf32>
    %6 = vector.shape_cast %5 : vector<1x1x1024xf32> to vector<1x1024xf32>
    %7 = arith.addf %4, %6 : vector<1x1024xf32>
    %8 = arith.truncf %7 : vector<1x1024xf32> to vector<1x1024xbf16>
    %c0_8 = arith.constant 0 : index
    %c0_9 = arith.constant 0 : index
    %c0_10 = arith.constant 0 : index
    %9 = vector.load %arg4[%c0_8, %c0_9, %c0_10] : memref<1x1024x512xbf16, #tpu.memory_space<vmem>>, vector<1x1024x512xbf16>
    %10 = vector.shape_cast %9 : vector<1x1024x512xbf16> to vector<1024x512xbf16>
    %cst_11 = arith.constant dense<0.000000e+00> : vector<1x512xf32>
    %11 = tpu.matmul %8, %10, %cst_11 {dimension_numbers = #tpu.dot_dimension_numbers<[1], [0], [0], [1], [0, 0, 1, 1], [], []>} : vector<1x1024xbf16>, vector<1024x512xbf16>, vector<1x512xf32> -> vector<1x512xf32>
    %c0_12 = arith.constant 0 : index
    %c0_13 = arith.constant 0 : index
    %c1024 = arith.constant 1024 : index
    %12 = vector.load %arg2[%c0_12, %c0_13, %c1024] : memref<1x1x3968xf32, #tpu.memory_space<vmem>>, vector<1x1x512xf32>
    %13 = vector.shape_cast %12 : vector<1x1x512xf32> to vector<1x512xf32>
    %14 = arith.addf %11, %13 : vector<1x512xf32>
    %15 = arith.truncf %14 : vector<1x512xf32> to vector<1x512xbf16>
    %c0_14 = arith.constant 0 : index
    %c0_15 = arith.constant 0 : index
    %c0_16 = arith.constant 0 : index
    %16 = vector.load %arg5[%c0_14, %c0_15, %c0_16] : memref<1x512x256xbf16, #tpu.memory_space<vmem>>, vector<1x512x256xbf16>
    %17 = vector.shape_cast %16 : vector<1x512x256xbf16> to vector<512x256xbf16>
    %cst_17 = arith.constant dense<0.000000e+00> : vector<1x256xf32>
    %18 = tpu.matmul %15, %17, %cst_17 {dimension_numbers = #tpu.dot_dimension_numbers<[1], [0], [0], [1], [0, 0, 1, 1], [], []>} : vector<1x512xbf16>, vector<512x256xbf16>, vector<1x256xf32> -> vector<1x256xf32>
    %c0_18 = arith.constant 0 : index
    %c0_19 = arith.constant 0 : index
    %c1536 = arith.constant 1536 : index
    %19 = vector.load %arg2[%c0_18, %c0_19, %c1536] : memref<1x1x3968xf32, #tpu.memory_space<vmem>>, vector<1x1x256xf32>
    %20 = vector.shape_cast %19 : vector<1x1x256xf32> to vector<1x256xf32>
    %21 = arith.addf %18, %20 : vector<1x256xf32>
    %22 = arith.truncf %21 : vector<1x256xf32> to vector<1x256xbf16>
    %c0_20 = arith.constant 0 : index
    %c0_21 = arith.constant 0 : index
    %c0_22 = arith.constant 0 : index
    %23 = vector.load %arg6[%c0_20, %c0_21, %c0_22] : memref<1x256x128xbf16, #tpu.memory_space<vmem>>, vector<1x256x128xbf16>
    %24 = vector.shape_cast %23 : vector<1x256x128xbf16> to vector<256x128xbf16>
    %cst_23 = arith.constant dense<0.000000e+00> : vector<1x128xf32>
    %25 = tpu.matmul %22, %24, %cst_23 {dimension_numbers = #tpu.dot_dimension_numbers<[1], [0], [0], [1], [0, 0, 1, 1], [], []>} : vector<1x256xbf16>, vector<256x128xbf16>, vector<1x128xf32> -> vector<1x128xf32>
    %c0_24 = arith.constant 0 : index
    %c0_25 = arith.constant 0 : index
    %c1792 = arith.constant 1792 : index
    %26 = vector.load %arg2[%c0_24, %c0_25, %c1792] : memref<1x1x3968xf32, #tpu.memory_space<vmem>>, vector<1x1x128xf32>
    %27 = vector.shape_cast %26 : vector<1x1x128xf32> to vector<1x128xf32>
    %28 = arith.addf %25, %27 : vector<1x128xf32>
    %29 = arith.truncf %28 : vector<1x128xf32> to vector<1x128xbf16>
    %c0_26 = arith.constant 0 : index
    %c0_27 = arith.constant 0 : index
    %c0_28 = arith.constant 0 : index
    %30 = vector.load %arg7[%c0_26, %c0_27, %c0_28] : memref<1x128x256xbf16, #tpu.memory_space<vmem>>, vector<1x128x256xbf16>
    %31 = vector.shape_cast %30 : vector<1x128x256xbf16> to vector<128x256xbf16>
    %cst_29 = arith.constant dense<0.000000e+00> : vector<1x256xf32>
    %32 = tpu.matmul %29, %31, %cst_29 {dimension_numbers = #tpu.dot_dimension_numbers<[1], [0], [0], [1], [0, 0, 1, 1], [], []>} : vector<1x128xbf16>, vector<128x256xbf16>, vector<1x256xf32> -> vector<1x256xf32>
    %c0_30 = arith.constant 0 : index
    %c0_31 = arith.constant 0 : index
    %c1920 = arith.constant 1920 : index
    %33 = vector.load %arg2[%c0_30, %c0_31, %c1920] : memref<1x1x3968xf32, #tpu.memory_space<vmem>>, vector<1x1x256xf32>
    %34 = vector.shape_cast %33 : vector<1x1x256xf32> to vector<1x256xf32>
    %35 = arith.addf %32, %34 : vector<1x256xf32>
    %36 = arith.truncf %35 : vector<1x256xf32> to vector<1x256xbf16>
    %c0_32 = arith.constant 0 : index
    %c0_33 = arith.constant 0 : index
    %c0_34 = arith.constant 0 : index
    %37 = vector.load %arg8[%c0_32, %c0_33, %c0_34] : memref<1x256x512xbf16, #tpu.memory_space<vmem>>, vector<1x256x512xbf16>
    %38 = vector.shape_cast %37 : vector<1x256x512xbf16> to vector<256x512xbf16>
    %cst_35 = arith.constant dense<0.000000e+00> : vector<1x512xf32>
    %39 = tpu.matmul %36, %38, %cst_35 {dimension_numbers = #tpu.dot_dimension_numbers<[1], [0], [0], [1], [0, 0, 1, 1], [], []>} : vector<1x256xbf16>, vector<256x512xbf16>, vector<1x512xf32> -> vector<1x512xf32>
    %c0_36 = arith.constant 0 : index
    %c0_37 = arith.constant 0 : index
    %c2176 = arith.constant 2176 : index
    %40 = vector.load %arg2[%c0_36, %c0_37, %c2176] : memref<1x1x3968xf32, #tpu.memory_space<vmem>>, vector<1x1x512xf32>
    %41 = vector.shape_cast %40 : vector<1x1x512xf32> to vector<1x512xf32>
    %42 = arith.addf %39, %41 : vector<1x512xf32>
    %43 = arith.truncf %42 : vector<1x512xf32> to vector<1x512xbf16>
    %c0_38 = arith.constant 0 : index
    %c0_39 = arith.constant 0 : index
    %c0_40 = arith.constant 0 : index
    %44 = vector.load %arg9[%c0_38, %c0_39, %c0_40] : memref<1x512x1024xbf16, #tpu.memory_space<vmem>>, vector<1x512x1024xbf16>
    %45 = vector.shape_cast %44 : vector<1x512x1024xbf16> to vector<512x1024xbf16>
    %cst_41 = arith.constant dense<0.000000e+00> : vector<1x1024xf32>
    %46 = tpu.matmul %43, %45, %cst_41 {dimension_numbers = #tpu.dot_dimension_numbers<[1], [0], [0], [1], [0, 0, 1, 1], [], []>} : vector<1x512xbf16>, vector<512x1024xbf16>, vector<1x1024xf32> -> vector<1x1024xf32>
    %c0_42 = arith.constant 0 : index
    %c0_43 = arith.constant 0 : index
    %c2688 = arith.constant 2688 : index
    %47 = vector.load %arg2[%c0_42, %c0_43, %c2688] : memref<1x1x3968xf32, #tpu.memory_space<vmem>>, vector<1x1x1024xf32>
    %48 = vector.shape_cast %47 : vector<1x1x1024xf32> to vector<1x1024xf32>
    %49 = arith.addf %46, %48 : vector<1x1024xf32>
    %50 = arith.truncf %49 : vector<1x1024xf32> to vector<1x1024xbf16>
    %c0_44 = arith.constant 0 : index
    %c0_45 = arith.constant 0 : index
    %c0_46 = arith.constant 0 : index
    %51 = vector.load %arg10[%c0_44, %c0_45, %c0_46] : memref<1x1024x256xbf16, #tpu.memory_space<vmem>>, vector<1x1024x256xbf16>
    %52 = vector.shape_cast %51 : vector<1x1024x256xbf16> to vector<1024x256xbf16>
    %cst_47 = arith.constant dense<0.000000e+00> : vector<1x256xf32>
    %53 = tpu.matmul %50, %52, %cst_47 {dimension_numbers = #tpu.dot_dimension_numbers<[1], [0], [0], [1], [0, 0, 1, 1], [], []>} : vector<1x1024xbf16>, vector<1024x256xbf16>, vector<1x256xf32> -> vector<1x256xf32>
    %c0_48 = arith.constant 0 : index
    %c0_49 = arith.constant 0 : index
    %c3712 = arith.constant 3712 : index
    %54 = vector.load %arg2[%c0_48, %c0_49, %c3712] : memref<1x1x3968xf32, #tpu.memory_space<vmem>>, vector<1x1x256xf32>
    %55 = vector.shape_cast %54 : vector<1x1x256xf32> to vector<1x256xf32>
    %56 = arith.addf %53, %55 : vector<1x256xf32>
    %57 = math.tanh %56 : vector<1x256xf32>
    %c0_50 = arith.constant 0 : index
    %c0_51 = arith.constant 0 : index
    %c0_52 = arith.constant 0 : index
    %58 = vector.load %arg11[%c0_50, %c0_51, %c0_52] : memref<1x1x256xf32, #tpu.memory_space<vmem>>, vector<1x1x256xf32>
    %59 = vector.shape_cast %58 : vector<1x1x256xf32> to vector<1x256xf32>
    %60 = vector.shape_cast %57 : vector<1x256xf32> to vector<1x1x256xf32>
    tpu.vector_store %arg11[%c0_50, %c0_51, %c0_52], %60 {strides = array<i32>} : memref<1x1x256xf32, #tpu.memory_space<vmem>>, vector<1x1x256xf32>,
    return
  }
  func.func @transform_0(%arg0: i32) -> (i32, i32, i32) {
    %c0_i32 = arith.constant 0 : i32
    %c0_i32_0 = arith.constant 0 : i32
    %c0_i32_1 = arith.constant 0 : i32
    return %arg0, %c0_i32, %c0_i32_0 : i32, i32, i32
  }
  func.func @transform_1(%arg0: i32) -> (i32, i32, i32) {
    %c0_i32 = arith.constant 0 : i32
    %c0_i32_0 = arith.constant 0 : i32
    %c0_i32_1 = arith.constant 0 : i32
    return %arg0, %c0_i32, %c0_i32_0 : i32, i32, i32
  }
  func.func @transform_2(%arg0: i32) -> (i32, i32, i32) {
    %c0_i32 = arith.constant 0 : i32
    %c0_i32_0 = arith.constant 0 : i32
    %c0_i32_1 = arith.constant 0 : i32
    return %arg0, %c0_i32, %c0_i32_0 : i32, i32, i32
  }
  func.func @transform_3(%arg0: i32) -> (i32, i32, i32) {
    %c0_i32 = arith.constant 0 : i32
    %c0_i32_0 = arith.constant 0 : i32
    %c0_i32_1 = arith.constant 0 : i32
    return %arg0, %c0_i32, %c0_i32_0 : i32, i32, i32
  }
  func.func @transform_4(%arg0: i32) -> (i32, i32, i32) {
    %c0_i32 = arith.constant 0 : i32
    %c0_i32_0 = arith.constant 0 : i32
    %c0_i32_1 = arith.constant 0 : i32
    return %arg0, %c0_i32, %c0_i32_0 : i32, i32, i32
  }
  func.func @transform_5(%arg0: i32) -> (i32, i32, i32) {
    %c0_i32 = arith.constant 0 : i32
    %c0_i32_0 = arith.constant 0 : i32
    %c0_i32_1 = arith.constant 0 : i32
    return %arg0, %c0_i32, %c0_i32_0 : i32, i32, i32
  }
  func.func @transform_6(%arg0: i32) -> (i32, i32, i32) {
    %c0_i32 = arith.constant 0 : i32
    %c0_i32_0 = arith.constant 0 : i32
    %c0_i32_1 = arith.constant 0 : i32
    return %arg0, %c0_i32, %c0_i32_0 : i32, i32, i32
  }
  func.func @transform_7(%arg0: i32) -> (i32, i32, i32) {
    %c0_i32 = arith.constant 0 : i32
    %c0_i32_0 = arith.constant 0 : i32
    %c0_i32_1 = arith.constant 0 : i32
    return %arg0, %c0_i32, %c0_i32_0 : i32, i32, i32
  }
  func.func @transform_8(%arg0: i32) -> (i32, i32, i32) {
    %c0_i32 = arith.constant 0 : i32
    %c0_i32_0 = arith.constant 0 : i32
    %c0_i32_1 = arith.constant 0 : i32
    return %arg0, %c0_i32, %c0_i32_0 : i32, i32, i32
  }
  func.func @transform_9(%arg0: i32) -> (i32, i32, i32) {
    %c0_i32 = arith.constant 0 : i32
    %c0_i32_0 = arith.constant 0 : i32
    %c0_i32_1 = arith.constant 0 : i32
    return %arg0, %c0_i32, %c0_i32_0 : i32, i32, i32
  }
  func.func @transform_10(%arg0: i32) -> (i32, i32, i32) {
    %c0_i32 = arith.constant 0 : i32
    %c0_i32_0 = arith.constant 0 : i32
    %c0_i32_1 = arith.constant 0 : i32
    return %arg0, %c0_i32, %c0_i32_0 : i32, i32, i32
  }
}

</mosaic_0001>

<bundles_post_ra>
// kernel: squeeze.3
= control target key start
LH: loop header
LB: loop body
LE: loop exit
PB: predicated region body
PF: predicated region fallthrough
CT: control target
= control target key end

     0   :  { %s125_s0 = inlined_call_operand.vmem [shape: f32[256], index: 0, kind: input, shape index: {}]   ;;  %s126_s1 = inlined_call_operand.hbm [shape: f32[1,1,16,16], index: 1, kind: output, shape index: {}]  }
   0x1   :  { %v6_v0 = vld [vmem:[%s125_s0] sm:$0x3] }
   0x2   :  { %7 = vst [vmem:[#allocation2] sm:$0x3] %v6_v0 }
   0x3   :  { %2 = vsyncpa [#allocation1], 0  ;;  %s93_s0 = smov 112   ;;  %s94_s8 = smov 80   ;;  %vm9_vm0 = vcmask 130048  }
   0x4   :  { %s95_s9 = smov 96   ;;  %s96_s10 = smov 64  }
   0x5   :  { %s97_s11 = smov 48   ;;  %s98_s12 = smov 32  }
   0x6   :  { %s99_s13 = smov 16   ;;  %s100_s14 = smov [#allocation0]  }
   0x7   :  { %s57_s15 = sshll.u32 %s100_s14, 4  ;;  %s58_s15 = int_to_ptr.vmem [resolvable:$true] %s57_s15 }
   0x8   :  { %s71_s16 = scalar_lea.vmem %s58_s15, 256  ;;  %p76_p1 = scmp.lt.s32.totalorder %s58_s15, %s58_s15 }
   0x9   :  { %v11_v1 = vld [vmem:[#allocation2] sm:$0x3]   ;;  %p72_p0 = scmp.ne.s32.totalorder %s58_s15, %s71_s16  ;;  %p77_p2 = scmp.lt.s32.totalorder %s71_s16, %s71_s16 }
   0xa   :  { %v23_v2 = vld [vmem:[#allocation2] sm:$0x3]   ;;  %12 = vrot.lane.b32.xlu0 %v11_v1, %s93_s0 }
   0xb   :  { %24 = vrot.lane.b32.xlu1 %v23_v2, %s94_s8  ;;  %v17_v3 = vld [vmem:[#allocation2] sm:$0x3]   ;;  %p78_p3 = por %p77_p2, %p76_p1 }
   0xc   :  { %v29_v4 = vld [vmem:[#allocation2] sm:$0x3]  }
   0xd   :  { %v8_v5 = vld [vmem:[#allocation2] sm:$0x3]   ;;  %p79_p4 = pnand %p78_p3, %p72_p0 }
   0xe   :  { %10 = vst.msk [vmem:[#allocation0] ss:$8 sm:$0x3] %vm9_vm0, %v8_v5   ;;  %18 = vrot.lane.b32.xlu0 %v17_v3, %s95_s9  ;;  %v35_v6 = vld [vmem:[#allocation2] sm:$0x3]  }
   0xf   :  { %30 = vrot.lane.b32.xlu1 %v29_v4, %s96_s10  ;;  %v41_v7 = vld [vmem:[#allocation2] sm:$0x3]  }
  0x10   :  { %v47_v8 = vld [vmem:[#allocation2] sm:$0x3]  }
  0x12   :  { %36 = vrot.lane.b32.xlu0 %v35_v6, %s97_s11 }
  0x13   :  { %42 = vrot.lane.b32.xlu1 %v41_v7, %s98_s12 }
  0x16   :  { %48 = vrot.lane.b32.xlu0 %v47_v8, %s99_s13 }
  0x7c   :  { %v13_v9 = vpop.permute.xlu0 %12  }
  0x7d   :  { %v25_v10 = vpop.permute.xlu1 %24   ;;  %16 = vst.msk [vmem:[#allocation0 + $0x1] ss:$8 sm:$0x3] %vm9_vm0, %v13_v9  }
  0x7e   :  { %28 = vst.msk [vmem:[#allocation0 + $0x3] ss:$8 sm:$0x3] %vm9_vm0, %v25_v10  }
  0x80   :  { %v19_v11 = vpop.permute.xlu0 %18  }
  0x81   :  { %v31_v12 = vpop.permute.xlu1 %30   ;;  %22 = vst.msk [vmem:[#allocation0 + $0x2] ss:$8 sm:$0x3] %vm9_vm0, %v19_v11  }
  0x82   :  { %34 = vst.msk [vmem:[#allocation0 + $0x4] ss:$8 sm:$0x3] %vm9_vm0, %v31_v12  }
  0x84   :  { %v37_v13 = vpop.permute.xlu0 %36  }
  0x85   :  { %v43_v14 = vpop.permute.xlu1 %42   ;;  %40 = vst.msk [vmem:[#allocation0 + $0x5] ss:$8 sm:$0x3] %vm9_vm0, %v37_v13  }
  0x86   :  { %46 = vst.msk [vmem:[#allocation0 + $0x6] ss:$8 sm:$0x3] %vm9_vm0, %v43_v14  }
  0x88   :  { %v49_v15 = vpop.permute.xlu0 %48  }
  0x89   :  { %52 = vst.msk [vmem:[#allocation0 + $0x7] ss:$8 sm:$0x3] %vm9_vm0, %v49_v15  }
  0x8a   :  { %82 = shalt.err (!%p79_p4)
}
  0x8b   :  { %60 = dma.vmem_to_hbm [thread:$0]  %s58_s15, 256, %s126_s1, [#allocation1]  }
  0x8c   :  { %91 = dma.done.wait [#allocation1], 256  }
  0x8d   :  { %92 = vsyncadd [#allocation1], 4294967040 }
  0x8e   :  { %62 = vsyncpa [#allocation1], 1 }

// kernel: simple_forward.1
= control target key start
LH: loop header
LB: loop body
LE: loop exit
PB: predicated region body
PF: predicated region fallthrough
CT: control target
= control target key end

     0   :  { %s11879_s0 = inlined_call_operand.vmem [shape: bf16[2,1,256], index: 0, kind: input, shape index: {}]   ;;  %s11880_s1 = inlined_call_operand.hbm [shape: f32[2,1,3968], index: 1, kind: input, shape index: {}]   ;;  %s11881_s2 = inlined_call_operand.hbm [shape: bf16[2,256,1024], index: 2, kind: input, shape index: {}]   ;;  %s11882_s3 = inlined_call_operand.hbm [shape: bf16[2,1024,512], index: 3, kind: input, shape index: {}]   ;;  %s11883_s4 = inlined_call_operand.hbm [shape: bf16[2,512,256], index: 4, kind: input, shape index: {}]   ;;  %s11884_s5 = inlined_call_operand.hbm [shape: bf16[2,256,128], index: 5, kind: input, shape index: {}]   ;;  %s11885_s6 = inlined_call_operand.hbm [shape: bf16[2,128,256], index: 6, kind: input, shape index: {}]   ;;  %s11886_s7 = inlined_call_operand.hbm [shape: bf16[2,256,512], index: 7, kind: input, shape index: {}]   ;;  %s11887_s8 = inlined_call_operand.hbm [shape: bf16[2,512,1024], index: 8, kind: input, shape index: {}]   ;;  %s11888_s9 = inlined_call_operand.hbm [shape: bf16[2,1024,256], index: 9, kind: input, shape index: {}]   ;;  %s11889_s10 = inlined_call_operand.vmem [shape: f32[2,1,256], index: 10, kind: output, shape index: {}]  }
   0x1   :  { %11913 = sst [smem:[#allocation30_spill]] %s11879_s0 }
   0x2   :  { %11914 = sst [smem:[#allocation31_spill]] %s11881_s2 }
   0x3   :  { %11915 = sst [smem:[#allocation32_spill]] %s11883_s4 }
   0x4   :  { %11916 = sst [smem:[#allocation33_spill]] %s11885_s6 }
   0x5   :  { %11917 = sst [smem:[#allocation34_spill]] %s11886_s7 }
   0x6   :  { %11918 = sst [smem:[#allocation35_spill]] %s11887_s8 }
   0x7   :  { %11919 = sst [smem:[#allocation36_spill]] %s11888_s9 }
   0x8   :  { %11920 = sst [smem:[#allocation37_spill]] %s11889_s10 }
   0x9   :  { %15 = vsyncpa [#allocation3], 0 }
   0xa   :  { %17 = vsyncpa [#allocation3 + $0x1], 0 }
   0xb   :  { %18 = vsyncpa [#allocation5], 0 }
   0xc   :  { %20 = vsyncpa [#allocation5 + $0x1], 0 }
   0xd   :  { %21 = vsyncpa [#allocation8], 0 }
   0xe   :  { %23 = vsyncpa [#allocation8 + $0x1], 0 }
   0xf   :  { %24 = vsyncpa [#allocation11], 0 }
  0x10   :  { %26 = vsyncpa [#allocation11 + $0x1], 0 }
  0x11   :  { %27 = vsyncpa [#allocation14], 0 }
  0x12   :  { %29 = vsyncpa [#allocation14 + $0x1], 0  ;;  %s10307_s13 = smov 0   ;;  %s10309_s14 = smov 0  }
  0x13   :  { %s10311_s15 = smov 0   ;;  %s10313_s16 = smov 0  }
  0x14 LB: > { %11921 = sst [smem:[#allocation21_spill]] %s10223_s14  ;;  %s10326_s17 = sadd.s32 4294967295, %s10231_s16   ;;  %s10231_s16 = sphi %s10313_s16, %s11964_s16   ;;  %s10227_s15 = sphi %s10311_s15, %s11967_s15   ;;  %s10223_s14 = sphi %s10309_s14, %s11966_s14   ;;  %s10219_s13 = sphi %s10307_s13, %s11965_s13  }
  0x15   : > { %11922 = sst [smem:[#allocation22_spill]] %s10227_s15  ;;  %s10329_s18 = sadd.s32 1, %s10231_s16  }
  0x16   : > { %11923 = sst [smem:[#allocation23_spill]] %s10326_s17  ;;  %s65_s19 = ssub.s32 %s10231_s16, %s10329_s18 }
  0x17   : > { %11924 = sst [smem:[#allocation24_spill]] %s10329_s18  ;;  %s68_s20 = sadd.s32 1, %s10227_s15 }
  0x18   : > { %p66_p0 = scmp.eq.s32.totalorder %s65_s19, 0  ;;  %p75_p1 = scmp.ne.s32.totalorder %s10227_s15, %s10223_s14 }
  0x19   : > { %p76_p2 = scmp.eq.s32.totalorder %s10231_s16, 0  ;;  %p81_p3 = scmp.ne.s32.totalorder %s10223_s14, %s10219_s13 }
  0x1a   : > { %s10339_s21 = scalar_select %p66_p0, %s10227_s15, %s68_s20  }
  0x1b   : > { %p77_p4 = por %p76_p2, %p75_p1  ;;  %p82_p5 = scmp.eq.s32.totalorder %s10326_s17, 0 }
  0x1c   : > { %11925 = sst [smem:[#allocation25_spill]] %s10339_s21  ;;  %p9074_p6 = scmp.lt.s32.totalorder %s10231_s16, 2 }
  0x1d   : > { %p10343_p7 = por %p82_p5, %p81_p3  ;;  %s10348_s23 = sand.u32 1, %s10227_s15  }
  0x1e   : > { %p10350_p8 = pnand %p9074_p6, %p77_p4  ;;  %s10355_s25 = sand.u32 1, %s10231_s16  }
  0x1f   : > { %s11926_s22 = scalar_select %p10343_p7, 1, 0 }
  0x20   : > { %s11890_s26 = sshll.u32 %s10348_s23, 10  ;;  %s11891_s27 = sshll.u32 %s10231_s16, 14 }
  0x21   : > { %11927 = sst [smem:[#allocation26_spill]] %s11926_s22  ;;  %s369_s28 = scalar_lea.vmem [#allocation4], %s11890_s26 }
  0x22   : > { %s376_s29 = sshll.u32 %s369_s28, 4  ;;  %s11929_s2 = sld [smem:[#allocation31_spill]]  ;;  %s10368_s29 = int_to_ptr.vmem [resolvable:$true] %s376_s29 }
  0x23   : > { %p10375_p10 = pneg %p10350_p8 }
  0x28   : > { %s10366_s12 = scalar_lea.hbm %s11929_s2, %s11891_s27  ;;  %s9934_s11 = scalar_lea.hbm %s11929_s2, 32768 }
  0x29   : > { %s9929_s19 = scalar_lea.hbm %s10366_s12, 16384  ;;  %p9935_p13 = scmp.lt.s32.totalorder %s10366_s12, %s11929_s2 }
  0x2a   : > { %p9930_p9 = scmp.ne.s32.totalorder %s10366_s12, %s9929_s19  ;;  %p9936_p0 = scmp.lt.s32.totalorder %s9934_s11, %s9929_s19 }
  0x2c   : > { %p9932_p11 = pnand %p10375_p10, %p9930_p9  ;;  %p9937_p1 = por %p9936_p0, %p9935_p13 }
  0x2e   : > { %p9933_p12 = pneg %p9932_p11 }
  0x30   : > { %p9938_p2 = pnand %p9937_p1, %p9933_p12 }
  0x32   : > { %9941 = shalt.err (!%p9938_p2)
}
  0x33   : > { %s9942_s13 = scalar_lea.vmem %s10368_s29, 16384  ;;  %s10233_s21 = smov [#allocation4]  }
  0x34   : > { %p9943_p3 = scmp.ne.s32.totalorder %s10368_s29, %s9942_s13  ;;  %s9947_s28 = sshll.u32 %s10233_s21, 4  ;;  %s9948_s28 = int_to_ptr.vmem [resolvable:$false] %s9947_s28 }
  0x35   : > { %s9949_s30 = scalar_lea.vmem %s9948_s28, 32768  ;;  %p9950_p6 = scmp.lt.s32.totalorder %s10368_s29, %s9948_s28 }
  0x36   : > { %p9945_p4 = pnand %p9943_p3, %p10375_p10  ;;  %p9951_p9 = scmp.lt.s32.totalorder %s9949_s30, %s9942_s13 }
  0x38   : > { %p9946_p5 = pneg %p9945_p4  ;;  %p9952_p11 = por %p9951_p9, %p9950_p6 }
  0x3a   : > { %p9953_p7 = pnand %p9952_p11, %p9946_p5 }
  0x3c   : > { %9956 = shalt.err (!%p9953_p7)
}
  0x3d   : > { %s11896_s26 = smov 512   ;;  %s11897_s21 = smov 32  }
  0x3e   : > { %s11931_s27 = scalar_lea.sflag [#allocation5], %s10355_s25  ;;  %s11932_s13 = sshll.u32 %s10231_s16, 14 }
  0x3f   : > { %9052 = dma.hbm_to_vmem [thread:$0]  (!%p10350_p8), %s10366_s12, 16384, %s10368_s29, %s11931_s27, %s11896_s26, %s11896_s26, %s11897_s21  }
  0x40   : > { %s11933_s9 = sld [smem:[#allocation36_spill]]  ;;  %p8053_p7 = scmp.ge.s32.totalorder %s10231_s16, 1 }
  0x41   : > { %s11935_s30 = sshll.u32 %s10348_s23, 10  ;;  %p531_p12 = scmp.lt.s32.totalorder %s10231_s16, 3 }
  0x42   : > { %s10412_s2 = scalar_lea.vmem [#allocation15], %s11935_s30  ;;  %s11898_s18 = sshll.u32 %s10348_s23, 9 }
  0x43   : > { %p10417_p13 = pnand %p8053_p7, %p531_p12  ;;  %s8997_s29 = sshll.u32 %s10231_s16, 13 }
  0x44   : > { %s411_s12 = scalar_lea.vmem [#allocation7], %s11898_s18  ;;  %s11938_s4 = sld [smem:[#allocation32_spill]] }
  0x45   : > { %s11936_s10 = scalar_select %p10417_p13, 1, 0 }
  0x46   : > { %s10407_s28 = scalar_lea.hbm %s11933_s9, %s11932_s13  ;;  %s418_s27 = sshll.u32 %s411_s12, 4  ;;  %s10431_s27 = int_to_ptr.vmem [resolvable:$true] %s418_s27 }
  0x47   : > { %11934 = sst [smem:[#allocation27_spill]] %s10407_s28  ;;  %s11906_s30 = scalar_lea.sflag [#allocation8], %s10355_s25 }
  0x48   : > { %11937 = sst [smem:[#allocation28_spill]] %s11936_s10 }
  0x4a   : > { %s10429_s11 = scalar_lea.hbm %s11938_s4, %s8997_s29  ;;  %s9962_s12 = scalar_lea.hbm %s11938_s4, 16384 }
  0x4b   : > { %s9957_s15 = scalar_lea.hbm %s10429_s11, 8192  ;;  %p9963_p3 = scmp.lt.s32.totalorder %s10429_s11, %s11938_s4 }
  0x4c   : > { %p9958_p0 = scmp.ne.s32.totalorder %s10429_s11, %s9957_s15  ;;  %p9964_p4 = scmp.lt.s32.totalorder %s9962_s12, %s9957_s15 }
  0x4e   : > { %p9960_p1 = pnand %p9958_p0, %p10375_p10  ;;  %p9965_p5 = por %p9964_p4, %p9963_p3 }
  0x50   : > { %p9961_p2 = pneg %p9960_p1 }
  0x52   : > { %p9966_p6 = pnand %p9965_p5, %p9961_p2 }
  0x54   : > { %9969 = shalt.err (!%p9966_p6)
}
  0x55   : > { %s9970_s19 = scalar_lea.vmem %s10431_s27, 8192  ;;  %s10236_s13 = smov [#allocation7]  }
  0x56   : > { %p9971_p9 = scmp.ne.s32.totalorder %s10431_s27, %s9970_s19  ;;  %s9975_s26 = sshll.u32 %s10236_s13, 4  ;;  %s9976_s26 = int_to_ptr.vmem [resolvable:$false] %s9975_s26 }
  0x57   : > { %s9977_s21 = scalar_lea.vmem %s9976_s26, 16384  ;;  %p9978_p12 = scmp.lt.s32.totalorder %s10431_s27, %s9976_s26 }
  0x58   : > { %p9973_p11 = pnand %p9971_p9, %p10375_p10  ;;  %p9979_p0 = scmp.lt.s32.totalorder %s9977_s21, %s9970_s19 }
  0x5a   : > { %p9974_p7 = pneg %p9973_p11  ;;  %p9980_p1 = por %p9979_p0, %p9978_p12 }
  0x5c   : > { %p9981_p13 = pnand %p9980_p1, %p9974_p7 }
  0x5e   : > { %9984 = shalt.err (!%p9981_p13)
}
  0x5f   : > { %s11907_s0 = smov 128   ;;  %s11908_s15 = smov 8  }
  0x60   : > { %9058 = dma.hbm_to_vmem [thread:$0]  (!%p10350_p8), %s10429_s11, 8192, %s10431_s27, %s11906_s30, %s11907_s0, %s11907_s0, %s11908_s15  }
  0x61   : > { %s11939_s7 = sld [smem:[#allocation34_spill]]  ;;  %s11940_s13 = sshll.u32 %s10348_s23, 9 }
  0x62   : > { %s474_s26 = scalar_lea.vmem [#allocation12], %s11940_s13  ;;  %s8038_s4 = sshll.u32 %s10348_s23, 7 }
  0x63   : > { %s481_s21 = sshll.u32 %s474_s26, 4  ;;  %s8998_s17 = sshll.u32 %s10231_s16, 11  ;;  %s10469_s21 = int_to_ptr.vmem [resolvable:$true] %s481_s21 }
  0x64   : > { %11941 = sst [smem:[#allocation29_spill]] %s10469_s21  ;;  %s432_s22 = scalar_lea.vmem [#allocation9], %s8038_s4 }
  0x65   : > { %s439_s14 = sshll.u32 %s432_s22, 4  ;;  %s10475_s27 = scalar_lea.hbm %s11884_s5, %s8998_s17  ;;  %s10477_s14 = int_to_ptr.vmem [resolvable:$true] %s439_s14 }
  0x66   : > { %s11942_s6 = sld [smem:[#allocation33_spill]]  ;;  %s453_s12 = scalar_lea.vmem [#allocation10], %s8038_s4 }
  0x67   : > { %s10464_s19 = scalar_lea.hbm %s11939_s7, %s8997_s29  ;;  %s460_s13 = sshll.u32 %s453_s12, 4  ;;  %s10484_s13 = int_to_ptr.vmem [resolvable:$true] %s460_s13 }
  0x68   : > { %s8032_s22 = sshll.u32 %s10348_s23, 11  ;;  %s11909_s26 = scalar_lea.sflag [#allocation11], %s10355_s25 }
  0x6c   : > { %s10482_s18 = scalar_lea.hbm %s11942_s6, %s8998_s17  ;;  %s9990_s11 = scalar_lea.hbm %s11942_s6, 4096 }
  0x6d   : > { %s9985_s30 = scalar_lea.hbm %s10482_s18, 2048  ;;  %p9991_p4 = scmp.lt.s32.totalorder %s10482_s18, %s11942_s6 }
  0x6e   : > { %p9986_p13 = scmp.ne.s32.totalorder %s10482_s18, %s9985_s30  ;;  %p9992_p5 = scmp.lt.s32.totalorder %s9990_s11, %s9985_s30 }
  0x70   : > { %p9988_p2 = pnand %p9986_p13, %p10375_p10  ;;  %p9993_p6 = por %p9992_p5, %p9991_p4 }
  0x72   : > { %p9989_p3 = pneg %p9988_p2 }
  0x74   : > { %p9994_p9 = pnand %p9993_p6, %p9989_p3 }
  0x76   : > { %9997 = shalt.err (!%p9994_p9)
}
  0x77   : > { %s9998_s4 = scalar_lea.vmem %s10484_s13, 2048  ;;  %s10239_s12 = smov [#allocation10]  }
  0x78   : > { %p9999_p11 = scmp.ne.s32.totalorder %s10484_s13, %s9998_s4  ;;  %s10003_s9 = sshll.u32 %s10239_s12, 4  ;;  %s10004_s9 = int_to_ptr.vmem [resolvable:$false] %s10003_s9 }
  0x79   : > { %s10005_s10 = scalar_lea.vmem %s10004_s9, 4096  ;;  %p10006_p0 = scmp.lt.s32.totalorder %s10484_s13, %s10004_s9 }
  0x7a   : > { %p10001_p7 = pnand %p9999_p11, %p10375_p10  ;;  %p10007_p1 = scmp.lt.s32.totalorder %s10005_s10, %s9998_s4 }
  0x7c   : > { %p10002_p12 = pneg %p10001_p7  ;;  %p10008_p13 = por %p10007_p1, %p10006_p0 }
  0x7e   : > { %p10009_p2 = pnand %p10008_p13, %p10002_p12 }
  0x80   : > { %10012 = shalt.err (!%p10009_p2)
}
  0x81   : > { %9064 = dma.hbm_to_vmem [thread:$0]  (!%p10350_p8), %s10482_s18, 2048, %s10484_s13, %s11909_s26, %s11907_s0, %s11907_s0, %s11908_s15  }
  0x82   : > { %s8996_s30 = sshll.u32 %s10231_s16, 15  ;;  %s390_s4 = scalar_lea.vmem [#allocation6], %s8032_s22 }
  0x83   : > { %s10517_s29 = scalar_lea.hbm %s11882_s3, %s8996_s30  ;;  %s397_s12 = sshll.u32 %s390_s4, 4  ;;  %s10521_s12 = int_to_ptr.vmem [resolvable:$true] %s397_s12 }
  0x84   : > { %s11943_s8 = sld [smem:[#allocation35_spill]]  ;;  %s495_s18 = scalar_lea.vmem [#allocation13], %s8032_s22 }
  0x85   : > { %s502_s13 = sshll.u32 %s495_s18, 4  ;;  %s9025_s11 = smul.u32 31, %s10348_s23  ;;  %s10530_s13 = int_to_ptr.vmem [resolvable:$true] %s502_s13 }
  0x86   : > { %s492_s17 = scalar_lea.sflag [#allocation14], %s10355_s25 }
  0x8a   : > { %s10526_s6 = scalar_lea.hbm %s11943_s8, %s8996_s30  ;;  %s10018_s30 = scalar_lea.hbm %s11943_s8, 65536 }
  0x8b   : > { %s10013_s0 = scalar_lea.hbm %s10526_s6, 32768  ;;  %p10019_p6 = scmp.lt.s32.totalorder %s10526_s6, %s11943_s8 }
  0x8c   : > { %p10014_p3 = scmp.ne.s32.totalorder %s10526_s6, %s10013_s0  ;;  %p10020_p9 = scmp.lt.s32.totalorder %s10018_s30, %s10013_s0 }
  0x8e   : > { %p10016_p4 = pnand %p10014_p3, %p10375_p10  ;;  %p10021_p11 = por %p10020_p9, %p10019_p6 }
  0x90   : > { %p10017_p5 = pneg %p10016_p4 }
  0x92   : > { %p10022_p7 = pnand %p10021_p11, %p10017_p5 }
  0x94   : > { %10025 = shalt.err (!%p10022_p7)
}
  0x95   : > { %s10026_s22 = scalar_lea.vmem %s10530_s13, 32768  ;;  %s10240_s18 = smov [#allocation13]  }
  0x96   : > { %p10027_p12 = scmp.ne.s32.totalorder %s10530_s13, %s10026_s22  ;;  %s10031_s15 = sshll.u32 %s10240_s18, 4  ;;  %s10032_s15 = int_to_ptr.vmem [resolvable:$false] %s10031_s15 }
  0x97   : > { %s10033_s4 = scalar_lea.vmem %s10032_s15, 65536  ;;  %p10034_p13 = scmp.lt.s32.totalorder %s10530_s13, %s10032_s15 }
  0x98   : > { %p10029_p0 = pnand %p10027_p12, %p10375_p10  ;;  %p10035_p2 = scmp.lt.s32.totalorder %s10033_s4, %s10026_s22 }
  0x9a   : > { %p10030_p1 = pneg %p10029_p0  ;;  %p10036_p3 = por %p10035_p2, %p10034_p13 }
  0x9c   : > { %p10037_p4 = pnand %p10036_p3, %p10030_p1 }
  0x9e   : > { %10040 = shalt.err (!%p10037_p4)
}
  0x9f   : > { %s11944_s0 = smov 32   ;;  %s11945_s30 = smov 512  }
  0xa0   : > { %9070 = dma.hbm_to_vmem [thread:$0]  (!%p10350_p8), %s10526_s6, 32768, %s10530_s13, %s492_s17, %s11945_s30, %s11945_s30, %s11944_s0  }
  0xa1   : > { %s9026_s9 = smul.u32 496, %s10231_s16  ;;  %s350_s10 = scalar_lea.vmem [#allocation2], %s9025_s11 }
  0xa2   : > { %s358_s22 = sshll.u32 %s350_s10, 4  ;;  %s347_s26 = scalar_lea.sflag [#allocation3], %s10348_s23  ;;  %s359_s22 = int_to_ptr.vmem [resolvable:$true] %s358_s22 }
  0xa3   : > { %s356_s4 = scalar_lea.hbm %s11880_s1, %s9026_s9  ;;  %s10046_s7 = scalar_lea.hbm %s11880_s1, 992 }
  0xa4   : > { %s10041_s8 = scalar_lea.hbm %s356_s4, 496  ;;  %p10047_p11 = scmp.lt.s32.totalorder %s356_s4, %s11880_s1 }
  0xa5   : > { %p10042_p5 = scmp.ne.s32.totalorder %s356_s4, %s10041_s8  ;;  %p10048_p7 = scmp.lt.s32.totalorder %s10046_s7, %s10041_s8 }
  0xa7   : > { %p10044_p6 = pnand %p10042_p5, %p10375_p10  ;;  %p10049_p12 = por %p10048_p7, %p10047_p11 }
  0xa9   : > { %p10045_p9 = pneg %p10044_p6 }
  0xab   : > { %p10050_p0 = pnand %p10049_p12, %p10045_p9 }
  0xad   : > { %10053 = shalt.err (!%p10050_p0)
}
  0xae   : > { %s10054_s13 = scalar_lea.vmem %s359_s22, 496  ;;  %s10241_s23 = smov [#allocation2]  }
  0xaf   : > { %p10055_p1 = scmp.ne.s32.totalorder %s359_s22, %s10054_s13  ;;  %s10059_s11 = sshll.u32 %s10241_s23, 4  ;;  %s10060_s11 = int_to_ptr.vmem [resolvable:$false] %s10059_s11 }
  0xb0   : > { %s10061_s0 = scalar_lea.vmem %s10060_s11, 992  ;;  %p10062_p3 = scmp.lt.s32.totalorder %s359_s22, %s10060_s11 }
  0xb1   : > { %p10057_p13 = pnand %p10055_p1, %p10375_p10  ;;  %p10063_p4 = scmp.lt.s32.totalorder %s10061_s0, %s10054_s13 }
  0xb3   : > { %p10058_p2 = pneg %p10057_p13  ;;  %p10064_p5 = por %p10063_p4, %p10062_p3 }
  0xb5   : > { %p10065_p6 = pnand %p10064_p5, %p10058_p2 }
  0xb7   : > { %10068 = shalt.err (!%p10065_p6)
}
  0xb8   : > { %9049 = dma.hbm_to_vmem [thread:$0]  (!%p10350_p8), %s356_s4, 496, %s359_s22, %s347_s26  }
  0xb9   : > { %s10069_s7 = scalar_lea.hbm %s10517_s29, 32768  ;;  %s10074_s21 = scalar_lea.hbm %s11882_s3, 65536 }
  0xba   : > { %p10070_p9 = scmp.ne.s32.totalorder %s10517_s29, %s10069_s7  ;;  %p10075_p12 = scmp.lt.s32.totalorder %s10517_s29, %s11882_s3 }
  0xbb   : > { %p10076_p0 = scmp.lt.s32.totalorder %s10074_s21, %s10069_s7 }
  0xbc   : > { %p10072_p11 = pnand %p10070_p9, %p10375_p10 }
  0xbd   : > { %p10077_p1 = por %p10076_p0, %p10075_p12 }
  0xbe   : > { %p10073_p7 = pneg %p10072_p11 }
  0xc0   : > { %p10078_p13 = pnand %p10077_p1, %p10073_p7 }
  0xc2   : > { %10081 = shalt.err (!%p10078_p13)
}
  0xc3   : > { %s10082_s26 = scalar_lea.vmem %s10521_s12, 32768  ;;  %s10242_s10 = smov [#allocation6]  }
  0xc4   : > { %p10083_p2 = scmp.ne.s32.totalorder %s10521_s12, %s10082_s26  ;;  %s10087_s22 = sshll.u32 %s10242_s10, 4  ;;  %s10088_s22 = int_to_ptr.vmem [resolvable:$false] %s10087_s22 }
  0xc5   : > { %s10089_s18 = scalar_lea.vmem %s10088_s22, 65536  ;;  %p10090_p5 = scmp.lt.s32.totalorder %s10521_s12, %s10088_s22 }
  0xc6   : > { %p10085_p3 = pnand %p10083_p2, %p10375_p10  ;;  %p10091_p6 = scmp.lt.s32.totalorder %s10089_s18, %s10082_s26 }
  0xc8   : > { %p10086_p4 = pneg %p10085_p3  ;;  %p10092_p9 = por %p10091_p6, %p10090_p5 }
  0xca   : > { %p10093_p11 = pnand %p10092_p9, %p10086_p4 }
  0xcc   : > { %10096 = shalt.err (!%p10093_p11)
}
  0xcd   : > { %s10243_s15 = smov 256   ;;  %s10244_s4 = smov 16  }
  0xce   : > { %s11946_s6 = scalar_lea.sflag [#allocation5], %s10355_s25  ;;  %s11947_s16 = sshll.u32 %s10412_s2, 4  ;;  %s10605_s16 = int_to_ptr.vmem [resolvable:$true] %s11947_s16 }
  0xcf   : > { %9055 = dma.hbm_to_vmem [thread:$0]  (!%p10350_p8), %s10517_s29, 32768, %s10521_s12, %s11946_s6, %s10243_s15, %s10243_s15, %s10244_s4  }
  0xd0   : > { %s10097_s13 = scalar_lea.hbm %s10475_s27, 2048  ;;  %s10102_s0 = scalar_lea.hbm %s11884_s5, 4096 }
  0xd1   : > { %p10098_p7 = scmp.ne.s32.totalorder %s10475_s27, %s10097_s13  ;;  %p10103_p1 = scmp.lt.s32.totalorder %s10475_s27, %s11884_s5 }
  0xd2   : > { %p10104_p13 = scmp.lt.s32.totalorder %s10102_s0, %s10097_s13 }
  0xd3   : > { %p10100_p12 = pnand %p10098_p7, %p10375_p10 }
  0xd4   : > { %p10105_p2 = por %p10104_p13, %p10103_p1 }
  0xd5   : > { %p10101_p0 = pneg %p10100_p12 }
  0xd7   : > { %p10106_p3 = pnand %p10105_p2, %p10101_p0 }
  0xd9   : > { %10109 = shalt.err (!%p10106_p3)
}
  0xda   : > { %s10110_s2 = scalar_lea.vmem %s10477_s14, 2048  ;;  %s10245_s29 = smov [#allocation9]  }
  0xdb   : > { %p10111_p4 = scmp.ne.s32.totalorder %s10477_s14, %s10110_s2  ;;  %s10115_s12 = sshll.u32 %s10245_s29, 4  ;;  %s10116_s12 = int_to_ptr.vmem [resolvable:$false] %s10115_s12 }
  0xdc   : > { %s10117_s28 = scalar_lea.vmem %s10116_s12, 4096  ;;  %p10118_p9 = scmp.lt.s32.totalorder %s10477_s14, %s10116_s12 }
  0xdd   : > { %p10113_p5 = pnand %p10111_p4, %p10375_p10  ;;  %p10119_p11 = scmp.lt.s32.totalorder %s10117_s28, %s10110_s2 }
  0xdf   : > { %p10114_p6 = pneg %p10113_p5  ;;  %p10120_p7 = por %p10119_p11, %p10118_p9 }
  0xe1   : > { %p10121_p12 = pnand %p10120_p7, %p10114_p6 }
  0xe3   : > { %10124 = shalt.err (!%p10121_p12)
}
  0xe4   : > { %s10246_s21 = smov 64   ;;  %s10247_s30 = smov 4  }
  0xe5   : > { %s11948_s9 = scalar_lea.sflag [#allocation8], %s10355_s25  ;;  %s10125_s26 = scalar_lea.hbm %s10464_s19, 8192 }
  0xe6   : > { %9061 = dma.hbm_to_vmem [thread:$0]  (!%p10350_p8), %s10475_s27, 2048, %s10477_s14, %s11948_s9, %s10246_s21, %s10246_s21, %s10247_s30  }
  0xe7   : > { %p10126_p0 = scmp.ne.s32.totalorder %s10464_s19, %s10125_s26  ;;  %s11949_s18 = sld [smem:[#allocation34_spill]] }
  0xe9   : > { %p10128_p1 = pnand %p10126_p0, %p10375_p10 }
  0xeb   : > { %p10129_p13 = pneg %p10128_p1 }
  0xed   : > { %s10130_s6 = scalar_lea.hbm %s11949_s18, 16384  ;;  %p10131_p2 = scmp.lt.s32.totalorder %s10464_s19, %s11949_s18 }
  0xee   : > { %p10132_p3 = scmp.lt.s32.totalorder %s10130_s6, %s10125_s26 }
  0xf0   : > { %p10133_p4 = por %p10132_p3, %p10131_p2 }
  0xf2   : > { %p10134_p5 = pnand %p10133_p4, %p10129_p13 }
  0xf4   : > { %10137 = shalt.err (!%p10134_p5)
}
  0xf5   : > { %s11950_s11 = sld [smem:[#allocation29_spill]]  ;;  %s10248_s27 = smov [#allocation12]  }
  0xf6   : > { %s10143_s0 = sshll.u32 %s10248_s27, 4  ;;  %s10144_s0 = int_to_ptr.vmem [resolvable:$false] %s10143_s0 }
  0xf7   : > { %s10145_s7 = scalar_lea.vmem %s10144_s0, 16384 }
  0xfb   : > { %s10138_s14 = scalar_lea.vmem %s11950_s11, 8192  ;;  %p10146_p7 = scmp.lt.s32.totalorder %s11950_s11, %s10144_s0 }
  0xfc   : > { %p10139_p6 = scmp.ne.s32.totalorder %s11950_s11, %s10138_s14  ;;  %p10147_p12 = scmp.lt.s32.totalorder %s10145_s7, %s10138_s14 }
  0xfe   : > { %p10141_p9 = pnand %p10139_p6, %p10375_p10  ;;  %p10148_p0 = por %p10147_p12, %p10146_p7 }
 0x100   : > { %p10142_p11 = pneg %p10141_p9 }
 0x102   : > { %p10149_p1 = pnand %p10148_p0, %p10142_p11 }
 0x104   : > { %10152 = shalt.err (!%p10149_p1)
}
 0x105   : > { %s11951_s8 = scalar_lea.sflag [#allocation11], %s10355_s25  ;;  %s11952_s2 = sld [smem:[#allocation27_spill]] }
 0x106   : > { %9067 = dma.hbm_to_vmem [thread:$0]  (!%p10350_p8), %s10464_s19, 8192, %s11950_s11, %s11951_s8, %s10243_s15, %s10243_s15, %s10244_s4  }
 0x107   : > { %s11953_s21 = sld [smem:[#allocation36_spill]] }
 0x10b   : > { %s10153_s29 = scalar_lea.hbm %s11952_s2, 16384 }
 0x10c   : > { %p10154_p13 = scmp.ne.s32.totalorder %s11952_s2, %s10153_s29 }
 0x10d   : > { %s10158_s30 = scalar_lea.hbm %s11953_s21, 32768  ;;  %p10159_p4 = scmp.lt.s32.totalorder %s11952_s2, %s11953_s21 }
 0x10e   : > { %p10156_p2 = pnand %p10154_p13, %p10375_p10  ;;  %p10160_p5 = scmp.lt.s32.totalorder %s10158_s30, %s10153_s29 }
 0x110   : > { %p10157_p3 = pneg %p10156_p2  ;;  %p10161_p6 = por %p10160_p5, %p10159_p4 }
 0x112   : > { %p10162_p9 = pnand %p10161_p6, %p10157_p3 }
 0x114   : > { %10165 = shalt.err (!%p10162_p9)
}
 0x115   : > { %s10166_s19 = scalar_lea.vmem %s10605_s16, 16384  ;;  %s10249_s15 = smov [#allocation15]  }
 0x116   : > { %p10167_p11 = scmp.ne.s32.totalorder %s10605_s16, %s10166_s19  ;;  %s10171_s4 = sshll.u32 %s10249_s15, 4  ;;  %s10172_s4 = int_to_ptr.vmem [resolvable:$false] %s10171_s4 }
 0x117   : > { %s10173_s10 = scalar_lea.vmem %s10172_s4, 32768  ;;  %p10174_p0 = scmp.lt.s32.totalorder %s10605_s16, %s10172_s4 }
 0x118   : > { %p10169_p7 = pnand %p10167_p11, %p10375_p10  ;;  %p10175_p1 = scmp.lt.s32.totalorder %s10173_s10, %s10166_s19 }
 0x11a   : > { %p10170_p12 = pneg %p10169_p7  ;;  %p10176_p13 = por %p10175_p1, %p10174_p0 }
 0x11c   : > { %p10177_p2 = pnand %p10176_p13, %p10170_p12 }
 0x11e   : > { %10180 = shalt.err (!%p10177_p2)
}
 0x11f   : > { %s11954_s22 = smov 8   ;;  %s11955_s18 = smov 128  }
 0x120   : > { %9073 = dma.hbm_to_vmem [thread:$0]  (!%p10350_p8), %s11952_s2, 16384, %s10605_s16, %s492_s17, %s11955_s18, %s11955_s18, %s11954_s22  }
 0x121   : > { %s11956_s20 = sld [smem:[#allocation28_spill]] }
 0x127   : > { %p11957_p10 = scmp.ne.s32.totalorder %s11956_s20, 0 }
 0x128   : > { %s11958_s6 = sld [smem:[#allocation21_spill]] (!%p11957_p10) }
 0x129   : > { %535 = sbr.rel (%p11957_p10) target bundleno = 2401 (0x961), region = 60  ;;  %s11959_s13 = sld [smem:[#allocation26_spill]] (!%p11957_p10) }
 0x12e   : > { %s10682_s23 = sand.u32 1, %s11958_s6  }
 0x12f   : > { %s9027_s11 = smul.u32 31, %s10682_s23  ;;  %s538_s14 = scalar_lea.sflag [#allocation3], %s10682_s23 }
 0x130   : > { %p11960_p3 = scmp.ne.s32.totalorder %s11959_s13, 0 }
 0x131   : > { %s10686_s24 = scalar_lea.vmem [#allocation2], %s9027_s11 }
 0x132   : > { %10198 = dma.done.wait (%p11960_p3), %s538_s14, 496  }
 0x133   : > { %10200 = vsyncadd (%p11960_p3), %s538_s14, 4294966800  ;;  %s11961_s25 = sld [smem:[#allocation23_spill]]  ;;  %s8054_s16 = sshll.u32 %s10682_s23, 10 }
 0x134   : > { %s10696_s0 = scalar_lea.vmem [#allocation4], %s8054_s16 }
 0x139   : > { %s546_s17 = sand.u32 1, %s11961_s25  }
 0x13a   : > { %s547_s27 = scalar_lea.sflag [#allocation5], %s546_s17 }
 0x13b   : > { %10202 = dma.done.wait (%p11960_p3), %s547_s27, 49152  }
 0x13c   : > { %10204 = vsyncadd (%p11960_p3), %s547_s27, 4294918144  ;;  %s8055_s7 = sshll.u32 %s10682_s23, 11  ;;  %s8056_s8 = sshll.u32 %s10682_s23, 9 }
 0x13d   : > { %s10704_s2 = scalar_lea.vmem [#allocation6], %s8055_s7  ;;  %s565_s29 = scalar_lea.sflag [#allocation8], %s546_s17 }
 0x13e   : > { %s10706_s12 = scalar_lea.vmem [#allocation7], %s8056_s8 }
 0x13f   : > { %10206 = dma.done.wait (%p11960_p3), %s565_s29, 10240  }
 0x140   : > { %10208 = vsyncadd (%p11960_p3), %s565_s29, 4294957056  ;;  %s8057_s28 = sshll.u32 %s10682_s23, 7  ;;  %s583_s30 = scalar_lea.sflag [#allocation11], %s546_s17 }
 0x141   : > { %s10713_s21 = scalar_lea.vmem [#allocation9], %s8057_s28  ;;  %s10715_s9 = scalar_lea.vmem [#allocation10], %s8057_s28 }
 0x142   : > { %10210 = dma.done.wait (%p11960_p3), %s583_s30, 10240  }
 0x143   : > { %10212 = vsyncadd (%p11960_p3), %s583_s30, 4294957056  ;;  %s10721_s26 = scalar_lea.vmem [#allocation12], %s8056_s8  ;;  %s601_s19 = scalar_lea.sflag [#allocation14], %s546_s17 }
 0x144   : > { %s10723_s15 = scalar_lea.vmem [#allocation13], %s8055_s7 }
 0x145   : > { %10214 = dma.done.wait (%p11960_p3), %s601_s19, 49152  }
 0x146   : > { %10216 = vsyncadd (%p11960_p3), %s601_s19, 4294918144  ;;  %v759_v0 = vld [vmem:[%s10696_s0 + $0x1c0] sm:$0xff]  ;;  %v760_v2 = vld [vmem:[%s10696_s0 + $0x1c8] sm:$0xff]  ;;  %p693_p8 = scmp.lt.s32.totalorder %s11961_s25, 1  ;;  %v10250_v35 = vmov 1966171168   ;;  %v844_v37 = vlaneseq }
 0x147   : > { %v763_v1 = vld [vmem:[%s10696_s0 + $0x1e0] sm:$0xff]  ;;  %v764_v4 = vld [vmem:[%s10696_s0 + $0x1e8] sm:$0xff]  ;;  %v842_v36 = vunpack.c.l.s4 %v10250_v35  ;;  %s11962_s18 = sld [smem:[#allocation30_spill]]  ;;  %s11572_s6 = scalar_lea.vmem [#allocation15], %s8054_s16 }
 0x148   : > { %v8122_v3 = vcombine.high %v759_v0, %v763_v1  ;;  %v8121_v5 = vcombine.low %v759_v0, %v763_v1  ;;  %v751_v6 = vld [vmem:[%s10696_s0 + $0x180] sm:$0xff]  ;;  %v8124_v8 = vcombine.high %v760_v2, %v764_v4  ;;  %v8123_v9 = vcombine.low %v760_v2, %v764_v4  ;;  %v752_v11 = vld [vmem:[%s10696_s0 + $0x188] sm:$0xff]  ;;  %s11969_s25 = smov (!%p693_p8, %s11961_s25), 1  ;;  %s11963_s11 = sld [smem:[#allocation37_spill]] }
 0x149   : > { %v755_v7 = vld [vmem:[%s10696_s0 + $0x1a0] sm:$0xff]  ;;  %v756_v12 = vld [vmem:[%s10696_s0 + $0x1a8] sm:$0xff]  ;;  %s8062_s4 = sshll.u32 %s11969_s25, 1  ;;  %v843_v46 = vunpack.c.0.s8 %v842_v36  ;;  %v10759_v47 = vshrl.u32 %v844_v37, 7  ;;  %vm7773_vm0 = vcmp.lt.s32.totalorder %v844_v37, 256 }
 0x14a   : > { %v8114_v10 = vcombine.high %v751_v6, %v755_v7  ;;  %v743_v13 = vld [vmem:[%s10696_s0 + $0x140] sm:$0xff]  ;;  %1538 = vmatprep.subr.bf16.mxu0 %v8122_v3  ;;  %v8116_v14 = vcombine.high %v752_v11, %v756_v12  ;;  %v744_v16 = vld [vmem:[%s10696_s0 + $0x148] sm:$0xff]  ;;  %1579 = vmatprep.subr.bf16.mxu1 %v8124_v8  ;;  %v8113_v18 = vcombine.low %v751_v6, %v755_v7 }
 0x14b   : > { %v747_v15 = vld [vmem:[%s10696_s0 + $0x160] sm:$0xff]  ;;  %v748_v17 = vld [vmem:[%s10696_s0 + $0x168] sm:$0xff]  ;;  %1539 = vmatpush1.bf16.msra.mxu0 %v8121_v5  ;;  %1580 = vmatpush1.bf16.msra.mxu1 %v8123_v9  ;;  %v8115_v19 = vcombine.low %v752_v11, %v756_v12  ;;  %v10771_v56 = vsub.s32 %v843_v46, %v10759_v47 }
 0x14c   : > { %1540 = vmatprep.subr.bf16.mxu0 %v8114_v10  ;;  %v8106_v20 = vcombine.high %v743_v13, %v747_v15  ;;  %1581 = vmatprep.subr.bf16.mxu1 %v8116_v14  ;;  %v8108_v21 = vcombine.high %v744_v16, %v748_v17  ;;  %v735_v22 = vld [vmem:[%s10696_s0 + $0x100] sm:$0xff]  ;;  %v736_v24 = vld [vmem:[%s10696_s0 + $0x108] sm:$0xff]  ;;  %v8105_v26 = vcombine.low %v743_v13, %v747_v15 }
 0x14d   : > { %v739_v23 = vld [vmem:[%s10696_s0 + $0x120] sm:$0xff]  ;;  %v740_v25 = vld [vmem:[%s10696_s0 + $0x128] sm:$0xff]  ;;  %v8107_v27 = vcombine.low %v744_v16, %v748_v17  ;;  %s696_s20 = scalar_lea.vmem %s11962_s18, %s8062_s4 }
 0x14e   : > { %v8098_v28 = vcombine.high %v735_v22, %v739_v23  ;;  %v8100_v29 = vcombine.high %v736_v24, %v740_v25  ;;  %v727_v30 = vld [vmem:[%s10696_s0 + $0xc0] sm:$0xff]  ;;  %v728_v32 = vld [vmem:[%s10696_s0 + $0xc8] sm:$0xff]  ;;  %v8097_v34 = vcombine.low %v735_v22, %v739_v23  ;;  %v8099_v38 = vcombine.low %v736_v24, %v740_v25  ;;  %s700_s14 = scalar_lea.vmem %s11963_s11, %s8062_s4 }
 0x14f   : > { %1541 = vmatpush1.bf16.msra.mxu0 %v8113_v18  ;;  %1582 = vmatpush1.bf16.msra.mxu1 %v8115_v19  ;;  %v731_v31 = vld [vmem:[%s10696_s0 + $0xe0] sm:$0xff]  ;;  %v732_v33 = vld [vmem:[%s10696_s0 + $0xe8] sm:$0xff] }
 0x150   : > { %1542 = vmatprep.subr.bf16.mxu0 %v8106_v20  ;;  %1583 = vmatprep.subr.bf16.mxu1 %v8108_v21  ;;  %v8090_v39 = vcombine.high %v727_v30, %v731_v31  ;;  %v8092_v40 = vcombine.high %v728_v32, %v732_v33  ;;  %v719_v41 = vld [vmem:[%s10696_s0 + $0x80] sm:$0xff]  ;;  %v720_v43 = vld [vmem:[%s10696_s0 + $0x88] sm:$0xff]  ;;  %v8089_v45 = vcombine.low %v727_v30, %v731_v31 }
 0x151   : > { %v723_v42 = vld [vmem:[%s10696_s0 + $0xa0] sm:$0xff]  ;;  %v724_v44 = vld [vmem:[%s10696_s0 + $0xa8] sm:$0xff]  ;;  %v8091_v48 = vcombine.low %v728_v32, %v732_v33 }
 0x152   : > { %v8082_v49 = vcombine.high %v719_v41, %v723_v42  ;;  %v8084_v50 = vcombine.high %v720_v43, %v724_v44  ;;  %v711_v51 = vld [vmem:[%s10696_s0 + $0x40] sm:$0xff]  ;;  %v712_v53 = vld [vmem:[%s10696_s0 + $0x48] sm:$0xff]  ;;  %v8081_v55 = vcombine.low %v719_v41, %v723_v42  ;;  %v8083_v57 = vcombine.low %v720_v43, %v724_v44 }
 0x153   : > { %1543 = vmatpush1.bf16.msra.mxu0 %v8105_v26  ;;  %1584 = vmatpush1.bf16.msra.mxu1 %v8107_v27  ;;  %v715_v52 = vld [vmem:[%s10696_s0 + $0x60] sm:$0xff]  ;;  %v716_v54 = vld [vmem:[%s10696_s0 + $0x68] sm:$0xff] }
 0x154   : > { %1544 = vmatprep.subr.bf16.mxu0 %v8098_v28  ;;  %1585 = vmatprep.subr.bf16.mxu1 %v8100_v29  ;;  %v8074_v58 = vcombine.high %v711_v51, %v715_v52  ;;  %v10773_v59 = vld.sshfl [vmem:[%s696_s20] sm:$0x11 pattern:$0x75316420]  ;;  %v8076_v60 = vcombine.high %v712_v53, %v716_v54  ;;  %v704_v0 = vld [vmem:[%s10696_s0 + $0x8] sm:$0xff]  ;;  %v8073_v2 = vcombine.low %v711_v51, %v715_v52 }
 0x155   : > { %v703_v61 = vld [vmem:[%s10696_s0] sm:$0xff]  ;;  %v840_v63 = vcombine.high %v10773_v59, %v10773_v59  ;;  %v708_v1 = vld [vmem:[%s10696_s0 + $0x28] sm:$0xff]  ;;  %v8075_v4 = vcombine.low %v712_v53, %v716_v54 }
 0x156   : > { %v707_v62 = vld [vmem:[%s10696_s0 + $0x20] sm:$0xff]  ;;  %v8068_v6 = vcombine.high %v704_v0, %v708_v1  ;;  %v824_v9 = vld [vmem:[%s10696_s0 + $0x3c8] sm:$0xff]  ;;  %v8067_v12 = vcombine.low %v704_v0, %v708_v1 }
 0x157   : > { %1545 = vmatpush1.bf16.msra.mxu0 %v8097_v34  ;;  %1586 = vmatpush1.bf16.msra.mxu1 %v8099_v38  ;;  %v10782_v3 = vrot.slane %v840_v63, %v10771_v56  ;;  %v8066_v5 = vcombine.high %v703_v61, %v707_v62  ;;  %v823_v7 = vld [vmem:[%s10696_s0 + $0x3c0] sm:$0xff]  ;;  %v828_v10 = vld [vmem:[%s10696_s0 + $0x3e8] sm:$0xff]  ;;  %v8065_v11 = vcombine.low %v703_v61, %v707_v62 }
 0x158   : > { %1546 = vmatprep.subr.bf16.mxu0 %v8090_v39  ;;  %1587 = vmatprep.subr.bf16.mxu1 %v8092_v40  ;;  %v827_v8 = vld [vmem:[%s10696_s0 + $0x3e0] sm:$0xff]  ;;  %v8188_v14 = vcombine.high %v824_v9, %v828_v10  ;;  %v816_v17 = vld [vmem:[%s10696_s0 + $0x388] sm:$0xff]  ;;  %v8187_v20 = vcombine.low %v824_v9, %v828_v10 }
 0x159   : > { %1570 = vmatprep.mubr.bf16.mxu0 %v10782_v3  ;;  %1611 = vmatprep.mubr.bf16.mxu1 %v10782_v3  ;;  %v8186_v13 = vcombine.high %v823_v7, %v827_v8  ;;  %v815_v15 = vld [vmem:[%s10696_s0 + $0x380] sm:$0xff]  ;;  %v820_v18 = vld [vmem:[%s10696_s0 + $0x3a8] sm:$0xff]  ;;  %v8185_v19 = vcombine.low %v823_v7, %v827_v8 }
 0x15a   : > { %v819_v16 = vld [vmem:[%s10696_s0 + $0x3a0] sm:$0xff]  ;;  %v8180_v22 = vcombine.high %v816_v17, %v820_v18  ;;  %v808_v25 = vld [vmem:[%s10696_s0 + $0x348] sm:$0xff]  ;;  %v8179_v28 = vcombine.low %v816_v17, %v820_v18 }
 0x15b   : > { %1547 = vmatpush1.bf16.msra.mxu0 %v8089_v45  ;;  %1588 = vmatpush1.bf16.msra.mxu1 %v8091_v48  ;;  %v8178_v21 = vcombine.high %v815_v15, %v819_v16  ;;  %v807_v23 = vld [vmem:[%s10696_s0 + $0x340] sm:$0xff]  ;;  %v812_v26 = vld [vmem:[%s10696_s0 + $0x368] sm:$0xff]  ;;  %v8177_v27 = vcombine.low %v815_v15, %v819_v16  ;;  %v766_v15 = vld [vmem:[%s10696_s0 + $0x1f8] sm:$0xff] }
 0x15c   : > { %1548 = vmatprep.subr.bf16.mxu0 %v8082_v49  ;;  %1589 = vmatprep.subr.bf16.mxu1 %v8084_v50  ;;  %v811_v24 = vld [vmem:[%s10696_s0 + $0x360] sm:$0xff]  ;;  %v8172_v30 = vcombine.high %v808_v25, %v812_v26  ;;  %v800_v33 = vld [vmem:[%s10696_s0 + $0x308] sm:$0xff]  ;;  %v8171_v36 = vcombine.low %v808_v25, %v812_v26 }
 0x15d   : > { %v8170_v29 = vcombine.high %v807_v23, %v811_v24  ;;  %v799_v31 = vld [vmem:[%s10696_s0 + $0x300] sm:$0xff]  ;;  %v804_v34 = vld [vmem:[%s10696_s0 + $0x328] sm:$0xff]  ;;  %v8169_v35 = vcombine.low %v807_v23, %v811_v24  ;;  %v10827_v23 = vrot.slane %v10773_v59, %v10771_v56  ;;  %v758_v24 = vld [vmem:[%s10696_s0 + $0x1b8] sm:$0xff] }
 0x15e   : > { %v803_v32 = vld [vmem:[%s10696_s0 + $0x320] sm:$0xff]  ;;  %v8164_v39 = vcombine.high %v800_v33, %v804_v34  ;;  %v792_v42 = vld [vmem:[%s10696_s0 + $0x2c8] sm:$0xff]  ;;  %v8163_v45 = vcombine.low %v800_v33, %v804_v34  ;;  %v750_v59 = vld [vmem:[%s10696_s0 + $0x178] sm:$0xff] }
 0x15f   : > { %1549 = vmatpush1.bf16.msra.mxu0 %v8081_v55  ;;  %1590 = vmatpush1.bf16.msra.mxu1 %v8083_v57  ;;  %v8162_v38 = vcombine.high %v799_v31, %v803_v32  ;;  %v791_v40 = vld [vmem:[%s10696_s0 + $0x2c0] sm:$0xff]  ;;  %v796_v43 = vld [vmem:[%s10696_s0 + $0x2e8] sm:$0xff]  ;;  %v8161_v44 = vcombine.low %v799_v31, %v803_v32  ;;  %v746_v31 = vld [vmem:[%s10696_s0 + $0x158] sm:$0xff] }
 0x160   : > { %1550 = vmatprep.subr.bf16.mxu0 %v8074_v58  ;;  %1591 = vmatprep.subr.bf16.mxu1 %v8076_v60  ;;  %v795_v41 = vld [vmem:[%s10696_s0 + $0x2e0] sm:$0xff]  ;;  %v8156_v49 = vcombine.high %v792_v42, %v796_v43  ;;  %v784_v51 = vld [vmem:[%s10696_s0 + $0x288] sm:$0xff]  ;;  %v8155_v54 = vcombine.low %v792_v42, %v796_v43  ;;  %v8111_v42 = vcombine.low %v746_v31, %v750_v59 }
 0x161   : > { %v8154_v46 = vcombine.high %v791_v40, %v795_v41  ;;  %v783_v48 = vld [vmem:[%s10696_s0 + $0x280] sm:$0xff]  ;;  %v788_v52 = vld [vmem:[%s10696_s0 + $0x2a8] sm:$0xff]  ;;  %v8153_v53 = vcombine.low %v791_v40, %v795_v41  ;;  %v742_v40 = vld [vmem:[%s10696_s0 + $0x138] sm:$0xff] }
 0x162   : > { %v787_v50 = vld [vmem:[%s10696_s0 + $0x2a0] sm:$0xff]  ;;  %v8148_v58 = vcombine.high %v784_v51, %v788_v52  ;;  %v776_v61 = vld [vmem:[%s10696_s0 + $0x248] sm:$0xff]  ;;  %v8147_v0 = vcombine.low %v784_v51, %v788_v52  ;;  %v721_v52 = vld [vmem:[%s10696_s0 + $0x90] sm:$0xff] }
 0x163   : > { %1551 = vmatpush1.bf16.msra.mxu0 %v8073_v2  ;;  %1592 = vmatpush1.bf16.msra.mxu1 %v8075_v4  ;;  %v8146_v55 = vcombine.high %v783_v48, %v787_v50  ;;  %v775_v57 = vld [vmem:[%s10696_s0 + $0x240] sm:$0xff]  ;;  %v780_v62 = vld [vmem:[%s10696_s0 + $0x268] sm:$0xff]  ;;  %v8145_v63 = vcombine.low %v783_v48, %v787_v50  ;;  %v730_v48 = vld [vmem:[%s10696_s0 + $0xd8] sm:$0xff] }
 0x164   : > { %1552 = vmatprep.subr.bf16.mxu0 %v8066_v5  ;;  %1593 = vmatprep.subr.bf16.mxu1 %v8068_v6  ;;  %v779_v60 = vld [vmem:[%s10696_s0 + $0x260] sm:$0xff]  ;;  %v8140_v4 = vcombine.high %v776_v61, %v780_v62  ;;  %v768_v6 = vld [vmem:[%s10696_s0 + $0x208] sm:$0xff]  ;;  %v8139_v9 = vcombine.low %v776_v61, %v780_v62  ;;  %v713_v62 = vld [vmem:[%s10696_s0 + $0x50] sm:$0xff] }
 0x165   : > { %v8138_v1 = vcombine.high %v775_v57, %v779_v60  ;;  %v767_v2 = vld [vmem:[%s10696_s0 + $0x200] sm:$0xff]  ;;  %v772_v7 = vld [vmem:[%s10696_s0 + $0x228] sm:$0xff]  ;;  %v8137_v8 = vcombine.low %v775_v57, %v779_v60  ;;  %v726_v57 = vld [vmem:[%s10696_s0 + $0xb8] sm:$0xff] }
 0x166   : > { %v771_v5 = vld [vmem:[%s10696_s0 + $0x220] sm:$0xff]  ;;  %v8131_v17 = vcombine.low %v768_v6, %v772_v7 }
 0x167   : > { %1553 = vmatpush1.bf16.msra.mxu0 %v8065_v11  ;;  %1594 = vmatpush1.bf16.msra.mxu1 %v8067_v12  ;;  %v8130_v10 = vcombine.high %v767_v2, %v771_v5  ;;  %v761_v11 = vld [vmem:[%s10696_s0 + $0x1d0] sm:$0xff]  ;;  %v8132_v12 = vcombine.high %v768_v6, %v772_v7  ;;  %v8129_v16 = vcombine.low %v767_v2, %v771_v5  ;;  %v718_v2 = vld [vmem:[%s10696_s0 + $0x78] sm:$0xff] }
 0x168   : > { %1554 = vmatprep.subr.bf16.mxu0 %v8186_v13  ;;  %1595 = vmatprep.subr.bf16.mxu1 %v8188_v14  ;;  %v765_v13 = vld [vmem:[%s10696_s0 + $0x1f0] sm:$0xff]  ;;  %v762_v14 = vld [vmem:[%s10696_s0 + $0x1d8] sm:$0xff] }
 0x169   : > { %v8126_v18 = vcombine.high %v761_v11, %v765_v13  ;;  %v8125_v25 = vcombine.low %v761_v11, %v765_v13  ;;  %v8127_v26 = vcombine.low %v762_v14, %v766_v15  ;;  %v705_v5 = vld [vmem:[%s10696_s0 + $0x10] sm:$0xff] }
 0x16a   : > { %v709_v6 = vld [vmem:[%s10696_s0 + $0x30] sm:$0xff] }
 0x16b   : > { %1555 = vmatpush2.bf16.msra.mxu0 %v8185_v19  ;;  %1596 = vmatpush2.bf16.msra.mxu1 %v8187_v20  ;;  %v753_v19 = vld [vmem:[%s10696_s0 + $0x190] sm:$0xff]  ;;  %v8128_v20 = vcombine.high %v762_v14, %v766_v15 }
 0x16c   : > { %1556 = vmatprep.subr.bf16.mxu0 %v8178_v21  ;;  %1597 = vmatprep.subr.bf16.mxu1 %v8180_v22  ;;  %v757_v21 = vld [vmem:[%s10696_s0 + $0x1b0] sm:$0xff]  ;;  %v754_v22 = vld [vmem:[%s10696_s0 + $0x198] sm:$0xff] }
 0x16d   : > { %v8117_v32 = vcombine.low %v753_v19, %v757_v21  ;;  %v8119_v33 = vcombine.low %v754_v22, %v758_v24  ;;  %v825_v13 = vld [vmem:[%s10696_s0 + $0x3d0] sm:$0xff] }
 0x16e   : > { %v829_v14 = vld [vmem:[%s10696_s0 + $0x3f0] sm:$0xff] }
 0x16f   : > { %1557 = vmatpush2.bf16.msra.mxu0 %v8177_v27  ;;  %1598 = vmatpush2.bf16.msra.mxu1 %v8179_v28  ;;  %v8118_v27 = vcombine.high %v753_v19, %v757_v21  ;;  %v745_v28 = vld [vmem:[%s10696_s0 + $0x150] sm:$0xff] }
 0x170   : > { %1558 = vmatprep.subr.bf16.mxu0 %v8170_v29  ;;  %1599 = vmatprep.subr.bf16.mxu1 %v8172_v30  ;;  %v8120_v29 = vcombine.high %v754_v22, %v758_v24  ;;  %v749_v30 = vld [vmem:[%s10696_s0 + $0x170] sm:$0xff] }
 0x171   : > { %v8110_v34 = vcombine.high %v745_v28, %v749_v30  ;;  %v8109_v41 = vcombine.low %v745_v28, %v749_v30  ;;  %v817_v21 = vld [vmem:[%s10696_s0 + $0x390] sm:$0xff] }
 0x172   : > { %v821_v22 = vld [vmem:[%s10696_s0 + $0x3b0] sm:$0xff] }
 0x173   : > { %1559 = vmatpush2.bf16.msra.mxu0 %v8169_v35  ;;  %1600 = vmatpush2.bf16.msra.mxu1 %v8171_v36  ;;  %v737_v35 = vld [vmem:[%s10696_s0 + $0x110] sm:$0xff]  ;;  %v8112_v36 = vcombine.high %v746_v31, %v750_v59 }
 0x174   : > { %1560 = vmatprep.subr.bf16.mxu0 %v8162_v38  ;;  %1601 = vmatprep.subr.bf16.mxu1 %v8164_v39  ;;  %v741_v38 = vld [vmem:[%s10696_s0 + $0x130] sm:$0xff]  ;;  %v738_v39 = vld [vmem:[%s10696_s0 + $0x118] sm:$0xff] }
 0x175   : > { %v8102_v43 = vcombine.high %v737_v35, %v741_v38  ;;  %v8101_v50 = vcombine.low %v737_v35, %v741_v38  ;;  %v809_v30 = vld [vmem:[%s10696_s0 + $0x350] sm:$0xff] }
 0x176   : > { %v813_v31 = vld [vmem:[%s10696_s0 + $0x370] sm:$0xff] }
 0x177   : > { %1561 = vmatpush2.bf16.msra.mxu0 %v8161_v44  ;;  %1602 = vmatpush2.bf16.msra.mxu1 %v8163_v45  ;;  %v729_v44 = vld [vmem:[%s10696_s0 + $0xd0] sm:$0xff]  ;;  %v8104_v45 = vcombine.high %v738_v39, %v742_v40 }
 0x178   : > { %1562 = vmatprep.subr.bf16.mxu0 %v8154_v46  ;;  %1603 = vmatprep.subr.bf16.mxu1 %v8156_v49  ;;  %v733_v46 = vld [vmem:[%s10696_s0 + $0xf0] sm:$0xff]  ;;  %v734_v49 = vld [vmem:[%s10696_s0 + $0xf8] sm:$0xff] }
 0x179   : > { %v8094_v51 = vcombine.high %v729_v44, %v733_v46  ;;  %v8095_v60 = vcombine.low %v730_v48, %v734_v49  ;;  %v801_v38 = vld [vmem:[%s10696_s0 + $0x310] sm:$0xff] }
 0x17b   : > { %1563 = vmatpush2.bf16.msra.mxu0 %v8153_v53  ;;  %1604 = vmatpush2.bf16.msra.mxu1 %v8155_v54  ;;  %v8096_v53 = vcombine.high %v730_v48, %v734_v49  ;;  %v725_v54 = vld [vmem:[%s10696_s0 + $0xb0] sm:$0xff] }
 0x17c   : > { %1564 = vmatprep.subr.bf16.mxu0 %v8146_v55  ;;  %1605 = vmatprep.subr.bf16.mxu1 %v8148_v58  ;;  %v722_v55 = vld [vmem:[%s10696_s0 + $0x98] sm:$0xff]  ;;  %v8093_v58 = vcombine.low %v729_v44, %v733_v46  ;;  %v8086_v61 = vcombine.high %v721_v52, %v725_v54  ;;  %v793_v46 = vld [vmem:[%s10696_s0 + $0x2d0] sm:$0xff] }
 0x17d   : > { %v8087_v7 = vcombine.low %v722_v55, %v726_v57  ;;  %v797_v48 = vld [vmem:[%s10696_s0 + $0x2f0] sm:$0xff] }
 0x17f   : > { %1565 = vmatpush2.bf16.msra.mxu0 %v8145_v63  ;;  %1606 = vmatpush2.bf16.msra.mxu1 %v8147_v0  ;;  %v8088_v63 = vcombine.high %v722_v55, %v726_v57  ;;  %v717_v0 = vld [vmem:[%s10696_s0 + $0x70] sm:$0xff] }
 0x180   : > { %1566 = vmatprep.subr.bf16.mxu0 %v8138_v1  ;;  %1607 = vmatprep.subr.bf16.mxu1 %v8140_v4  ;;  %v714_v1 = vld [vmem:[%s10696_s0 + $0x58] sm:$0xff]  ;;  %v8085_v4 = vcombine.low %v721_v52, %v725_v54  ;;  %v785_v54 = vld [vmem:[%s10696_s0 + $0x290] sm:$0xff] }
 0x181   : > { %v8080_v11 = vcombine.high %v714_v1, %v718_v2  ;;  %v8079_v15 = vcombine.low %v714_v1, %v718_v2  ;;  %v789_v55 = vld [vmem:[%s10696_s0 + $0x2b0] sm:$0xff] }
 0x182   : > { %v781_v1 = vld [vmem:[%s10696_s0 + $0x270] sm:$0xff] }
 0x183   : > { %1567 = vmatpush2.bf16.msra.mxu0 %v8137_v8  ;;  %1608 = vmatpush2.bf16.msra.mxu1 %v8139_v9  ;;  %v8078_v8 = vcombine.high %v713_v62, %v717_v0  ;;  %v706_v9 = vld [vmem:[%s10696_s0 + $0x18] sm:$0xff] }
 0x184   : > { %1568 = vmatprep.subr.bf16.mxu0 %v8130_v10  ;;  %1609 = vmatprep.subr.bf16.mxu1 %v8132_v12  ;;  %v710_v10 = vld [vmem:[%s10696_s0 + $0x38] sm:$0xff]  ;;  %v8077_v12 = vcombine.low %v713_v62, %v717_v0  ;;  %v777_v0 = vld [vmem:[%s10696_s0 + $0x250] sm:$0xff] }
 0x185   : > { %v8072_v19 = vcombine.high %v706_v9, %v710_v10  ;;  %v8071_v24 = vcombine.low %v706_v9, %v710_v10  ;;  %v769_v9 = vld [vmem:[%s10696_s0 + $0x210] sm:$0xff] }
 0x186   : > { %v773_v10 = vld [vmem:[%s10696_s0 + $0x230] sm:$0xff] }
 0x187   : > { %1569 = vmatpush2.bf16.msra.mxu0 %v8129_v16  ;;  %1610 = vmatpush2.bf16.msra.mxu1 %v8131_v17  ;;  %v8070_v16 = vcombine.high %v705_v5, %v709_v6  ;;  %v826_v17 = vld [vmem:[%s10696_s0 + $0x3d8] sm:$0xff] }
 0x188   : > { %1620 = vmatprep.subr.bf16.mxu0 %v8126_v18  ;;  %1661 = vmatprep.subr.bf16.mxu1 %v8128_v20  ;;  %v830_v18 = vld [vmem:[%s10696_s0 + $0x3f8] sm:$0xff]  ;;  %v8069_v20 = vcombine.low %v705_v5, %v709_v6 }
 0x189   : > { %v8192_v28 = vcombine.high %v826_v17, %v830_v18  ;;  %v8191_v59 = vcombine.low %v826_v17, %v830_v18  ;;  %v778_v5 = vld [vmem:[%s10696_s0 + $0x258] sm:$0xff]  ;;  %v8134_v18 = vcombine.high %v769_v9, %v773_v10 }
 0x18a   : > { %1571 = vmatmul.mubr.bf16.vlgmr.msra.gmra.mxu0 %v10827_v23  ;;  %1612 = vmatmul.mubr.bf16.vlgmr.msra.gmra.mxu1 %v10827_v23  ;;  %v782_v6 = vld [vmem:[%s10696_s0 + $0x278] sm:$0xff] }
 0x18b   : > { %1621 = vmatpush1.bf16.msra.mxu0 %v8125_v25  ;;  %1662 = vmatpush1.bf16.msra.mxu1 %v8127_v26  ;;  %v8190_v25 = vcombine.high %v825_v13, %v829_v14  ;;  %v818_v26 = vld [vmem:[%s10696_s0 + $0x398] sm:$0xff]  ;;  %v8143_v17 = vcombine.low %v778_v5, %v782_v6 }
 0x18c   : > { %1622 = vmatprep.subr.bf16.mxu0 %v8118_v27  ;;  %1663 = vmatprep.subr.bf16.mxu1 %v8120_v29  ;;  %v822_v27 = vld [vmem:[%s10696_s0 + $0x3b8] sm:$0xff]  ;;  %v8189_v29 = vcombine.low %v825_v13, %v829_v14 }
 0x18d   : > { %1652 = vmatprep.mubr.bf16.mxu0 %v10782_v3  ;;  %1693 = vmatprep.mubr.bf16.mxu1 %v10782_v3  ;;  %v8103_v3 = vcombine.low %v738_v39, %v742_v40  ;;  %v8184_v35 = vcombine.high %v818_v26, %v822_v27  ;;  %v805_v39 = vld [vmem:[%s10696_s0 + $0x330] sm:$0xff]  ;;  %v8183_v40 = vcombine.low %v818_v26, %v822_v27  ;;  %v770_v13 = vld [vmem:[%s10696_s0 + $0x218] sm:$0xff] }
 0x18e   : > { %v774_v14 = vld [vmem:[%s10696_s0 + $0x238] sm:$0xff]  ;;  %v9120_v26 = vld [vmem:[%s10704_s2 + $0x2e0] ss:$16 sps:$4 sm:$0xff]   ;;  %v9125_v27 = vld [vmem:[%s10704_s2 + $0xc4] ss:$16 sps:$4 sm:$0xff]  }
 0x18f   : > { %1623 = vmatpush1.bf16.msra.mxu0 %v8117_v32  ;;  %1664 = vmatpush1.bf16.msra.mxu1 %v8119_v33  ;;  %v8182_v32 = vcombine.high %v817_v21, %v821_v22  ;;  %v810_v33 = vld [vmem:[%s10696_s0 + $0x358] sm:$0xff] }
 0x190   : > { %1624 = vmatprep.subr.bf16.mxu0 %v8110_v34  ;;  %1665 = vmatprep.subr.bf16.mxu1 %v8112_v36  ;;  %v814_v34 = vld [vmem:[%s10696_s0 + $0x378] sm:$0xff]  ;;  %v8181_v36 = vcombine.low %v817_v21, %v821_v22  ;;  %v8133_v21 = vcombine.low %v769_v9, %v773_v10  ;;  %v9122_v22 = vld [vmem:[%s10704_s2 + $0x2e4] ss:$16 sps:$4 sm:$0xff]   ;;  %v9189_v10 = vld [vmem:[%s10704_s2 + $0x160] ss:$16 sps:$4 sm:$0xff]  }
 0x191   : > { %v8176_v44 = vcombine.high %v810_v33, %v814_v34  ;;  %v8175_v49 = vcombine.low %v810_v33, %v814_v34  ;;  %v9132_v33 = vld [vmem:[%s10704_s2 + $0x2a0] ss:$16 sps:$4 sm:$0xff]   ;;  %v9137_v34 = vld [vmem:[%s10704_s2 + $0x84] ss:$16 sps:$4 sm:$0xff]  }
 0x192   : > { %v9191_v9 = vld [vmem:[%s10704_s2 + $0x164] ss:$16 sps:$4 sm:$0xff]  }
 0x193   : > { %1625 = vmatpush1.bf16.msra.mxu0 %v8109_v41  ;;  %1666 = vmatpush1.bf16.msra.mxu1 %v8111_v42  ;;  %v8174_v41 = vcombine.high %v809_v30, %v813_v31  ;;  %v802_v42 = vld [vmem:[%s10696_s0 + $0x318] sm:$0xff] }
 0x194   : > { %1626 = vmatprep.subr.bf16.mxu0 %v8102_v43  ;;  %1667 = vmatprep.subr.bf16.mxu1 %v8104_v45  ;;  %v806_v43 = vld [vmem:[%s10696_s0 + $0x338] sm:$0xff]  ;;  %v8173_v45 = vcombine.low %v809_v30, %v813_v31  ;;  %v9126_v30 = vld [vmem:[%s10704_s2 + $0x2c0] ss:$16 sps:$4 sm:$0xff]   ;;  %v9131_v31 = vld [vmem:[%s10704_s2 + $0xa4] ss:$16 sps:$4 sm:$0xff]  }
 0x195   : > { %v8168_v52 = vcombine.high %v802_v42, %v806_v43  ;;  %v8167_v57 = vcombine.low %v802_v42, %v806_v43  ;;  %v9149_v42 = vld [vmem:[%s10704_s2 + $0x44] ss:$16 sps:$4 sm:$0xff]   ;;  %v9147_v43 = vld [vmem:[%s10704_s2 + $0x40] ss:$16 sps:$4 sm:$0xff]  }
 0x197   : > { %1627 = vmatpush1.bf16.msra.mxu0 %v8101_v50  ;;  %1668 = vmatpush1.bf16.msra.mxu1 %v8103_v3  ;;  %v8166_v50 = vcombine.high %v801_v38, %v805_v39  ;;  %v794_v3 = vld [vmem:[%s10696_s0 + $0x2d8] sm:$0xff] }
 0x198   : > { %1628 = vmatprep.subr.bf16.mxu0 %v8094_v51  ;;  %1669 = vmatprep.subr.bf16.mxu1 %v8096_v53  ;;  %v798_v51 = vld [vmem:[%s10696_s0 + $0x2f8] sm:$0xff]  ;;  %v8165_v53 = vcombine.low %v801_v38, %v805_v39  ;;  %v9143_v38 = vld [vmem:[%s10704_s2 + $0x64] ss:$16 sps:$4 sm:$0xff]   ;;  %v9141_v39 = vld [vmem:[%s10704_s2 + $0x60] ss:$16 sps:$4 sm:$0xff]  }
 0x199   : > { %v8160_v62 = vcombine.high %v794_v3, %v798_v51  ;;  %v8159_v2 = vcombine.low %v794_v3, %v798_v51  ;;  %v9161_v3 = vld [vmem:[%s10704_s2 + $0x4] ss:$16 sps:$4 sm:$0xff]   ;;  %v9159_v51 = vld [vmem:[%s10704_s2] ss:$16 sps:$4 sm:$0xff]  }
 0x19b   : > { %1629 = vmatpush1.bf16.msra.mxu0 %v8093_v58  ;;  %1670 = vmatpush1.bf16.msra.mxu1 %v8095_v60  ;;  %v8158_v58 = vcombine.high %v793_v46, %v797_v48  ;;  %v786_v60 = vld [vmem:[%s10696_s0 + $0x298] sm:$0xff] }
 0x19c   : > { %1630 = vmatprep.subr.bf16.mxu0 %v8086_v61  ;;  %1671 = vmatprep.subr.bf16.mxu1 %v8088_v63  ;;  %v790_v61 = vld [vmem:[%s10696_s0 + $0x2b8] sm:$0xff]  ;;  %v8157_v63 = vcombine.low %v793_v46, %v797_v48  ;;  %v9155_v46 = vld [vmem:[%s10704_s2 + $0x24] ss:$16 sps:$4 sm:$0xff]   ;;  %v9153_v48 = vld [vmem:[%s10704_s2 + $0x20] ss:$16 sps:$4 sm:$0xff]  }
 0x19f   : > { %1631 = vmatpush1.bf16.msra.mxu0 %v8085_v4  ;;  %1672 = vmatpush1.bf16.msra.mxu1 %v8087_v7  ;;  %v8150_v4 = vcombine.high %v785_v54, %v789_v55  ;;  %v8152_v7 = vcombine.high %v786_v60, %v790_v61 }
 0x1a0   : > { %1632 = vmatprep.subr.bf16.mxu0 %v8078_v8  ;;  %1673 = vmatprep.subr.bf16.mxu1 %v8080_v11  ;;  %v8149_v8 = vcombine.low %v785_v54, %v789_v55  ;;  %v8151_v11 = vcombine.low %v786_v60, %v790_v61  ;;  %v9167_v54 = vld [vmem:[%s10704_s2 + $0x1e4] ss:$16 sps:$4 sm:$0xff]   ;;  %v9165_v55 = vld [vmem:[%s10704_s2 + $0x1e0] ss:$16 sps:$4 sm:$0xff]  }
 0x1a1   : > { %v9173_v60 = vld [vmem:[%s10704_s2 + $0x1c4] ss:$16 sps:$4 sm:$0xff]   ;;  %v9171_v61 = vld [vmem:[%s10704_s2 + $0x1c0] ss:$16 sps:$4 sm:$0xff]  }
 0x1a3   : > { %1633 = vmatpush1.bf16.msra.mxu0 %v8077_v12  ;;  %1674 = vmatpush1.bf16.msra.mxu1 %v8079_v15  ;;  %v8142_v12 = vcombine.high %v777_v0, %v781_v1  ;;  %v8144_v15 = vcombine.high %v778_v5, %v782_v6  ;;  %v9185_v5 = vld [vmem:[%s10704_s2 + $0x184] ss:$16 sps:$4 sm:$0xff]   ;;  %v9183_v6 = vld [vmem:[%s10704_s2 + $0x180] ss:$16 sps:$4 sm:$0xff]  }
 0x1a4   : > { %1634 = vmatprep.subr.bf16.mxu0 %v8070_v16  ;;  %1675 = vmatprep.subr.bf16.mxu1 %v8072_v19  ;;  %v8141_v16 = vcombine.low %v777_v0, %v781_v1  ;;  %v8136_v19 = vcombine.high %v770_v13, %v774_v14  ;;  %v9179_v0 = vld [vmem:[%s10704_s2 + $0x1a4] ss:$16 sps:$4 sm:$0xff]   ;;  %v9177_v1 = vld [vmem:[%s10704_s2 + $0x1a0] ss:$16 sps:$4 sm:$0xff]  }
 0x1a7   : > { %1635 = vmatpush1.bf16.msra.mxu0 %v8069_v20  ;;  %1676 = vmatpush1.bf16.msra.mxu1 %v8071_v24  ;;  %v9119_v20 = vld [vmem:[%s10704_s2 + $0xe4] ss:$16 sps:$4 sm:$0xff]   ;;  %v8135_v24 = vcombine.low %v770_v13, %v774_v14  ;;  %v9195_v14 = vld [vmem:[%s10704_s2 + $0x140] ss:$16 sps:$4 sm:$0xff]  }
 0x1a8   : > { %1636 = vmatprep.subr.bf16.mxu0 %v8190_v25  ;;  %1677 = vmatprep.subr.bf16.mxu1 %v8192_v28  ;;  %v9117_v25 = vld [vmem:[%s10704_s2 + $0xe0] ss:$16 sps:$4 sm:$0xff]   ;;  %v9128_v28 = vld [vmem:[%s10704_s2 + $0x2c4] ss:$16 sps:$4 sm:$0xff]  }
 0x1a9   : > { %v9197_v13 = vld [vmem:[%s10704_s2 + $0x144] ss:$16 sps:$4 sm:$0xff]  }
 0x1ab   : > { %1637 = vmatpush2.bf16.msra.mxu0 %v8189_v29  ;;  %1678 = vmatpush2.bf16.msra.mxu1 %v8191_v59  ;;  %v9123_v29 = vld [vmem:[%s10704_s2 + $0xc0] ss:$16 sps:$4 sm:$0xff]  }
 0x1ac   : > { %1638 = vmatprep.subr.bf16.mxu0 %v8182_v32  ;;  %1679 = vmatprep.subr.bf16.mxu1 %v8184_v35  ;;  %v9129_v59 = vld [vmem:[%s10704_s2 + $0xa0] ss:$16 sps:$4 sm:$0xff]   ;;  %v9134_v32 = vld [vmem:[%s10704_s2 + $0x2a4] ss:$16 sps:$4 sm:$0xff]  }
 0x1ad   : > { %v9140_v35 = vld [vmem:[%s10704_s2 + $0x284] ss:$16 sps:$4 sm:$0xff]  }
 0x1af   : > { %1639 = vmatpush2.bf16.msra.mxu0 %v8181_v36  ;;  %1680 = vmatpush2.bf16.msra.mxu1 %v8183_v40  ;;  %v9138_v36 = vld [vmem:[%s10704_s2 + $0x280] ss:$16 sps:$4 sm:$0xff]   ;;  %v9146_v40 = vld [vmem:[%s10704_s2 + $0x264] ss:$16 sps:$4 sm:$0xff]  }
 0x1b0   : > { %1640 = vmatprep.subr.bf16.mxu0 %v8174_v41  ;;  %1681 = vmatprep.subr.bf16.mxu1 %v8176_v44  ;;  %v9144_v41 = vld [vmem:[%s10704_s2 + $0x260] ss:$16 sps:$4 sm:$0xff]   ;;  %v9152_v44 = vld [vmem:[%s10704_s2 + $0x244] ss:$16 sps:$4 sm:$0xff]  }
 0x1b3   : > { %1641 = vmatpush2.bf16.msra.mxu0 %v8173_v45  ;;  %1682 = vmatpush2.bf16.msra.mxu1 %v8175_v49  ;;  %v9150_v45 = vld [vmem:[%s10704_s2 + $0x240] ss:$16 sps:$4 sm:$0xff]   ;;  %v9158_v49 = vld [vmem:[%s10704_s2 + $0x224] ss:$16 sps:$4 sm:$0xff]  }
 0x1b4   : > { %1642 = vmatprep.subr.bf16.mxu0 %v8166_v50  ;;  %1683 = vmatprep.subr.bf16.mxu1 %v8168_v52  ;;  %v9156_v50 = vld [vmem:[%s10704_s2 + $0x220] ss:$16 sps:$4 sm:$0xff]   ;;  %v9164_v52 = vld [vmem:[%s10704_s2 + $0x204] ss:$16 sps:$4 sm:$0xff]  }
 0x1b7   : > { %1643 = vmatpush2.bf16.msra.mxu0 %v8165_v53  ;;  %1684 = vmatpush2.bf16.msra.mxu1 %v8167_v57  ;;  %v9162_v53 = vld [vmem:[%s10704_s2 + $0x200] ss:$16 sps:$4 sm:$0xff]   ;;  %v9170_v57 = vld [vmem:[%s10704_s2 + $0x3e4] ss:$16 sps:$4 sm:$0xff]  }
 0x1b8   : > { %1644 = vmatprep.subr.bf16.mxu0 %v8158_v58  ;;  %1685 = vmatprep.subr.bf16.mxu1 %v8160_v62  ;;  %v9168_v58 = vld [vmem:[%s10704_s2 + $0x3e0] ss:$16 sps:$4 sm:$0xff]   ;;  %v9176_v62 = vld [vmem:[%s10704_s2 + $0x3c4] ss:$16 sps:$4 sm:$0xff]  }
 0x1bb   : > { %1645 = vmatpush2.bf16.msra.mxu0 %v8157_v63  ;;  %1686 = vmatpush2.bf16.msra.mxu1 %v8159_v2  ;;  %v9174_v63 = vld [vmem:[%s10704_s2 + $0x3c0] ss:$16 sps:$4 sm:$0xff]   ;;  %v9182_v2 = vld [vmem:[%s10704_s2 + $0x3a4] ss:$16 sps:$4 sm:$0xff]  }
 0x1bc   : > { %1646 = vmatprep.subr.bf16.mxu0 %v8150_v4  ;;  %1687 = vmatprep.subr.bf16.mxu1 %v8152_v7  ;;  %v9180_v4 = vld [vmem:[%s10704_s2 + $0x3a0] ss:$16 sps:$4 sm:$0xff]   ;;  %v9188_v7 = vld [vmem:[%s10704_s2 + $0x384] ss:$16 sps:$4 sm:$0xff]  }
 0x1bf   : > { %1647 = vmatpush2.bf16.msra.mxu0 %v8149_v8  ;;  %1688 = vmatpush2.bf16.msra.mxu1 %v8151_v11  ;;  %v9186_v8 = vld [vmem:[%s10704_s2 + $0x380] ss:$16 sps:$4 sm:$0xff]   ;;  %v9194_v11 = vld [vmem:[%s10704_s2 + $0x364] ss:$16 sps:$4 sm:$0xff]  }
 0x1c0   : > { %1648 = vmatprep.subr.bf16.mxu0 %v8142_v12  ;;  %1689 = vmatprep.subr.bf16.mxu1 %v8144_v15  ;;  %v9192_v12 = vld [vmem:[%s10704_s2 + $0x360] ss:$16 sps:$4 sm:$0xff]   ;;  %v9200_v15 = vld [vmem:[%s10704_s2 + $0x344] ss:$16 sps:$4 sm:$0xff]  }
 0x1c3   : > { %1649 = vmatpush2.bf16.msra.mxu0 %v8141_v16  ;;  %1690 = vmatpush2.bf16.msra.mxu1 %v8143_v17  ;;  %v9198_v16 = vld [vmem:[%s10704_s2 + $0x340] ss:$16 sps:$4 sm:$0xff]   ;;  %v9203_v17 = vld [vmem:[%s10704_s2 + $0x124] ss:$16 sps:$4 sm:$0xff]  }
 0x1c4   : > { %1650 = vmatprep.subr.bf16.mxu0 %v8134_v18  ;;  %1691 = vmatprep.subr.bf16.mxu1 %v8136_v19  ;;  %v9201_v18 = vld [vmem:[%s10704_s2 + $0x120] ss:$16 sps:$4 sm:$0xff]   ;;  %v9206_v19 = vld [vmem:[%s10704_s2 + $0x324] ss:$16 sps:$4 sm:$0xff]  }
 0x1c7   : > { %1651 = vmatpush2.bf16.msra.mxu0 %v8133_v21  ;;  %1692 = vmatpush2.bf16.msra.mxu1 %v8135_v24  ;;  %v9209_v21 = vld [vmem:[%s10704_s2 + $0x104] ss:$16 sps:$4 sm:$0xff]   ;;  %v9207_v24 = vld [vmem:[%s10704_s2 + $0x100] ss:$16 sps:$4 sm:$0xff]  }
 0x1c8   : > { %3268 = vmatprep.subr.bf16.mxu0 %v9119_v20  ;;  %3309 = vmatprep.subr.bf16.mxu1 %v9122_v22  ;;  %v9204_v20 = vld [vmem:[%s10704_s2 + $0x320] ss:$16 sps:$4 sm:$0xff]   ;;  %v9212_v22 = vld [vmem:[%s10704_s2 + $0x304] ss:$16 sps:$4 sm:$0xff]  }
 0x1ca   : > { %1653 = vmatmul.mubr.bf16.vlgmr.msra.gmra.mxu0 %v10827_v23  ;;  %1694 = vmatmul.mubr.bf16.vlgmr.msra.gmra.mxu1 %v10827_v23  ;;  %v9135_v23 = vld [vmem:[%s10704_s2 + $0x80] ss:$16 sps:$4 sm:$0xff]  }
 0x1cb   : > { %3269 = vmatpush1.bf16.msra.mxu0 %v9117_v25  ;;  %3310 = vmatpush1.bf16.msra.mxu1 %v9120_v26  ;;  %v9210_v25 = vld [vmem:[%s10704_s2 + $0x300] ss:$16 sps:$4 sm:$0xff]   ;;  %v9215_v26 = vld [vmem:[%s10704_s2 + $0x4e4] ss:$16 sps:$4 sm:$0xff]  }
 0x1cc   : > { %3270 = vmatprep.subr.bf16.mxu0 %v9125_v27  ;;  %3311 = vmatprep.subr.bf16.mxu1 %v9128_v28  ;;  %v9218_v27 = vld [vmem:[%s10704_s2 + $0x6e4] ss:$16 sps:$4 sm:$0xff]   ;;  %v10959_v28 = vsub.s32 0, %v10759_v47 }
 0x1cf   : > { %3271 = vmatpush1.bf16.msra.mxu0 %v9123_v29  ;;  %3312 = vmatpush1.bf16.msra.mxu1 %v9126_v30  ;;  %v10962_v29 = vsub.s32 2, %v10759_v47  ;;  %v10965_v30 = vld [vmem:[%s10686_s24] sm:$0xff] }
 0x1d0   : > { %3272 = vmatprep.subr.bf16.mxu0 %v9131_v31  ;;  %3313 = vmatprep.subr.bf16.mxu1 %v9134_v32  ;;  %v10968_v31 = vsub.s32 1, %v10759_v47  ;;  %v1501_v32 = vrot.slane %v10965_v30, %v10959_v28 }
 0x1d3   : > { %3273 = vmatpush1.bf16.msra.mxu0 %v9129_v59  ;;  %3314 = vmatpush1.bf16.msra.mxu1 %v9132_v33  ;;  %v10971_v59 = vsub.s32 3, %v10759_v47  ;;  %v1509_v33 = vrot.slane %v10965_v30, %v10962_v29 }
 0x1d4   : > { %3274 = vmatprep.subr.bf16.mxu0 %v9137_v34  ;;  %3315 = vmatprep.subr.bf16.mxu1 %v9140_v35  ;;  %v1505_v34 = vrot.slane %v10965_v30, %v10968_v31 }
 0x1d5   : > { %v1513_v35 = vrot.slane %v10965_v30, %v10971_v59 }
 0x1d7   : > { %3275 = vmatpush1.bf16.msra.mxu0 %v9135_v23  ;;  %3316 = vmatpush1.bf16.msra.mxu1 %v9138_v36 }
 0x1d8   : > { %3276 = vmatprep.subr.bf16.mxu0 %v9143_v38  ;;  %3317 = vmatprep.subr.bf16.mxu1 %v9146_v40 }
 0x1db   : > { %3277 = vmatpush1.bf16.msra.mxu0 %v9141_v39  ;;  %3318 = vmatpush1.bf16.msra.mxu1 %v9144_v41 }
 0x1dc   : > { %3278 = vmatprep.subr.bf16.mxu0 %v9149_v42  ;;  %3319 = vmatprep.subr.bf16.mxu1 %v9152_v44 }
 0x1df   : > { %3279 = vmatpush1.bf16.msra.mxu0 %v9147_v43  ;;  %3320 = vmatpush1.bf16.msra.mxu1 %v9150_v45 }
 0x1e0   : > { %3280 = vmatprep.subr.bf16.mxu0 %v9155_v46  ;;  %3321 = vmatprep.subr.bf16.mxu1 %v9158_v49  ;;  %v9213_v49 = vld [vmem:[%s10704_s2 + $0x4e0] ss:$16 sps:$4 sm:$0xff]  }
 0x1e3   : > { %3281 = vmatpush1.bf16.msra.mxu0 %v9153_v48  ;;  %3322 = vmatpush1.bf16.msra.mxu1 %v9156_v50 }
 0x1e4   : > { %3282 = vmatprep.subr.bf16.mxu0 %v9161_v3  ;;  %3323 = vmatprep.subr.bf16.mxu1 %v9164_v52  ;;  %v9216_v52 = vld [vmem:[%s10704_s2 + $0x6e0] ss:$16 sps:$4 sm:$0xff]  }
 0x1e7   : > { %3283 = vmatpush1.bf16.msra.mxu0 %v9159_v51  ;;  %3324 = vmatpush1.bf16.msra.mxu1 %v9162_v53  ;;  %v9221_v53 = vld [vmem:[%s10704_s2 + $0x4c4] ss:$16 sps:$4 sm:$0xff]  }
 0x1e8   : > { %3284 = vmatprep.subr.bf16.mxu0 %v9167_v54  ;;  %3325 = vmatprep.subr.bf16.mxu1 %v9170_v57  ;;  %v9219_v57 = vld [vmem:[%s10704_s2 + $0x4c0] ss:$16 sps:$4 sm:$0xff]  }
 0x1eb   : > { %3285 = vmatpush2.bf16.msra.mxu0 %v9165_v55  ;;  %3326 = vmatpush2.bf16.msra.mxu1 %v9168_v58  ;;  %v9224_v55 = vld [vmem:[%s10704_s2 + $0x6c4] ss:$16 sps:$4 sm:$0xff]   ;;  %v9222_v58 = vld [vmem:[%s10704_s2 + $0x6c0] ss:$16 sps:$4 sm:$0xff]  }
 0x1ec   : > { %3286 = vmatprep.subr.bf16.mxu0 %v9173_v60  ;;  %3327 = vmatprep.subr.bf16.mxu1 %v9176_v62  ;;  %v9227_v60 = vld [vmem:[%s10704_s2 + $0x4a4] ss:$16 sps:$4 sm:$0xff]   ;;  %v9225_v62 = vld [vmem:[%s10704_s2 + $0x4a0] ss:$16 sps:$4 sm:$0xff]  }
 0x1ef   : > { %3287 = vmatpush2.bf16.msra.mxu0 %v9171_v61  ;;  %3328 = vmatpush2.bf16.msra.mxu1 %v9174_v63  ;;  %v9230_v61 = vld [vmem:[%s10704_s2 + $0x6a4] ss:$16 sps:$4 sm:$0xff]   ;;  %v9228_v63 = vld [vmem:[%s10704_s2 + $0x6a0] ss:$16 sps:$4 sm:$0xff]  }
 0x1f0   : > { %3288 = vmatprep.subr.bf16.mxu0 %v9179_v0  ;;  %3329 = vmatprep.subr.bf16.mxu1 %v9182_v2  ;;  %v9233_v0 = vld [vmem:[%s10704_s2 + $0x484] ss:$16 sps:$4 sm:$0xff]   ;;  %v9231_v2 = vld [vmem:[%s10704_s2 + $0x480] ss:$16 sps:$4 sm:$0xff]  }
 0x1f3   : > { %3289 = vmatpush2.bf16.msra.mxu0 %v9177_v1  ;;  %3330 = vmatpush2.bf16.msra.mxu1 %v9180_v4  ;;  %v9236_v1 = vld [vmem:[%s10704_s2 + $0x684] ss:$16 sps:$4 sm:$0xff]   ;;  %v9234_v4 = vld [vmem:[%s10704_s2 + $0x680] ss:$16 sps:$4 sm:$0xff]  }
 0x1f4   : > { %3290 = vmatprep.subr.bf16.mxu0 %v9185_v5  ;;  %3331 = vmatprep.subr.bf16.mxu1 %v9188_v7  ;;  %v9239_v5 = vld [vmem:[%s10704_s2 + $0x464] ss:$16 sps:$4 sm:$0xff]   ;;  %v9237_v7 = vld [vmem:[%s10704_s2 + $0x460] ss:$16 sps:$4 sm:$0xff]  }
 0x1f7   : > { %3291 = vmatpush2.bf16.msra.mxu0 %v9183_v6  ;;  %3332 = vmatpush2.bf16.msra.mxu1 %v9186_v8  ;;  %v9242_v6 = vld [vmem:[%s10704_s2 + $0x664] ss:$16 sps:$4 sm:$0xff]   ;;  %v9240_v8 = vld [vmem:[%s10704_s2 + $0x660] ss:$16 sps:$4 sm:$0xff]  }
 0x1f8   : > { %3292 = vmatprep.subr.bf16.mxu0 %v9191_v9  ;;  %3333 = vmatprep.subr.bf16.mxu1 %v9194_v11  ;;  %v9245_v9 = vld [vmem:[%s10704_s2 + $0x444] ss:$16 sps:$4 sm:$0xff]   ;;  %v9243_v11 = vld [vmem:[%s10704_s2 + $0x440] ss:$16 sps:$4 sm:$0xff]  }
 0x1fb   : > { %3293 = vmatpush2.bf16.msra.mxu0 %v9189_v10  ;;  %3334 = vmatpush2.bf16.msra.mxu1 %v9192_v12  ;;  %v9248_v10 = vld [vmem:[%s10704_s2 + $0x644] ss:$16 sps:$4 sm:$0xff]   ;;  %v9246_v12 = vld [vmem:[%s10704_s2 + $0x640] ss:$16 sps:$4 sm:$0xff]  }
 0x1fc   : > { %3294 = vmatprep.subr.bf16.mxu0 %v9197_v13  ;;  %3335 = vmatprep.subr.bf16.mxu1 %v9200_v15  ;;  %v9251_v13 = vld [vmem:[%s10704_s2 + $0x424] ss:$16 sps:$4 sm:$0xff]   ;;  %v9249_v15 = vld [vmem:[%s10704_s2 + $0x420] ss:$16 sps:$4 sm:$0xff]  }
 0x1ff   : > { %3295 = vmatpush2.bf16.msra.mxu0 %v9195_v14  ;;  %3336 = vmatpush2.bf16.msra.mxu1 %v9198_v16  ;;  %v9254_v14 = vld [vmem:[%s10704_s2 + $0x624] ss:$16 sps:$4 sm:$0xff]   ;;  %v9252_v16 = vld [vmem:[%s10704_s2 + $0x620] ss:$16 sps:$4 sm:$0xff]  }
 0x200   : > { %3296 = vmatprep.subr.bf16.mxu0 %v9203_v17  ;;  %3337 = vmatprep.subr.bf16.mxu1 %v9206_v19  ;;  %v9257_v17 = vld [vmem:[%s10704_s2 + $0x404] ss:$16 sps:$4 sm:$0xff]   ;;  %v9255_v19 = vld [vmem:[%s10704_s2 + $0x400] ss:$16 sps:$4 sm:$0xff]  }
 0x203   : > { %3297 = vmatpush2.bf16.msra.mxu0 %v9201_v18  ;;  %3338 = vmatpush2.bf16.msra.mxu1 %v9204_v20  ;;  %v9260_v18 = vld [vmem:[%s10704_s2 + $0x604] ss:$16 sps:$4 sm:$0xff]   ;;  %v9258_v20 = vld [vmem:[%s10704_s2 + $0x600] ss:$16 sps:$4 sm:$0xff]  }
 0x204   : > { %3298 = vmatprep.subr.bf16.mxu0 %v9209_v21  ;;  %3339 = vmatprep.subr.bf16.mxu1 %v9212_v22  ;;  %v9263_v21 = vld [vmem:[%s10704_s2 + $0x5e4] ss:$16 sps:$4 sm:$0xff]  }
 0x205   : > { %v9266_v22 = vld [vmem:[%s10704_s2 + $0x7e4] ss:$16 sps:$4 sm:$0xff]  }
 0x207   : > { %3299 = vmatpush2.bf16.msra.mxu0 %v9207_v24  ;;  %3340 = vmatpush2.bf16.msra.mxu1 %v9210_v25  ;;  %v9261_v24 = vld [vmem:[%s10704_s2 + $0x5e0] ss:$16 sps:$4 sm:$0xff]  }
 0x208   : > { %3350 = vmatprep.subr.bf16.mxu0 %v9215_v26  ;;  %3391 = vmatprep.subr.bf16.mxu1 %v9218_v27  ;;  %v9264_v25 = vld [vmem:[%s10704_s2 + $0x7e0] ss:$16 sps:$4 sm:$0xff]   ;;  %v9269_v26 = vld [vmem:[%s10704_s2 + $0x5c4] ss:$16 sps:$4 sm:$0xff]  }
 0x209   : > { %v9272_v27 = vld [vmem:[%s10704_s2 + $0x7c4] ss:$16 sps:$4 sm:$0xff]  }
 0x24a   : > { %v1572_v23 = vpop.f32.mrf.mxu0  ;;  %v1613_v36 = vpop.f32.mrf.mxu1 }
 0x24b   : > { %v1573_v38 = vadd.f32 %v1572_v23, %v1501_v32  ;;  %v1614_v39 = vadd.f32 %v1613_v36, %v1509_v33  ;;  %v9267_v32 = vld [vmem:[%s10704_s2 + $0x5c0] ss:$16 sps:$4 sm:$0xff]   ;;  %v9278_v23 = vld [vmem:[%s10704_s2 + $0x7a4] ss:$16 sps:$4 sm:$0xff]  }
 0x24c   : > { %v1574_v40 = vpop.f32.mrf.mxu0  ;;  %v1615_v42 = vpop.f32.mrf.mxu1  ;;  %v9270_v33 = vld [vmem:[%s10704_s2 + $0x7c0] ss:$16 sps:$4 sm:$0xff]  }
 0x24d   : > { %v1575_v41 = vadd.f32 %v1574_v40, %v1505_v34  ;;  %v1616_v43 = vadd.f32 %v1615_v42, %v1513_v35  ;;  %v10981_v45 = vpack.c.bf16 %v1614_v39, %v1614_v39  ;;  %v10986_v50 = vpack.c.bf16 %v1573_v38, %v1573_v38  ;;  %v9275_v34 = vld [vmem:[%s10704_s2 + $0x5a4] ss:$16 sps:$4 sm:$0xff]   ;;  %v9273_v35 = vld [vmem:[%s10704_s2 + $0x5a0] ss:$16 sps:$4 sm:$0xff]  }
 0x24e   : > { %v1576_v44 = vpop.f32.mrf.mxu0  ;;  %v1617_v48 = vpop.f32.mrf.mxu1  ;;  %v9276_v36 = vld [vmem:[%s10704_s2 + $0x7a0] ss:$16 sps:$4 sm:$0xff]   ;;  %v9281_v38 = vld [vmem:[%s10704_s2 + $0x584] ss:$16 sps:$4 sm:$0xff]  }
 0x24f   : > { %v10983_v46 = vpack.c.bf16 %v1575_v41, %v1575_v41  ;;  %v10988_v3 = vpack.c.bf16 %v1616_v43, %v1616_v43  ;;  %v9284_v39 = vld [vmem:[%s10704_s2 + $0x784] ss:$16 sps:$4 sm:$0xff]   ;;  %v9279_v40 = vld [vmem:[%s10704_s2 + $0x580] ss:$16 sps:$4 sm:$0xff]  }
 0x250   : > { %v1577_v51 = vpop.f32.mrf.mxu0  ;;  %v1618_v54 = vpop.f32.mrf.mxu1  ;;  %v9282_v41 = vld [vmem:[%s10704_s2 + $0x780] ss:$16 sps:$4 sm:$0xff]   ;;  %v9287_v42 = vld [vmem:[%s10704_s2 + $0x564] ss:$16 sps:$4 sm:$0xff]  }
 0x251   : > { %3300 = vmatprep.mubr.bf16.mxu0 %v10983_v46  ;;  %3341 = vmatprep.mubr.bf16.mxu1 %v10988_v3  ;;  %v9290_v43 = vld [vmem:[%s10704_s2 + $0x764] ss:$16 sps:$4 sm:$0xff]   ;;  %v9285_v44 = vld [vmem:[%s10704_s2 + $0x560] ss:$16 sps:$4 sm:$0xff]  }
 0x252   : > { %3301 = vmatmul.mubr.bf16.vlgmr.msra.gmra.mxu0 %v10986_v50  ;;  %3342 = vmatmul.mubr.bf16.vlgmr.msra.gmra.mxu1 %v10981_v45  ;;  %v9288_v48 = vld [vmem:[%s10704_s2 + $0x760] ss:$16 sps:$4 sm:$0xff]   ;;  %v9296_v51 = vld [vmem:[%s10704_s2 + $0x744] ss:$16 sps:$4 sm:$0xff]  }
 0x253   : > { %3351 = vmatpush1.bf16.msra.mxu0 %v9213_v49  ;;  %3392 = vmatpush1.bf16.msra.mxu1 %v9216_v52  ;;  %v9293_v49 = vld [vmem:[%s10704_s2 + $0x544] ss:$16 sps:$4 sm:$0xff]   ;;  %v9291_v52 = vld [vmem:[%s10704_s2 + $0x540] ss:$16 sps:$4 sm:$0xff]  }
 0x254   : > { %3352 = vmatprep.subr.bf16.mxu0 %v9221_v53  ;;  %3393 = vmatprep.subr.bf16.mxu1 %v9224_v55  ;;  %v9294_v53 = vld [vmem:[%s10704_s2 + $0x740] ss:$16 sps:$4 sm:$0xff]   ;;  %v9299_v54 = vld [vmem:[%s10704_s2 + $0x524] ss:$16 sps:$4 sm:$0xff]   ;;  %v1516_v55 = vsub.s32 4, %v10759_v47 }
 0x257   : > { %3353 = vmatpush1.bf16.msra.mxu0 %v9219_v57  ;;  %3394 = vmatpush1.bf16.msra.mxu1 %v9222_v58  ;;  %v1524_v57 = vsub.s32 6, %v10759_v47  ;;  %v9302_v58 = vld [vmem:[%s10704_s2 + $0x724] ss:$16 sps:$4 sm:$0xff]  }
 0x258   : > { %3354 = vmatprep.subr.bf16.mxu0 %v9227_v60  ;;  %3395 = vmatprep.subr.bf16.mxu1 %v9230_v61  ;;  %v1520_v60 = vsub.s32 5, %v10759_v47  ;;  %v1528_v61 = vsub.s32 7, %v10759_v47 }
 0x25b   : > { %3355 = vmatpush1.bf16.msra.mxu0 %v9225_v62  ;;  %3396 = vmatpush1.bf16.msra.mxu1 %v9228_v63  ;;  %v9297_v62 = vld [vmem:[%s10704_s2 + $0x520] ss:$16 sps:$4 sm:$0xff]  }
 0x25c   : > { %3356 = vmatprep.subr.bf16.mxu0 %v9233_v0  ;;  %3397 = vmatprep.subr.bf16.mxu1 %v9236_v1  ;;  %v9300_v63 = vld [vmem:[%s10704_s2 + $0x720] ss:$16 sps:$4 sm:$0xff]   ;;  %v1517_v0 = vrot.slane %v10965_v30, %v1516_v55  ;;  %v1525_v1 = vrot.slane %v10965_v30, %v1524_v57 }
 0x25f   : > { %3357 = vmatpush1.bf16.msra.mxu0 %v9231_v2  ;;  %3398 = vmatpush1.bf16.msra.mxu1 %v9234_v4  ;;  %v9305_v2 = vld [vmem:[%s10704_s2 + $0x504] ss:$16 sps:$4 sm:$0xff]   ;;  %v1521_v4 = vrot.slane %v10965_v30, %v1520_v60 }
 0x260   : > { %3358 = vmatprep.subr.bf16.mxu0 %v9239_v5  ;;  %3399 = vmatprep.subr.bf16.mxu1 %v9242_v6  ;;  %v9308_v5 = vld [vmem:[%s10704_s2 + $0x704] ss:$16 sps:$4 sm:$0xff]  }
 0x263   : > { %3359 = vmatpush1.bf16.msra.mxu0 %v9237_v7  ;;  %3400 = vmatpush1.bf16.msra.mxu1 %v9240_v8  ;;  %v1529_v7 = vrot.slane %v10965_v30, %v1528_v61 }
 0x264   : > { %3360 = vmatprep.subr.bf16.mxu0 %v9245_v9  ;;  %3401 = vmatprep.subr.bf16.mxu1 %v9248_v10  ;;  %v9303_v9 = vld [vmem:[%s10704_s2 + $0x500] ss:$16 sps:$4 sm:$0xff]  }
 0x267   : > { %3361 = vmatpush1.bf16.msra.mxu0 %v9243_v11  ;;  %3402 = vmatpush1.bf16.msra.mxu1 %v9246_v12 }
 0x268   : > { %3362 = vmatprep.subr.bf16.mxu0 %v9251_v13  ;;  %3403 = vmatprep.subr.bf16.mxu1 %v9254_v14  ;;  %v9306_v13 = vld [vmem:[%s10704_s2 + $0x700] ss:$16 sps:$4 sm:$0xff]   ;;  %v9311_v14 = vld [vmem:[%s10704_s2 + $0xec] ss:$16 sps:$4 sm:$0xff]  }
 0x26b   : > { %3363 = vmatpush1.bf16.msra.mxu0 %v9249_v15  ;;  %3404 = vmatpush1.bf16.msra.mxu1 %v9252_v16 }
 0x26c   : > { %3364 = vmatprep.subr.bf16.mxu0 %v9257_v17  ;;  %3405 = vmatprep.subr.bf16.mxu1 %v9260_v18  ;;  %v9314_v17 = vld [vmem:[%s10704_s2 + $0x2ec] ss:$16 sps:$4 sm:$0xff]  }
 0x26f   : > { %3365 = vmatpush1.bf16.msra.mxu0 %v9255_v19  ;;  %3406 = vmatpush1.bf16.msra.mxu1 %v9258_v20 }
 0x270   : > { %3366 = vmatprep.subr.bf16.mxu0 %v9263_v21  ;;  %3407 = vmatprep.subr.bf16.mxu1 %v9266_v22  ;;  %v9309_v22 = vld [vmem:[%s10704_s2 + $0xe8] ss:$16 sps:$4 sm:$0xff]  }
 0x273   : > { %3367 = vmatpush2.bf16.msra.mxu0 %v9261_v24  ;;  %3408 = vmatpush2.bf16.msra.mxu1 %v9264_v25 }
 0x274   : > { %3368 = vmatprep.subr.bf16.mxu0 %v9269_v26  ;;  %3409 = vmatprep.subr.bf16.mxu1 %v9272_v27  ;;  %v9312_v27 = vld [vmem:[%s10704_s2 + $0x2e8] ss:$16 sps:$4 sm:$0xff]  }
 0x277   : > { %3369 = vmatpush2.bf16.msra.mxu0 %v9267_v32  ;;  %3410 = vmatpush2.bf16.msra.mxu1 %v9270_v33  ;;  %v9317_v33 = vld [vmem:[%s10704_s2 + $0xcc] ss:$16 sps:$4 sm:$0xff]  }
 0x278   : > { %3370 = vmatprep.subr.bf16.mxu0 %v9275_v34  ;;  %3411 = vmatprep.subr.bf16.mxu1 %v9278_v23  ;;  %v9320_v34 = vld [vmem:[%s10704_s2 + $0x2cc] ss:$16 sps:$4 sm:$0xff]   ;;  %v9315_v23 = vld [vmem:[%s10704_s2 + $0xc8] ss:$16 sps:$4 sm:$0xff]  }
 0x27b   : > { %3371 = vmatpush2.bf16.msra.mxu0 %v9273_v35  ;;  %3412 = vmatpush2.bf16.msra.mxu1 %v9276_v36  ;;  %v9318_v35 = vld [vmem:[%s10704_s2 + $0x2c8] ss:$16 sps:$4 sm:$0xff]   ;;  %v9323_v36 = vld [vmem:[%s10704_s2 + $0xac] ss:$16 sps:$4 sm:$0xff]  }
 0x27c   : > { %3372 = vmatprep.subr.bf16.mxu0 %v9281_v38  ;;  %3413 = vmatprep.subr.bf16.mxu1 %v9284_v39  ;;  %v9326_v38 = vld [vmem:[%s10704_s2 + $0x2ac] ss:$16 sps:$4 sm:$0xff]   ;;  %v9321_v39 = vld [vmem:[%s10704_s2 + $0xa8] ss:$16 sps:$4 sm:$0xff]  }
 0x27f   : > { %3373 = vmatpush2.bf16.msra.mxu0 %v9279_v40  ;;  %3414 = vmatpush2.bf16.msra.mxu1 %v9282_v41  ;;  %v9324_v40 = vld [vmem:[%s10704_s2 + $0x2a8] ss:$16 sps:$4 sm:$0xff]   ;;  %v9329_v41 = vld [vmem:[%s10704_s2 + $0x8c] ss:$16 sps:$4 sm:$0xff]  }
 0x280   : > { %3374 = vmatprep.subr.bf16.mxu0 %v9287_v42  ;;  %3415 = vmatprep.subr.bf16.mxu1 %v9290_v43  ;;  %v9330_v42 = vld [vmem:[%s10704_s2 + $0x288] ss:$16 sps:$4 sm:$0xff]   ;;  %v9335_v43 = vld [vmem:[%s10704_s2 + $0x6c] ss:$16 sps:$4 sm:$0xff]  }
 0x283   : > { %3375 = vmatpush2.bf16.msra.mxu0 %v9285_v44  ;;  %3416 = vmatpush2.bf16.msra.mxu1 %v9288_v48  ;;  %v9338_v44 = vld [vmem:[%s10704_s2 + $0x26c] ss:$16 sps:$4 sm:$0xff]   ;;  %v9333_v48 = vld [vmem:[%s10704_s2 + $0x68] ss:$16 sps:$4 sm:$0xff]  }
 0x284   : > { %3376 = vmatprep.subr.bf16.mxu0 %v9293_v49  ;;  %3417 = vmatprep.subr.bf16.mxu1 %v9296_v51  ;;  %v9336_v49 = vld [vmem:[%s10704_s2 + $0x268] ss:$16 sps:$4 sm:$0xff]   ;;  %v9341_v51 = vld [vmem:[%s10704_s2 + $0x4c] ss:$16 sps:$4 sm:$0xff]  }
 0x287   : > { %3377 = vmatpush2.bf16.msra.mxu0 %v9291_v52  ;;  %3418 = vmatpush2.bf16.msra.mxu1 %v9294_v53  ;;  %v9344_v52 = vld [vmem:[%s10704_s2 + $0x24c] ss:$16 sps:$4 sm:$0xff]   ;;  %v9339_v53 = vld [vmem:[%s10704_s2 + $0x48] ss:$16 sps:$4 sm:$0xff]  }
 0x288   : > { %3378 = vmatprep.subr.bf16.mxu0 %v9299_v54  ;;  %3419 = vmatprep.subr.bf16.mxu1 %v9302_v58  ;;  %v9342_v54 = vld [vmem:[%s10704_s2 + $0x248] ss:$16 sps:$4 sm:$0xff]   ;;  %v9347_v58 = vld [vmem:[%s10704_s2 + $0x2c] ss:$16 sps:$4 sm:$0xff]  }
 0x28a   : > { %v1654_v6 = vpop.f32.mrf.mxu0  ;;  %v1695_v8 = vpop.f32.mrf.mxu1 }
 0x28b   : > { %3379 = vmatpush2.bf16.msra.mxu0 %v9297_v62  ;;  %v1655_v10 = vadd.f32 %v1654_v6, %v1517_v0  ;;  %v1696_v11 = vadd.f32 %v1695_v8, %v1525_v1  ;;  %3420 = vmatpush2.bf16.msra.mxu1 %v9300_v63  ;;  %v9350_v62 = vld [vmem:[%s10704_s2 + $0x22c] ss:$16 sps:$4 sm:$0xff]   ;;  %v9345_v63 = vld [vmem:[%s10704_s2 + $0x28] ss:$16 sps:$4 sm:$0xff]  }
 0x28c   : > { %v1656_v12 = vpop.f32.mrf.mxu0  ;;  %3380 = vmatprep.subr.bf16.mxu0 %v9305_v2  ;;  %v1697_v16 = vpop.f32.mrf.mxu1  ;;  %3421 = vmatprep.subr.bf16.mxu1 %v9308_v5  ;;  %v9348_v0 = vld [vmem:[%s10704_s2 + $0x228] ss:$16 sps:$4 sm:$0xff]   ;;  %v9353_v1 = vld [vmem:[%s10704_s2 + $0xc] ss:$16 sps:$4 sm:$0xff]  }
 0x28d   : > { %v1657_v15 = vadd.f32 %v1656_v12, %v1521_v4  ;;  %v1698_v18 = vadd.f32 %v1697_v16, %v1529_v7  ;;  %v11073_v30 = vpack.c.bf16 %v1696_v11, %v1696_v11  ;;  %v11078_v24 = vpack.c.bf16 %v1655_v10, %v1655_v10  ;;  %v9356_v2 = vld [vmem:[%s10704_s2 + $0x20c] ss:$16 sps:$4 sm:$0xff]   ;;  %v9351_v4 = vld [vmem:[%s10704_s2 + $0x8] ss:$16 sps:$4 sm:$0xff]  }
 0x28e   : > { %v1658_v19 = vpop.f32.mrf.mxu0  ;;  %v1699_v21 = vpop.f32.mrf.mxu1  ;;  %v9354_v5 = vld [vmem:[%s10704_s2 + $0x208] ss:$16 sps:$4 sm:$0xff]   ;;  %v9359_v6 = vld [vmem:[%s10704_s2 + $0x1ec] ss:$16 sps:$4 sm:$0xff]  }
 0x28f   : > { %v11075_v20 = vpack.c.bf16 %v1657_v15, %v1657_v15  ;;  %3381 = vmatpush2.bf16.msra.mxu0 %v9303_v9  ;;  %v11080_v25 = vpack.c.bf16 %v1698_v18, %v1698_v18  ;;  %3422 = vmatpush2.bf16.msra.mxu1 %v9306_v13  ;;  %v9362_v7 = vld [vmem:[%s10704_s2 + $0x3ec] ss:$16 sps:$4 sm:$0xff]   ;;  %v9357_v8 = vld [vmem:[%s10704_s2 + $0x1e8] ss:$16 sps:$4 sm:$0xff]  }
 0x290   : > { %v1659_v26 = vpop.f32.mrf.mxu0  ;;  %3432 = vmatprep.subr.bf16.mxu0 %v9311_v14  ;;  %v1700_v32 = vpop.f32.mrf.mxu1  ;;  %3473 = vmatprep.subr.bf16.mxu1 %v9314_v17  ;;  %v9360_v9 = vld [vmem:[%s10704_s2 + $0x3e8] ss:$16 sps:$4 sm:$0xff]   ;;  %v9365_v10 = vld [vmem:[%s10704_s2 + $0x1cc] ss:$16 sps:$4 sm:$0xff]  }
 0x291   : > { %3382 = vmatprep.mubr.bf16.mxu0 %v11075_v20  ;;  %3423 = vmatprep.mubr.bf16.mxu1 %v11080_v25  ;;  %v9368_v11 = vld [vmem:[%s10704_s2 + $0x3cc] ss:$16 sps:$4 sm:$0xff]   ;;  %v9363_v12 = vld [vmem:[%s10704_s2 + $0x1c8] ss:$16 sps:$4 sm:$0xff]  }
 0x292   : > { %3383 = vmatmul.mubr.bf16.vlgmr.msra.gmra.mxu0 %v11078_v24  ;;  %3424 = vmatmul.mubr.bf16.vlgmr.msra.gmra.mxu1 %v11073_v30  ;;  %v9366_v13 = vld [vmem:[%s10704_s2 + $0x3c8] ss:$16 sps:$4 sm:$0xff]   ;;  %v9371_v14 = vld [vmem:[%s10704_s2 + $0x1ac] ss:$16 sps:$4 sm:$0xff]  }
 0x293   : > { %3433 = vmatpush1.bf16.msra.mxu0 %v9309_v22  ;;  %3474 = vmatpush1.bf16.msra.mxu1 %v9312_v27  ;;  %v9374_v15 = vld [vmem:[%s10704_s2 + $0x3ac] ss:$16 sps:$4 sm:$0xff]   ;;  %v9369_v16 = vld [vmem:[%s10704_s2 + $0x1a8] ss:$16 sps:$4 sm:$0xff]  }
 0x294   : > { %3464 = vmatprep.mubr.bf16.mxu0 %v10983_v46  ;;  %3505 = vmatprep.mubr.bf16.mxu1 %v10988_v3  ;;  %v9332_v46 = vld [vmem:[%s10704_s2 + $0x28c] ss:$16 sps:$4 sm:$0xff]   ;;  %v9327_v3 = vld [vmem:[%s10704_s2 + $0x88] ss:$16 sps:$4 sm:$0xff]  }
 0x295   : > { %3434 = vmatprep.subr.bf16.mxu0 %v9317_v33  ;;  %3475 = vmatprep.subr.bf16.mxu1 %v9320_v34  ;;  %v9372_v17 = vld [vmem:[%s10704_s2 + $0x3a8] ss:$16 sps:$4 sm:$0xff]   ;;  %v9377_v18 = vld [vmem:[%s10704_s2 + $0x18c] ss:$16 sps:$4 sm:$0xff]  }
 0x296   : > { %v9380_v19 = vld [vmem:[%s10704_s2 + $0x38c] ss:$16 sps:$4 sm:$0xff]   ;;  %v9375_v21 = vld [vmem:[%s10704_s2 + $0x188] ss:$16 sps:$4 sm:$0xff]  }
 0x297   : > { %3435 = vmatpush1.bf16.msra.mxu0 %v9315_v23  ;;  %3476 = vmatpush1.bf16.msra.mxu1 %v9318_v35  ;;  %v9378_v22 = vld [vmem:[%s10704_s2 + $0x388] ss:$16 sps:$4 sm:$0xff]   ;;  %v9383_v26 = vld [vmem:[%s10704_s2 + $0x16c] ss:$16 sps:$4 sm:$0xff]  }
 0x298   : > { %3436 = vmatprep.subr.bf16.mxu0 %v9323_v36  ;;  %3477 = vmatprep.subr.bf16.mxu1 %v9326_v38  ;;  %v9386_v27 = vld [vmem:[%s10704_s2 + $0x36c] ss:$16 sps:$4 sm:$0xff]   ;;  %v9381_v32 = vld [vmem:[%s10704_s2 + $0x168] ss:$16 sps:$4 sm:$0xff]  }
 0x299   : > { %v9384_v33 = vld [vmem:[%s10704_s2 + $0x368] ss:$16 sps:$4 sm:$0xff]   ;;  %v9389_v34 = vld [vmem:[%s10704_s2 + $0x14c] ss:$16 sps:$4 sm:$0xff]  }
 0x29a   : > { %v9392_v23 = vld [vmem:[%s10704_s2 + $0x34c] ss:$16 sps:$4 sm:$0xff]   ;;  %v9387_v35 = vld [vmem:[%s10704_s2 + $0x148] ss:$16 sps:$4 sm:$0xff]  }
 0x29b   : > { %3437 = vmatpush1.bf16.msra.mxu0 %v9321_v39  ;;  %3478 = vmatpush1.bf16.msra.mxu1 %v9324_v40  ;;  %v9390_v36 = vld [vmem:[%s10704_s2 + $0x348] ss:$16 sps:$4 sm:$0xff]   ;;  %v9395_v38 = vld [vmem:[%s10704_s2 + $0x12c] ss:$16 sps:$4 sm:$0xff]  }
 0x29c   : > { %3438 = vmatprep.subr.bf16.mxu0 %v9329_v41  ;;  %3479 = vmatprep.subr.bf16.mxu1 %v9332_v46  ;;  %v9398_v39 = vld [vmem:[%s10704_s2 + $0x32c] ss:$16 sps:$4 sm:$0xff]   ;;  %v9393_v40 = vld [vmem:[%s10704_s2 + $0x128] ss:$16 sps:$4 sm:$0xff]  }
 0x29d   : > { %v9396_v41 = vld [vmem:[%s10704_s2 + $0x328] ss:$16 sps:$4 sm:$0xff]   ;;  %v9401_v46 = vld [vmem:[%s10704_s2 + $0x10c] ss:$16 sps:$4 sm:$0xff]  }
 0x29f   : > { %3439 = vmatpush1.bf16.msra.mxu0 %v9327_v3  ;;  %3480 = vmatpush1.bf16.msra.mxu1 %v9330_v42  ;;  %v9404_v3 = vld [vmem:[%s10704_s2 + $0x30c] ss:$16 sps:$4 sm:$0xff]   ;;  %v9399_v42 = vld [vmem:[%s10704_s2 + $0x108] ss:$16 sps:$4 sm:$0xff]  }
 0x2a0   : > { %3440 = vmatprep.subr.bf16.mxu0 %v9335_v43  ;;  %3481 = vmatprep.subr.bf16.mxu1 %v9338_v44  ;;  %v9402_v43 = vld [vmem:[%s10704_s2 + $0x308] ss:$16 sps:$4 sm:$0xff]   ;;  %v9407_v44 = vld [vmem:[%s10704_s2 + $0x4ec] ss:$16 sps:$4 sm:$0xff]  }
 0x2a3   : > { %3441 = vmatpush1.bf16.msra.mxu0 %v9333_v48  ;;  %3482 = vmatpush1.bf16.msra.mxu1 %v9336_v49  ;;  %v9410_v48 = vld [vmem:[%s10704_s2 + $0x6ec] ss:$16 sps:$4 sm:$0xff]   ;;  %v9405_v49 = vld [vmem:[%s10704_s2 + $0x4e8] ss:$16 sps:$4 sm:$0xff]  }
 0x2a4   : > { %3442 = vmatprep.subr.bf16.mxu0 %v9341_v51  ;;  %3483 = vmatprep.subr.bf16.mxu1 %v9344_v52  ;;  %v9408_v51 = vld [vmem:[%s10704_s2 + $0x6e8] ss:$16 sps:$4 sm:$0xff]   ;;  %v9413_v52 = vld [vmem:[%s10704_s2 + $0x4cc] ss:$16 sps:$4 sm:$0xff]  }
 0x2a7   : > { %3443 = vmatpush1.bf16.msra.mxu0 %v9339_v53  ;;  %3484 = vmatpush1.bf16.msra.mxu1 %v9342_v54  ;;  %v9416_v53 = vld [vmem:[%s10704_s2 + $0x6cc] ss:$16 sps:$4 sm:$0xff]   ;;  %v9411_v54 = vld [vmem:[%s10704_s2 + $0x4c8] ss:$16 sps:$4 sm:$0xff]  }
 0x2a8   : > { %3444 = vmatprep.subr.bf16.mxu0 %v9347_v58  ;;  %3485 = vmatprep.subr.bf16.mxu1 %v9350_v62  ;;  %v9414_v58 = vld [vmem:[%s10704_s2 + $0x6c8] ss:$16 sps:$4 sm:$0xff]   ;;  %v9419_v62 = vld [vmem:[%s10704_s2 + $0x4ac] ss:$16 sps:$4 sm:$0xff]  }
 0x2ab   : > { %3445 = vmatpush1.bf16.msra.mxu0 %v9345_v63  ;;  %3486 = vmatpush1.bf16.msra.mxu1 %v9348_v0  ;;  %v9420_v63 = vld [vmem:[%s10704_s2 + $0x6a8] ss:$16 sps:$4 sm:$0xff]   ;;  %v9428_v0 = vld [vmem:[%s10704_s2 + $0x68c] ss:$16 sps:$4 sm:$0xff]  }
 0x2ac   : > { %3446 = vmatprep.subr.bf16.mxu0 %v9353_v1  ;;  %3487 = vmatprep.subr.bf16.mxu1 %v9356_v2  ;;  %v9426_v1 = vld [vmem:[%s10704_s2 + $0x688] ss:$16 sps:$4 sm:$0xff]   ;;  %v9431_v2 = vld [vmem:[%s10704_s2 + $0x46c] ss:$16 sps:$4 sm:$0xff]  }
 0x2af   : > { %3447 = vmatpush1.bf16.msra.mxu0 %v9351_v4  ;;  %3488 = vmatpush1.bf16.msra.mxu1 %v9354_v5  ;;  %v9434_v4 = vld [vmem:[%s10704_s2 + $0x66c] ss:$16 sps:$4 sm:$0xff]   ;;  %v9429_v5 = vld [vmem:[%s10704_s2 + $0x468] ss:$16 sps:$4 sm:$0xff]  }
 0x2b0   : > { %3448 = vmatprep.subr.bf16.mxu0 %v9359_v6  ;;  %3489 = vmatprep.subr.bf16.mxu1 %v9362_v7  ;;  %v9432_v6 = vld [vmem:[%s10704_s2 + $0x668] ss:$16 sps:$4 sm:$0xff]   ;;  %v9437_v7 = vld [vmem:[%s10704_s2 + $0x44c] ss:$16 sps:$4 sm:$0xff]  }
 0x2b3   : > { %3449 = vmatpush2.bf16.msra.mxu0 %v9357_v8  ;;  %3490 = vmatpush2.bf16.msra.mxu1 %v9360_v9  ;;  %v9440_v8 = vld [vmem:[%s10704_s2 + $0x64c] ss:$16 sps:$4 sm:$0xff]   ;;  %v9435_v9 = vld [vmem:[%s10704_s2 + $0x448] ss:$16 sps:$4 sm:$0xff]  }
 0x2b4   : > { %3450 = vmatprep.subr.bf16.mxu0 %v9365_v10  ;;  %3491 = vmatprep.subr.bf16.mxu1 %v9368_v11  ;;  %v9438_v10 = vld [vmem:[%s10704_s2 + $0x648] ss:$16 sps:$4 sm:$0xff]   ;;  %v9443_v11 = vld [vmem:[%s10704_s2 + $0x42c] ss:$16 sps:$4 sm:$0xff]  }
 0x2b7   : > { %3451 = vmatpush2.bf16.msra.mxu0 %v9363_v12  ;;  %3492 = vmatpush2.bf16.msra.mxu1 %v9366_v13  ;;  %v9446_v12 = vld [vmem:[%s10704_s2 + $0x62c] ss:$16 sps:$4 sm:$0xff]   ;;  %v9441_v13 = vld [vmem:[%s10704_s2 + $0x428] ss:$16 sps:$4 sm:$0xff]  }
 0x2b8   : > { %3452 = vmatprep.subr.bf16.mxu0 %v9371_v14  ;;  %3493 = vmatprep.subr.bf16.mxu1 %v9374_v15  ;;  %v9444_v14 = vld [vmem:[%s10704_s2 + $0x628] ss:$16 sps:$4 sm:$0xff]   ;;  %v9449_v15 = vld [vmem:[%s10704_s2 + $0x40c] ss:$16 sps:$4 sm:$0xff]  }
 0x2bb   : > { %3453 = vmatpush2.bf16.msra.mxu0 %v9369_v16  ;;  %3494 = vmatpush2.bf16.msra.mxu1 %v9372_v17  ;;  %v9452_v16 = vld [vmem:[%s10704_s2 + $0x60c] ss:$16 sps:$4 sm:$0xff]   ;;  %v9447_v17 = vld [vmem:[%s10704_s2 + $0x408] ss:$16 sps:$4 sm:$0xff]  }
 0x2bc   : > { %3454 = vmatprep.subr.bf16.mxu0 %v9377_v18  ;;  %3495 = vmatprep.subr.bf16.mxu1 %v9380_v19  ;;  %v9450_v18 = vld [vmem:[%s10704_s2 + $0x608] ss:$16 sps:$4 sm:$0xff]   ;;  %v9455_v19 = vld [vmem:[%s10704_s2 + $0x5ec] ss:$16 sps:$4 sm:$0xff]  }
 0x2bf   : > { %3455 = vmatpush2.bf16.msra.mxu0 %v9375_v21  ;;  %3496 = vmatpush2.bf16.msra.mxu1 %v9378_v22  ;;  %v9458_v21 = vld [vmem:[%s10704_s2 + $0x7ec] ss:$16 sps:$4 sm:$0xff]   ;;  %v9453_v22 = vld [vmem:[%s10704_s2 + $0x5e8] ss:$16 sps:$4 sm:$0xff]  }
 0x2c0   : > { %3456 = vmatprep.subr.bf16.mxu0 %v9383_v26  ;;  %3497 = vmatprep.subr.bf16.mxu1 %v9386_v27  ;;  %v9456_v26 = vld [vmem:[%s10704_s2 + $0x7e8] ss:$16 sps:$4 sm:$0xff]   ;;  %v9461_v27 = vld [vmem:[%s10704_s2 + $0x5cc] ss:$16 sps:$4 sm:$0xff]  }
 0x2c3   : > { %3457 = vmatpush2.bf16.msra.mxu0 %v9381_v32  ;;  %3498 = vmatpush2.bf16.msra.mxu1 %v9384_v33  ;;  %v9464_v32 = vld [vmem:[%s10704_s2 + $0x7cc] ss:$16 sps:$4 sm:$0xff]   ;;  %v9459_v33 = vld [vmem:[%s10704_s2 + $0x5c8] ss:$16 sps:$4 sm:$0xff]  }
 0x2c4   : > { %3458 = vmatprep.subr.bf16.mxu0 %v9389_v34  ;;  %3499 = vmatprep.subr.bf16.mxu1 %v9392_v23  ;;  %v9462_v34 = vld [vmem:[%s10704_s2 + $0x7c8] ss:$16 sps:$4 sm:$0xff]   ;;  %v9467_v23 = vld [vmem:[%s10704_s2 + $0x5ac] ss:$16 sps:$4 sm:$0xff]  }
 0x2c7   : > { %3459 = vmatpush2.bf16.msra.mxu0 %v9387_v35  ;;  %3500 = vmatpush2.bf16.msra.mxu1 %v9390_v36  ;;  %v9470_v35 = vld [vmem:[%s10704_s2 + $0x7ac] ss:$16 sps:$4 sm:$0xff]   ;;  %v9465_v36 = vld [vmem:[%s10704_s2 + $0x5a8] ss:$16 sps:$4 sm:$0xff]  }
 0x2c8   : > { %3460 = vmatprep.subr.bf16.mxu0 %v9395_v38  ;;  %3501 = vmatprep.subr.bf16.mxu1 %v9398_v39  ;;  %v9468_v38 = vld [vmem:[%s10704_s2 + $0x7a8] ss:$16 sps:$4 sm:$0xff]   ;;  %v9473_v39 = vld [vmem:[%s10704_s2 + $0x58c] ss:$16 sps:$4 sm:$0xff]  }
 0x2cb   : > { %3461 = vmatpush2.bf16.msra.mxu0 %v9393_v40  ;;  %3502 = vmatpush2.bf16.msra.mxu1 %v9396_v41  ;;  %v9476_v40 = vld [vmem:[%s10704_s2 + $0x78c] ss:$16 sps:$4 sm:$0xff]   ;;  %v9471_v41 = vld [vmem:[%s10704_s2 + $0x588] ss:$16 sps:$4 sm:$0xff]  }
 0x2cc   : > { %3462 = vmatprep.subr.bf16.mxu0 %v9401_v46  ;;  %3503 = vmatprep.subr.bf16.mxu1 %v9404_v3  ;;  %v9474_v46 = vld [vmem:[%s10704_s2 + $0x788] ss:$16 sps:$4 sm:$0xff]   ;;  %v9479_v3 = vld [vmem:[%s10704_s2 + $0x56c] ss:$16 sps:$4 sm:$0xff]  }
 0x2cf   : > { %3463 = vmatpush2.bf16.msra.mxu0 %v9399_v42  ;;  %3504 = vmatpush2.bf16.msra.mxu1 %v9402_v43  ;;  %v9482_v42 = vld [vmem:[%s10704_s2 + $0x76c] ss:$16 sps:$4 sm:$0xff]   ;;  %v9477_v43 = vld [vmem:[%s10704_s2 + $0x568] ss:$16 sps:$4 sm:$0xff]  }
 0x2d0   : > { %3514 = vmatprep.subr.bf16.mxu0 %v9407_v44  ;;  %3555 = vmatprep.subr.bf16.mxu1 %v9410_v48  ;;  %v9480_v44 = vld [vmem:[%s10704_s2 + $0x768] ss:$16 sps:$4 sm:$0xff]   ;;  %v9485_v48 = vld [vmem:[%s10704_s2 + $0x54c] ss:$16 sps:$4 sm:$0xff]  }
 0x2d2   : > { %3465 = vmatmul.mubr.bf16.vlgmr.msra.gmra.mxu0 %v10986_v50  ;;  %3506 = vmatmul.mubr.bf16.vlgmr.msra.gmra.mxu1 %v10981_v45  ;;  %v9422_v50 = vld [vmem:[%s10704_s2 + $0x6ac] ss:$16 sps:$4 sm:$0xff]   ;;  %v9417_v45 = vld [vmem:[%s10704_s2 + $0x4a8] ss:$16 sps:$4 sm:$0xff]  }
 0x2d3   : > { %3515 = vmatpush1.bf16.msra.mxu0 %v9405_v49  ;;  %3546 = vmatprep.mubr.bf16.mxu0 %v11075_v20  ;;  %v9425_v20 = vld [vmem:[%s10704_s2 + $0x48c] ss:$16 sps:$4 sm:$0xff]  }
 0x2d4   : > { %3556 = vmatpush1.bf16.msra.mxu1 %v9408_v51  ;;  %3587 = vmatprep.mubr.bf16.mxu1 %v11080_v25  ;;  %v9423_v25 = vld [vmem:[%s10704_s2 + $0x488] ss:$16 sps:$4 sm:$0xff]   ;;  %v9488_v49 = vld [vmem:[%s10704_s2 + $0x74c] ss:$16 sps:$4 sm:$0xff]  }
 0x2d5   : > { %3516 = vmatprep.subr.bf16.mxu0 %v9413_v52  ;;  %3557 = vmatprep.subr.bf16.mxu1 %v9416_v53  ;;  %v9483_v51 = vld [vmem:[%s10704_s2 + $0x548] ss:$16 sps:$4 sm:$0xff]   ;;  %v9491_v53 = vld [vmem:[%s10704_s2 + $0x52c] ss:$16 sps:$4 sm:$0xff]  }
 0x2d6   : > { %v9486_v52 = vld [vmem:[%s10704_s2 + $0x748] ss:$16 sps:$4 sm:$0xff]  }
 0x2d7   : > { %3517 = vmatpush1.bf16.msra.mxu0 %v9411_v54  ;;  %v9494_v54 = vld [vmem:[%s10704_s2 + $0x72c] ss:$16 sps:$4 sm:$0xff]  }
 0x2d8   : > { %3558 = vmatpush1.bf16.msra.mxu1 %v9414_v58  ;;  %3518 = vmatprep.subr.bf16.mxu0 %v9419_v62  ;;  %v9489_v58 = vld [vmem:[%s10704_s2 + $0x528] ss:$16 sps:$4 sm:$0xff]  }
 0x2d9   : > { %3559 = vmatprep.subr.bf16.mxu1 %v9422_v50  ;;  %v9492_v62 = vld [vmem:[%s10704_s2 + $0x728] ss:$16 sps:$4 sm:$0xff]   ;;  %v9497_v50 = vld [vmem:[%s10704_s2 + $0x50c] ss:$16 sps:$4 sm:$0xff]  }
 0x2db   : > { %3519 = vmatpush1.bf16.msra.mxu0 %v9417_v45  ;;  %v9500_v45 = vld [vmem:[%s10704_s2 + $0x70c] ss:$16 sps:$4 sm:$0xff]  }
 0x2dc   : > { %3560 = vmatpush1.bf16.msra.mxu1 %v9420_v63  ;;  %3520 = vmatprep.subr.bf16.mxu0 %v9425_v20  ;;  %v9495_v63 = vld [vmem:[%s10704_s2 + $0x508] ss:$16 sps:$4 sm:$0xff]  }
 0x2dd   : > { %3561 = vmatprep.subr.bf16.mxu1 %v9428_v0  ;;  %v9498_v20 = vld [vmem:[%s10704_s2 + $0x708] ss:$16 sps:$4 sm:$0xff]   ;;  %v9503_v0 = vld [vmem:[%s10706_s12 + $0x74] ss:$8 sps:$4 sm:$0xff]  }
 0x2df   : > { %3521 = vmatpush1.bf16.msra.mxu0 %v9423_v25  ;;  %v9501_v25 = vld [vmem:[%s10706_s12 + $0x70] ss:$8 sps:$4 sm:$0xff]  }
 0x2e0   : > { %3562 = vmatpush1.bf16.msra.mxu1 %v9426_v1  ;;  %3522 = vmatprep.subr.bf16.mxu0 %v9431_v2  ;;  %v9506_v1 = vld [vmem:[%s10706_s12 + $0x64] ss:$8 sps:$4 sm:$0xff]  }
 0x2e1   : > { %3563 = vmatprep.subr.bf16.mxu1 %v9434_v4 }
 0x2e3   : > { %3523 = vmatpush1.bf16.msra.mxu0 %v9429_v5  ;;  %v9504_v5 = vld [vmem:[%s10706_s12 + $0x60] ss:$8 sps:$4 sm:$0xff]  }
 0x2e4   : > { %3564 = vmatpush1.bf16.msra.mxu1 %v9432_v6  ;;  %3524 = vmatprep.subr.bf16.mxu0 %v9437_v7  ;;  %v9509_v7 = vld [vmem:[%s10706_s12 + $0x54] ss:$8 sps:$4 sm:$0xff]  }
 0x2e5   : > { %3565 = vmatprep.subr.bf16.mxu1 %v9440_v8 }
 0x2e7   : > { %3525 = vmatpush1.bf16.msra.mxu0 %v9435_v9 }
 0x2e8   : > { %3566 = vmatpush1.bf16.msra.mxu1 %v9438_v10  ;;  %3526 = vmatprep.subr.bf16.mxu0 %v9443_v11  ;;  %v9512_v11 = vld [vmem:[%s10706_s12 + $0x44] ss:$8 sps:$4 sm:$0xff]  }
 0x2e9   : > { %3567 = vmatprep.subr.bf16.mxu1 %v9446_v12 }
 0x2eb   : > { %3527 = vmatpush1.bf16.msra.mxu0 %v9441_v13  ;;  %v9549_v13 = vld [vmem:[%s10706_s12 + $0x170] ss:$8 sps:$4 sm:$0xff]  }
 0x2ec   : > { %3568 = vmatpush1.bf16.msra.mxu1 %v9444_v14  ;;  %3528 = vmatprep.subr.bf16.mxu0 %v9449_v15  ;;  %v9551_v14 = vld [vmem:[%s10706_s12 + $0x174] ss:$8 sps:$4 sm:$0xff]   ;;  %v9554_v15 = vld [vmem:[%s10706_s12 + $0x164] ss:$8 sps:$4 sm:$0xff]  }
 0x2ed   : > { %3569 = vmatprep.subr.bf16.mxu1 %v9452_v16  ;;  %v9510_v16 = vld [vmem:[%s10706_s12 + $0x40] ss:$8 sps:$4 sm:$0xff]  }
 0x2ef   : > { %3529 = vmatpush1.bf16.msra.mxu0 %v9447_v17  ;;  %v9515_v17 = vld [vmem:[%s10706_s12 + $0x34] ss:$8 sps:$4 sm:$0xff]  }
 0x2f0   : > { %3570 = vmatpush1.bf16.msra.mxu1 %v9450_v18  ;;  %3530 = vmatprep.subr.bf16.mxu0 %v9455_v19  ;;  %v9552_v18 = vld [vmem:[%s10706_s12 + $0x160] ss:$8 sps:$4 sm:$0xff]   ;;  %v9557_v19 = vld [vmem:[%s10706_s12 + $0x154] ss:$8 sps:$4 sm:$0xff]  }
 0x2f1   : > { %3571 = vmatprep.subr.bf16.mxu1 %v9458_v21  ;;  %v9513_v21 = vld [vmem:[%s10706_s12 + $0x30] ss:$8 sps:$4 sm:$0xff]  }
 0x2f3   : > { %3531 = vmatpush2.bf16.msra.mxu0 %v9453_v22  ;;  %v9518_v22 = vld [vmem:[%s10706_s12 + $0x24] ss:$8 sps:$4 sm:$0xff]  }
 0x2f4   : > { %3572 = vmatpush2.bf16.msra.mxu1 %v9456_v26  ;;  %3532 = vmatprep.subr.bf16.mxu0 %v9461_v27  ;;  %v9555_v26 = vld [vmem:[%s10706_s12 + $0x150] ss:$8 sps:$4 sm:$0xff]   ;;  %v9560_v27 = vld [vmem:[%s10706_s12 + $0x144] ss:$8 sps:$4 sm:$0xff]  }
 0x2f5   : > { %3573 = vmatprep.subr.bf16.mxu1 %v9464_v32  ;;  %v9516_v32 = vld [vmem:[%s10706_s12 + $0x20] ss:$8 sps:$4 sm:$0xff]  }
 0x2f7   : > { %3533 = vmatpush2.bf16.msra.mxu0 %v9459_v33  ;;  %v9521_v33 = vld [vmem:[%s10706_s12 + $0x14] ss:$8 sps:$4 sm:$0xff]  }
 0x2f8   : > { %3574 = vmatpush2.bf16.msra.mxu1 %v9462_v34  ;;  %3534 = vmatprep.subr.bf16.mxu0 %v9467_v23  ;;  %v9558_v34 = vld [vmem:[%s10706_s12 + $0x140] ss:$8 sps:$4 sm:$0xff]   ;;  %v9563_v23 = vld [vmem:[%s10706_s12 + $0x134] ss:$8 sps:$4 sm:$0xff]  }
 0x2f9   : > { %3575 = vmatprep.subr.bf16.mxu1 %v9470_v35  ;;  %v9519_v35 = vld [vmem:[%s10706_s12 + $0x10] ss:$8 sps:$4 sm:$0xff]  }
 0x2fb   : > { %3535 = vmatpush2.bf16.msra.mxu0 %v9465_v36  ;;  %v9524_v36 = vld [vmem:[%s10706_s12 + $0x4] ss:$8 sps:$4 sm:$0xff]  }
 0x2fc   : > { %3576 = vmatpush2.bf16.msra.mxu1 %v9468_v38  ;;  %3536 = vmatprep.subr.bf16.mxu0 %v9473_v39  ;;  %v9561_v38 = vld [vmem:[%s10706_s12 + $0x130] ss:$8 sps:$4 sm:$0xff]   ;;  %v9566_v39 = vld [vmem:[%s10706_s12 + $0x124] ss:$8 sps:$4 sm:$0xff]  }
 0x2fd   : > { %3577 = vmatprep.subr.bf16.mxu1 %v9476_v40  ;;  %v9522_v40 = vld [vmem:[%s10706_s12] ss:$8 sps:$4 sm:$0xff]  }
 0x2ff   : > { %3537 = vmatpush2.bf16.msra.mxu0 %v9471_v41  ;;  %v9527_v41 = vld [vmem:[%s10706_s12 + $0xf4] ss:$8 sps:$4 sm:$0xff]  }
 0x300   : > { %3578 = vmatpush2.bf16.msra.mxu1 %v9474_v46  ;;  %3538 = vmatprep.subr.bf16.mxu0 %v9479_v3  ;;  %v9564_v46 = vld [vmem:[%s10706_s12 + $0x120] ss:$8 sps:$4 sm:$0xff]   ;;  %v9569_v3 = vld [vmem:[%s10706_s12 + $0x114] ss:$8 sps:$4 sm:$0xff]  }
 0x301   : > { %3579 = vmatprep.subr.bf16.mxu1 %v9482_v42  ;;  %v9525_v42 = vld [vmem:[%s10706_s12 + $0xf0] ss:$8 sps:$4 sm:$0xff]  }
 0x303   : > { %3539 = vmatpush2.bf16.msra.mxu0 %v9477_v43  ;;  %v9530_v43 = vld [vmem:[%s10706_s12 + $0xe4] ss:$8 sps:$4 sm:$0xff]  }
 0x304   : > { %3580 = vmatpush2.bf16.msra.mxu1 %v9480_v44  ;;  %3540 = vmatprep.subr.bf16.mxu0 %v9485_v48  ;;  %v9567_v44 = vld [vmem:[%s10706_s12 + $0x110] ss:$8 sps:$4 sm:$0xff]   ;;  %v9572_v48 = vld [vmem:[%s10706_s12 + $0x104] ss:$8 sps:$4 sm:$0xff]  }
 0x305   : > { %3581 = vmatprep.subr.bf16.mxu1 %v9488_v49  ;;  %v9528_v49 = vld [vmem:[%s10706_s12 + $0xe0] ss:$8 sps:$4 sm:$0xff]  }
 0x307   : > { %3541 = vmatpush2.bf16.msra.mxu0 %v9483_v51  ;;  %v9533_v51 = vld [vmem:[%s10706_s12 + $0xd4] ss:$8 sps:$4 sm:$0xff]  }
 0x308   : > { %3582 = vmatpush2.bf16.msra.mxu1 %v9486_v52  ;;  %3542 = vmatprep.subr.bf16.mxu0 %v9491_v53  ;;  %v9570_v52 = vld [vmem:[%s10706_s12 + $0x100] ss:$8 sps:$4 sm:$0xff]   ;;  %v9575_v53 = vld [vmem:[%s10706_s12 + $0x1f4] ss:$8 sps:$4 sm:$0xff]  }
 0x309   : > { %3583 = vmatprep.subr.bf16.mxu1 %v9494_v54  ;;  %v9531_v54 = vld [vmem:[%s10706_s12 + $0xd0] ss:$8 sps:$4 sm:$0xff]  }
 0x30b   : > { %3543 = vmatpush2.bf16.msra.mxu0 %v9489_v58  ;;  %v9536_v58 = vld [vmem:[%s10706_s12 + $0xc4] ss:$8 sps:$4 sm:$0xff]  }
 0x30c   : > { %3584 = vmatpush2.bf16.msra.mxu1 %v9492_v62  ;;  %3544 = vmatprep.subr.bf16.mxu0 %v9497_v50  ;;  %v9573_v62 = vld [vmem:[%s10706_s12 + $0x1f0] ss:$8 sps:$4 sm:$0xff]   ;;  %v9578_v50 = vld [vmem:[%s10706_s12 + $0x1e4] ss:$8 sps:$4 sm:$0xff]  }
 0x30d   : > { %3585 = vmatprep.subr.bf16.mxu1 %v9500_v45  ;;  %v9534_v45 = vld [vmem:[%s10706_s12 + $0xc0] ss:$8 sps:$4 sm:$0xff]  }
 0x30f   : > { %3545 = vmatpush2.bf16.msra.mxu0 %v9495_v63  ;;  %v9539_v63 = vld [vmem:[%s10706_s12 + $0xb4] ss:$8 sps:$4 sm:$0xff]  }
 0x310   : > { %3586 = vmatpush2.bf16.msra.mxu1 %v9498_v20  ;;  %3996 = vmatprep.subr.bf16.mxu0 %v9503_v0  ;;  %v9576_v20 = vld [vmem:[%s10706_s12 + $0x1e0] ss:$8 sps:$4 sm:$0xff]   ;;  %v9581_v0 = vld [vmem:[%s10706_s12 + $0x1d4] ss:$8 sps:$4 sm:$0xff]  }
 0x311   : > { %4037 = vmatprep.subr.bf16.mxu1 %v9551_v14  ;;  %v9585_v14 = vld [vmem:[%s10706_s12 + $0x1b0] ss:$8 sps:$4 sm:$0xff]  }
 0x312   : > { %3547 = vmatmul.mubr.bf16.vlgmr.msra.gmra.mxu0 %v11078_v24  ;;  %v11221_v2 = vpop.f32.mrf.mxu0  ;;  %v11224_v4 = vpop.f32.mrf.mxu1 }
 0x313   : > { %3588 = vmatmul.mubr.bf16.vlgmr.msra.gmra.mxu1 %v11073_v30  ;;  %3997 = vmatpush1.bf16.msra.mxu0 %v9501_v25  ;;  %v9507_v30 = vld [vmem:[%s10706_s12 + $0x50] ss:$8 sps:$4 sm:$0xff]  }
 0x314   : > { %v11227_v6 = vpop.f32.mrf.mxu0  ;;  %3998 = vmatprep.subr.bf16.mxu0 %v9506_v1  ;;  %v11230_v8 = vpop.f32.mrf.mxu1  ;;  %4038 = vmatpush1.bf16.msra.mxu1 %v9549_v13  ;;  %v9537_v25 = vld [vmem:[%s10706_s12 + $0xb0] ss:$8 sps:$4 sm:$0xff]   ;;  %v9542_v1 = vld [vmem:[%s10706_s12 + $0xa4] ss:$8 sps:$4 sm:$0xff]  }
 0x315   : > { %4039 = vmatprep.subr.bf16.mxu1 %v9554_v15  ;;  %v9548_v13 = vld [vmem:[%s10706_s12 + $0x84] ss:$8 sps:$4 sm:$0xff]  }
 0x316   : > { %v3306_v24 = vpop.f32.mrf.mxu0  ;;  %v3347_v9 = vpop.f32.mrf.mxu1 }
 0x317   : > { %3999 = vmatpush1.bf16.msra.mxu0 %v9504_v5  ;;  %v9579_v5 = vld [vmem:[%s10706_s12 + $0x1d0] ss:$8 sps:$4 sm:$0xff]   ;;  %v9540_v24 = vld [vmem:[%s10706_s12 + $0xa0] ss:$8 sps:$4 sm:$0xff]   ;;  %v9545_v9 = vld [vmem:[%s10706_s12 + $0x94] ss:$8 sps:$4 sm:$0xff]  }
 0x318   : > { %v3307_v10 = vpop.f32.mrf.mxu0  ;;  %4000 = vmatprep.subr.bf16.mxu0 %v9509_v7  ;;  %v3348_v12 = vpop.f32.mrf.mxu1  ;;  %4040 = vmatpush1.bf16.msra.mxu1 %v9552_v18  ;;  %v9584_v7 = vld [vmem:[%s10706_s12 + $0x1c4] ss:$8 sps:$4 sm:$0xff]   ;;  %v9546_v18 = vld [vmem:[%s10706_s12 + $0x80] ss:$8 sps:$4 sm:$0xff]  }
 0x319   : > { %4041 = vmatprep.subr.bf16.mxu1 %v9557_v19  ;;  %v9587_v10 = vld [vmem:[%s10706_s12 + $0x1b4] ss:$8 sps:$4 sm:$0xff]   ;;  %v9543_v12 = vld [vmem:[%s10706_s12 + $0x90] ss:$8 sps:$4 sm:$0xff]   ;;  %v9588_v19 = vld [vmem:[%s10706_s12 + $0x1a0] ss:$8 sps:$4 sm:$0xff]  }
 0x31b   : > { %4001 = vmatpush1.bf16.msra.mxu0 %v9507_v30  ;;  %v9582_v30 = vld [vmem:[%s10706_s12 + $0x1c0] ss:$8 sps:$4 sm:$0xff]  }
 0x31c   : > { %4002 = vmatprep.subr.bf16.mxu0 %v9512_v11  ;;  %4042 = vmatpush1.bf16.msra.mxu1 %v9555_v26  ;;  %v11282_v11 = vld [vmem:[%s10686_s24 + $0x8] sm:$0xf] }
 0x31d   : > { %4043 = vmatprep.subr.bf16.mxu1 %v9560_v27  ;;  %v3251_v15 = vrot.slane %v11282_v11, %v10959_v28 }
 0x31f   : > { %4003 = vmatpush1.bf16.msra.mxu0 %v9510_v16  ;;  %v9590_v16 = vld [vmem:[%s10706_s12 + $0x1a4] ss:$8 sps:$4 sm:$0xff]  }
 0x320   : > { %4004 = vmatprep.subr.bf16.mxu0 %v9515_v17  ;;  %4044 = vmatpush1.bf16.msra.mxu1 %v9558_v34  ;;  %v3255_v17 = vrot.slane %v11282_v11, %v10968_v31 }
 0x321   : > { %4045 = vmatprep.subr.bf16.mxu1 %v9563_v23 }
 0x323   : > { %4005 = vmatpush1.bf16.msra.mxu0 %v9513_v21  ;;  %v3303_v21 = vadd.f32 %v11221_v2, %v3251_v15 }
 0x324   : > { %4006 = vmatprep.subr.bf16.mxu0 %v9518_v22  ;;  %4046 = vmatpush1.bf16.msra.mxu1 %v9561_v38  ;;  %v3305_v22 = vadd.f32 %v11227_v6, %v3255_v17 }
 0x325   : > { %4047 = vmatprep.subr.bf16.mxu1 %v9566_v39  ;;  %v3344_v26 = vadd.f32 %v11224_v4, %v3303_v21  ;;  %v9591_v39 = vld [vmem:[%s10706_s12 + $0x190] ss:$8 sps:$4 sm:$0xff]   ;;  %v9596_v4 = vld [vmem:[%s10706_s12 + $0x184] ss:$8 sps:$4 sm:$0xff]  }
 0x327   : > { %4007 = vmatpush1.bf16.msra.mxu0 %v9516_v32  ;;  %v3346_v32 = vadd.f32 %v11230_v8, %v3305_v22  ;;  %v9594_v8 = vld [vmem:[%s10706_s12 + $0x180] ss:$8 sps:$4 sm:$0xff]  }
 0x328   : > { %4008 = vmatprep.subr.bf16.mxu0 %v9521_v33  ;;  %4048 = vmatpush1.bf16.msra.mxu1 %v9564_v46 }
 0x329   : > { %4049 = vmatprep.subr.bf16.mxu1 %v9569_v3 }
 0x32b   : > { %4009 = vmatpush1.bf16.msra.mxu0 %v9519_v35  ;;  %v9593_v35 = vld [vmem:[%s10706_s12 + $0x194] ss:$8 sps:$4 sm:$0xff]  }
 0x32c   : > { %4010 = vmatprep.subr.bf16.mxu0 %v9524_v36  ;;  %4050 = vmatpush1.bf16.msra.mxu1 %v9567_v44 }
 0x32d   : > { %4051 = vmatprep.subr.bf16.mxu1 %v9572_v48 }
 0x32f   : > { %4011 = vmatpush1.bf16.msra.mxu0 %v9522_v40 }
 0x330   : > { %4012 = vmatprep.subr.bf16.mxu0 %v9527_v41  ;;  %4052 = vmatpush1.bf16.msra.mxu1 %v9570_v52 }
 0x331   : > { %4053 = vmatprep.subr.bf16.mxu1 %v9575_v53 }
 0x333   : > { %4013 = vmatpush2.bf16.msra.mxu0 %v9525_v42 }
 0x334   : > { %4014 = vmatprep.subr.bf16.mxu0 %v9530_v43  ;;  %4054 = vmatpush2.bf16.msra.mxu1 %v9573_v62  ;;  %v9597_v62 = vld [vmem:[%s10713_s21 + $0x78] sm:$0xff]  }
 0x335   : > { %4055 = vmatprep.subr.bf16.mxu1 %v9578_v50  ;;  %v9598_v50 = vld [vmem:[%s10713_s21 + $0x38] sm:$0xff]  }
 0x337   : > { %4015 = vmatpush2.bf16.msra.mxu0 %v9528_v49 }
 0x338   : > { %4016 = vmatprep.subr.bf16.mxu0 %v9533_v51  ;;  %4056 = vmatpush2.bf16.msra.mxu1 %v9576_v20  ;;  %v9601_v20 = vld [vmem:[%s10713_s21 + $0x68] sm:$0xff]  }
 0x339   : > { %4057 = vmatprep.subr.bf16.mxu1 %v9581_v0  ;;  %v9602_v0 = vld [vmem:[%s10713_s21 + $0x28] sm:$0xff]  }
 0x33b   : > { %4017 = vmatpush2.bf16.msra.mxu0 %v9531_v54 }
 0x33c   : > { %4018 = vmatprep.subr.bf16.mxu0 %v9536_v58  ;;  %4058 = vmatpush2.bf16.msra.mxu1 %v9579_v5  ;;  %v9605_v5 = vld [vmem:[%s10713_s21 + $0x58] sm:$0xff]  }
 0x33d   : > { %4059 = vmatprep.subr.bf16.mxu1 %v9584_v7  ;;  %v9606_v7 = vld [vmem:[%s10713_s21 + $0x18] sm:$0xff]  }
 0x33f   : > { %4019 = vmatpush2.bf16.msra.mxu0 %v9534_v45  ;;  %v9599_v45 = vld [vmem:[%s10713_s21 + $0x70] sm:$0xff]  }
 0x340   : > { %4020 = vmatprep.subr.bf16.mxu0 %v9539_v63  ;;  %4060 = vmatpush2.bf16.msra.mxu1 %v9582_v30  ;;  %v9600_v63 = vld [vmem:[%s10713_s21 + $0x30] sm:$0xff]   ;;  %v3259_v30 = vrot.slane %v11282_v11, %v10962_v29 }
 0x341   : > { %4061 = vmatprep.subr.bf16.mxu1 %v9587_v10  ;;  %v3263_v10 = vrot.slane %v11282_v11, %v10971_v59 }
 0x343   : > { %4021 = vmatpush2.bf16.msra.mxu0 %v9537_v25  ;;  %v9603_v25 = vld [vmem:[%s10713_s21 + $0x60] sm:$0xff]  }
 0x344   : > { %4022 = vmatprep.subr.bf16.mxu0 %v9542_v1  ;;  %4062 = vmatpush2.bf16.msra.mxu1 %v9585_v14  ;;  %v9604_v1 = vld [vmem:[%s10713_s21 + $0x20] sm:$0xff]  }
 0x345   : > { %4063 = vmatprep.subr.bf16.mxu1 %v9590_v16 }
 0x347   : > { %4023 = vmatpush2.bf16.msra.mxu0 %v9540_v24  ;;  %v9607_v24 = vld [vmem:[%s10713_s21 + $0x50] sm:$0xff]  }
 0x348   : > { %4024 = vmatprep.subr.bf16.mxu0 %v9545_v9  ;;  %4064 = vmatpush2.bf16.msra.mxu1 %v9588_v19  ;;  %v9608_v9 = vld [vmem:[%s10713_s21 + $0x10] sm:$0xff]  }
 0x349   : > { %4065 = vmatprep.subr.bf16.mxu1 %v9593_v35 }
 0x34b   : > { %4025 = vmatpush2.bf16.msra.mxu0 %v9543_v12 }
 0x34c   : > { %4026 = vmatprep.subr.bf16.mxu0 %v9548_v13  ;;  %4066 = vmatpush2.bf16.msra.mxu1 %v9591_v39  ;;  %v9610_v39 = vld [vmem:[%s10713_s21 + $0x8] sm:$0xff]  }
 0x34d   : > { %4067 = vmatprep.subr.bf16.mxu1 %v9596_v4  ;;  %v9613_v4 = vld [vmem:[%s10715_s9 + $0x70] ss:$8 sps:$4 sm:$0xff]  }
 0x34f   : > { %4027 = vmatpush2.bf16.msra.mxu0 %v9546_v18 }
 0x350   : > { %4068 = vmatpush2.bf16.msra.mxu1 %v9594_v8  ;;  %9003 = vmatprep.subr.bf16.mxu0 %v9597_v62  ;;  %v9616_v8 = vld [vmem:[%s10715_s9 + $0x60] ss:$8 sps:$4 sm:$0xff]  }
 0x352   : > { %v3384_v27 = vpop.f32.mrf.mxu0  ;;  %v3425_v34 = vpop.f32.mrf.mxu1 }
 0x353   : > { %v3385_v33 = vadd.f32 %v3384_v27, %v3344_v26 }
 0x354   : > { %v3386_v23 = vpop.f32.mrf.mxu0  ;;  %v3427_v38 = vpop.f32.mrf.mxu1 }
 0x355   : > { %v3387_v36 = vadd.f32 %v3386_v23, %v3346_v32  ;;  %v3426_v2 = vadd.f32 %v3425_v34, %v3385_v33 }
 0x356   : > { %v3388_v40 = vpop.f32.mrf.mxu0  ;;  %v3429_v41 = vpop.f32.mrf.mxu1 }
 0x357   : > { %v3428_v6 = vadd.f32 %v3427_v38, %v3387_v36  ;;  %v3596_v43 = vpack.c.bf16 %v3426_v2, %v3426_v2  ;;  %v9609_v38 = vld [vmem:[%s10713_s21 + $0x48] sm:$0xff]   ;;  %v9612_v41 = vld [vmem:[%s10713_s21] sm:$0xff]  }
 0x358   : > { %v3389_v46 = vpop.f32.mrf.mxu0  ;;  %v3430_v42 = vpop.f32.mrf.mxu1 }
 0x359   : > { %v3597_v3 = vpack.c.bf16 %v3428_v6, %v3428_v6  ;;  %v9611_v6 = vld [vmem:[%s10713_s21 + $0x40] sm:$0xff]  }
 0x35a   : > { %v9618_v42 = vld [vmem:[%s10715_s9 + $0x64] ss:$8 sps:$4 sm:$0xff]  }
 0x35b   : > { %4028 = vmatprep.mubr.bf16.mxu0 %v3597_v3  ;;  %v9615_v3 = vld [vmem:[%s10715_s9 + $0x74] ss:$8 sps:$4 sm:$0xff]  }
 0x35c   : > { %4029 = vmatmul.mubr.bf16.vlgmr.msra.gmra.mxu0 %v3596_v43  ;;  %4358 = vmatprep.subr.bf16.mxu1 %v9615_v3  ;;  %v9621_v43 = vld [vmem:[%s10715_s9 + $0x54] ss:$8 sps:$4 sm:$0xff]   ;;  %v9703_v3 = vld [vmem:[%s10721_s26 + $0x180] ss:$16 sps:$4 sm:$0xff]  }
 0x35d   : > { %9004 = vmatpush3.bf16.msra.mxu0 %v9598_v50 }
 0x35e   : > { %9005 = vmatprep.subr.bf16.mxu0 %v9599_v45 }
 0x361   : > { %9006 = vmatpush3.bf16.msra.mxu0 %v9600_v63 }
 0x362   : > { %9007 = vmatprep.subr.bf16.mxu0 %v9601_v20 }
 0x365   : > { %9008 = vmatpush3.bf16.msra.mxu0 %v9602_v0 }
 0x366   : > { %9009 = vmatprep.subr.bf16.mxu0 %v9603_v25 }
 0x369   : > { %9010 = vmatpush3.bf16.msra.mxu0 %v9604_v1 }
 0x36a   : > { %9011 = vmatprep.subr.bf16.mxu0 %v9605_v5 }
 0x36d   : > { %9012 = vmatpush3.bf16.msra.mxu0 %v9606_v7 }
 0x36e   : > { %9013 = vmatprep.subr.bf16.mxu0 %v9607_v24 }
 0x371   : > { %9014 = vmatpush3.bf16.msra.mxu0 %v9608_v9 }
 0x372   : > { %9015 = vmatprep.subr.bf16.mxu0 %v9609_v38  ;;  %v9679_v38 = vld [vmem:[%s10721_s26] ss:$16 sps:$4 sm:$0xff]  }
 0x375   : > { %9016 = vmatpush3.bf16.msra.mxu0 %v9610_v39  ;;  %v9687_v39 = vld [vmem:[%s10721_s26 + $0x1e4] ss:$16 sps:$4 sm:$0xff]  }
 0x376   : > { %9017 = vmatprep.subr.bf16.mxu0 %v9611_v6  ;;  %v9691_v6 = vld [vmem:[%s10721_s26 + $0x1c0] ss:$16 sps:$4 sm:$0xff]  }
 0x379   : > { %9018 = vmatpush3.bf16.msra.mxu0 %v9612_v41  ;;  %v9699_v41 = vld [vmem:[%s10721_s26 + $0x1a4] ss:$16 sps:$4 sm:$0xff]  }
 0x392   : > { %v3466_v44 = vpop.f32.mrf.mxu0  ;;  %v3507_v48 = vpop.f32.mrf.mxu1 }
 0x393   : > { %v3467_v12 = vadd.f32 %v3466_v44, %v3259_v30  ;;  %v9619_v44 = vld [vmem:[%s10715_s9 + $0x50] ss:$8 sps:$4 sm:$0xff]  }
 0x394   : > { %v3468_v49 = vpop.f32.mrf.mxu0  ;;  %v3509_v51 = vpop.f32.mrf.mxu1  ;;  %v9631_v30 = vld [vmem:[%s10715_s9 + $0x10] ss:$8 sps:$4 sm:$0xff]  }
 0x395   : > { %v3469_v13 = vadd.f32 %v3468_v49, %v3263_v10  ;;  %v3508_v14 = vadd.f32 %v3507_v48, %v3467_v12  ;;  %v9624_v48 = vld [vmem:[%s10715_s9 + $0x44] ss:$8 sps:$4 sm:$0xff]   ;;  %v9622_v49 = vld [vmem:[%s10715_s9 + $0x40] ss:$8 sps:$4 sm:$0xff]   ;;  %v9633_v10 = vld [vmem:[%s10715_s9 + $0x14] ss:$8 sps:$4 sm:$0xff]  }
 0x396   : > { %v3470_v52 = vpop.f32.mrf.mxu0  ;;  %v3511_v53 = vpop.f32.mrf.mxu1  ;;  %v9636_v12 = vld [vmem:[%s10715_s9 + $0x4] ss:$8 sps:$4 sm:$0xff]  }
 0x397   : > { %v3510_v16 = vadd.f32 %v3509_v51, %v3469_v13  ;;  %v9627_v51 = vld [vmem:[%s10715_s9 + $0x34] ss:$8 sps:$4 sm:$0xff]   ;;  %v9625_v52 = vld [vmem:[%s10715_s9 + $0x30] ss:$8 sps:$4 sm:$0xff]   ;;  %v9630_v53 = vld [vmem:[%s10715_s9 + $0x24] ss:$8 sps:$4 sm:$0xff]  }
 0x398   : > { %v3471_v54 = vpop.f32.mrf.mxu0  ;;  %v3512_v58 = vpop.f32.mrf.mxu1  ;;  %v9634_v13 = vld [vmem:[%s10715_s9] ss:$8 sps:$4 sm:$0xff]  }
 0x399   : > { %v9628_v54 = vld [vmem:[%s10715_s9 + $0x20] ss:$8 sps:$4 sm:$0xff]   ;;  %v3664_v58 = vld [vmem:[%s10686_s24 + $0xc] sm:$0x3] }
 0x39a   : > { %v3989_v62 = vrot.slane %v3664_v58, %v10959_v28  ;;  %v3993_v50 = vrot.slane %v3664_v58, %v10968_v31 }
 0x3d2   : > { %v3548_v15 = vpop.f32.mrf.mxu0 }
 0x3d3   : > { %v3549_v17 = vadd.f32 %v3548_v15, %v3508_v14  ;;  %v3589_v18 = vpop.f32.mrf.mxu1  ;;  %v10251_v14 = vmov 0   ;;  %v9637_v15 = vld [vmem:[%s10721_s26 + $0xe0] ss:$16 sps:$4 sm:$0xff]  }
 0x3d4   : > { %v3550_v19 = vpop.f32.mrf.mxu0 }
 0x3d5   : > { %v3551_v21 = vadd.f32 %v3550_v19, %v3510_v16  ;;  %v3591_v22 = vpop.f32.mrf.mxu1  ;;  %v3590_v26 = vadd.f32 %v3589_v18, %v3549_v17  ;;  %v9639_v16 = vld [vmem:[%s10721_s26 + $0xe4] ss:$16 sps:$4 sm:$0xff]   ;;  %v9642_v17 = vld [vmem:[%s10721_s26 + $0xec] ss:$16 sps:$4 sm:$0xff]   ;;  %v9643_v19 = vld [vmem:[%s10721_s26 + $0xc0] ss:$16 sps:$4 sm:$0xff]  }
 0x3d6   : > { %v3552_v27 = vpop.f32.mrf.mxu0  ;;  %v9645_v18 = vld [vmem:[%s10721_s26 + $0xc4] ss:$16 sps:$4 sm:$0xff]   ;;  %4807 = vmatprep.subr.bf16.mxu0 %v9639_v16  ;;  %v9696_v16 = vld [vmem:[%s10721_s26 + $0x1cc] ss:$16 sps:$4 sm:$0xff]  }
 0x3d7   : > { %v3592_v32 = vadd.f32 %v3591_v22, %v3551_v21  ;;  %v3593_v33 = vpop.f32.mrf.mxu1  ;;  %v3598_v35 = vpack.c.bf16 %v3590_v26, %v3590_v26  ;;  %v9651_v21 = vld [vmem:[%s10721_s26 + $0xa4] ss:$16 sps:$4 sm:$0xff]   ;;  %v9649_v22 = vld [vmem:[%s10721_s26 + $0xa0] ss:$16 sps:$4 sm:$0xff]  }
 0x3d8   : > { %v3553_v34 = vpop.f32.mrf.mxu0  ;;  %v9657_v26 = vld [vmem:[%s10721_s26 + $0x84] ss:$16 sps:$4 sm:$0xff]   ;;  %v9655_v27 = vld [vmem:[%s10721_s26 + $0x80] ss:$16 sps:$4 sm:$0xff]  }
 0x3d9   : > { %v3599_v11 = vpack.c.bf16 %v3592_v32, %v3592_v32  ;;  %v3594_v23 = vpop.f32.mrf.mxu1  ;;  %v9663_v32 = vld [vmem:[%s10721_s26 + $0x64] ss:$16 sps:$4 sm:$0xff]   ;;  %v9661_v33 = vld [vmem:[%s10721_s26 + $0x60] ss:$16 sps:$4 sm:$0xff]  }
 0x3da   : > { %v9669_v34 = vld [vmem:[%s10721_s26 + $0x44] ss:$16 sps:$4 sm:$0xff]  }
 0x3db   : > { %4069 = vmatprep.mubr.bf16.mxu1 %v3599_v11  ;;  %v9667_v11 = vld [vmem:[%s10721_s26 + $0x40] ss:$16 sps:$4 sm:$0xff]   ;;  %v9675_v23 = vld [vmem:[%s10721_s26 + $0x24] ss:$16 sps:$4 sm:$0xff]  }
 0x3dc   : > { %4070 = vmatmul.mubr.bf16.vlgmr.msra.gmra.mxu1 %v3598_v35  ;;  %v9673_v35 = vld [vmem:[%s10721_s26 + $0x20] ss:$16 sps:$4 sm:$0xff]  }
 0x3dd   : > { %4359 = vmatpush1.bf16.msra.mxu1 %v9613_v4  ;;  %4390 = vmatprep.mubr.bf16.mxu1 %v10251_v14  ;;  %v9705_v4 = vld [vmem:[%s10721_s26 + $0x184] ss:$16 sps:$4 sm:$0xff]   ;;  %v9690_v14 = vld [vmem:[%s10721_s26 + $0x1ec] ss:$16 sps:$4 sm:$0xff]  }
 0x3de   : > { %4360 = vmatprep.subr.bf16.mxu1 %v9618_v42  ;;  %v9711_v42 = vld [vmem:[%s10721_s26 + $0x164] ss:$16 sps:$4 sm:$0xff]  }
 0x3e1   : > { %4361 = vmatpush1.bf16.msra.mxu1 %v9616_v8  ;;  %v9709_v8 = vld [vmem:[%s10721_s26 + $0x160] ss:$16 sps:$4 sm:$0xff]  }
 0x3e2   : > { %4362 = vmatprep.subr.bf16.mxu1 %v9621_v43  ;;  %v9717_v43 = vld [vmem:[%s10721_s26 + $0x144] ss:$16 sps:$4 sm:$0xff]  }
 0x3e5   : > { %4363 = vmatpush1.bf16.msra.mxu1 %v9619_v44  ;;  %v9715_v44 = vld [vmem:[%s10721_s26 + $0x140] ss:$16 sps:$4 sm:$0xff]  }
 0x3e6   : > { %4364 = vmatprep.subr.bf16.mxu1 %v9624_v48 }
 0x3e9   : > { %4365 = vmatpush1.bf16.msra.mxu1 %v9622_v49  ;;  %v4112_v49 = vld [vmem:[%s10686_s24 + $0xe] sm:$0x1] }
 0x3ea   : > { %4366 = vmatprep.subr.bf16.mxu1 %v9627_v51 }
 0x3ed   : > { %4367 = vmatpush1.bf16.msra.mxu1 %v9625_v52 }
 0x3ee   : > { %4368 = vmatprep.subr.bf16.mxu1 %v9630_v53 }
 0x3f1   : > { %4369 = vmatpush1.bf16.msra.mxu1 %v9628_v54 }
 0x3f2   : > { %4370 = vmatprep.subr.bf16.mxu1 %v9633_v10  ;;  %v9676_v10 = vld [vmem:[%s10721_s26 + $0x28] ss:$16 sps:$4 sm:$0xff]  }
 0x3f5   : > { %4371 = vmatpush1.bf16.msra.mxu1 %v9631_v30  ;;  %v9678_v30 = vld [vmem:[%s10721_s26 + $0x2c] ss:$16 sps:$4 sm:$0xff]  }
 0x3f6   : > { %4372 = vmatprep.subr.bf16.mxu1 %v9636_v12  ;;  %v9684_v12 = vld [vmem:[%s10721_s26 + $0xc] ss:$16 sps:$4 sm:$0xff]  }
 0x3f9   : > { %4373 = vmatpush1.bf16.msra.mxu1 %v9634_v13  ;;  %v9682_v13 = vld [vmem:[%s10721_s26 + $0x8] ss:$16 sps:$4 sm:$0xff]  }
 0x3fa   : > { %4848 = vmatprep.subr.bf16.mxu1 %v9642_v17  ;;  %v9694_v17 = vld [vmem:[%s10721_s26 + $0x1c8] ss:$16 sps:$4 sm:$0xff]  }
 0x41c   : > { %v4030_v36 = vpop.f32.mrf.mxu0 }
 0x41d   : > { %v4031_v45 = vadd.f32 %v4030_v36, %v3989_v62  ;;  %v9681_v36 = vld [vmem:[%s10721_s26 + $0x4] ss:$16 sps:$4 sm:$0xff]   ;;  %v9640_v62 = vld [vmem:[%s10721_s26 + $0xe8] ss:$16 sps:$4 sm:$0xff]  }
 0x41e   : > { %v4032_v2 = vpop.f32.mrf.mxu0 }
 0x41f   : > { %v4033_v20 = vadd.f32 %v4032_v2, %v3993_v50  ;;  %v9685_v2 = vld [vmem:[%s10721_s26 + $0x1e0] ss:$16 sps:$4 sm:$0xff]  }
 0x420   : > { %v4034_v40 = vpop.f32.mrf.mxu0 }
 0x421   : > { %v9693_v40 = vld [vmem:[%s10721_s26 + $0x1c4] ss:$16 sps:$4 sm:$0xff]  }
 0x422   : > { %v4035_v46 = vpop.f32.mrf.mxu0 }
 0x423   : > { %v9697_v46 = vld [vmem:[%s10721_s26 + $0x1a0] ss:$16 sps:$4 sm:$0xff]  }
 0x49c   : > { %v4071_v63 = vpop.f32.mrf.mxu1 }
 0x49d   : > { %v4072_v0 = vadd.f32 %v4071_v63, %v4031_v45  ;;  %v9648_v45 = vld [vmem:[%s10721_s26 + $0xcc] ss:$16 sps:$4 sm:$0xff]   ;;  %v9646_v63 = vld [vmem:[%s10721_s26 + $0xc8] ss:$16 sps:$4 sm:$0xff]  }
 0x49e   : > { %v4073_v25 = vpop.f32.mrf.mxu1 }
 0x49f   : > { %v4074_v1 = vadd.f32 %v4073_v25, %v4033_v20  ;;  %v4078_v24 = vpack.c.bf16 %v4072_v0, %v4072_v0  ;;  %v9654_v20 = vld [vmem:[%s10721_s26 + $0xac] ss:$16 sps:$4 sm:$0xff]   ;;  %v9652_v0 = vld [vmem:[%s10721_s26 + $0xa8] ss:$16 sps:$4 sm:$0xff]  }
 0x4a0   : > { %v4075_v5 = vpop.f32.mrf.mxu1  ;;  %v9660_v25 = vld [vmem:[%s10721_s26 + $0x8c] ss:$16 sps:$4 sm:$0xff]  }
 0x4a1   : > { %v4079_v7 = vpack.c.bf16 %v4074_v1, %v4074_v1  ;;  %v9658_v1 = vld [vmem:[%s10721_s26 + $0x88] ss:$16 sps:$4 sm:$0xff]   ;;  %v9666_v5 = vld [vmem:[%s10721_s26 + $0x6c] ss:$16 sps:$4 sm:$0xff]  }
 0x4a2   : > { %v4076_v9 = vpop.f32.mrf.mxu1 }
 0x4a3   : > { %4241 = vmatprep.mubr.bf16.mxu0 %v4079_v7  ;;  %v9664_v7 = vld [vmem:[%s10721_s26 + $0x68] ss:$16 sps:$4 sm:$0xff]  }
 0x4a4   : > { %4242 = vmatmul.mubr.bf16.vlgmr.msra.gmra.mxu0 %v4078_v24  ;;  %v9672_v24 = vld [vmem:[%s10721_s26 + $0x4c] ss:$16 sps:$4 sm:$0xff]   ;;  %v9670_v9 = vld [vmem:[%s10721_s26 + $0x48] ss:$16 sps:$4 sm:$0xff]  }
 0x4a5   : > { %4808 = vmatpush1.bf16.msra.mxu0 %v9637_v15  ;;  %v9688_v15 = vld [vmem:[%s10721_s26 + $0x1e8] ss:$16 sps:$4 sm:$0xff]  }
 0x4a6   : > { %4809 = vmatprep.subr.bf16.mxu0 %v9645_v18  ;;  %v9702_v18 = vld [vmem:[%s10721_s26 + $0x1ac] ss:$16 sps:$4 sm:$0xff]  }
 0x4a9   : > { %4810 = vmatpush1.bf16.msra.mxu0 %v9643_v19  ;;  %v9700_v19 = vld [vmem:[%s10721_s26 + $0x1a8] ss:$16 sps:$4 sm:$0xff]  }
 0x4aa   : > { %4811 = vmatprep.subr.bf16.mxu0 %v9651_v21  ;;  %v9708_v21 = vld [vmem:[%s10721_s26 + $0x18c] ss:$16 sps:$4 sm:$0xff]  }
 0x4ad   : > { %4812 = vmatpush1.bf16.msra.mxu0 %v9649_v22  ;;  %v9706_v22 = vld [vmem:[%s10721_s26 + $0x188] ss:$16 sps:$4 sm:$0xff]  }
 0x4ae   : > { %4813 = vmatprep.subr.bf16.mxu0 %v9657_v26  ;;  %v9714_v26 = vld [vmem:[%s10721_s26 + $0x16c] ss:$16 sps:$4 sm:$0xff]  }
 0x4b1   : > { %4814 = vmatpush1.bf16.msra.mxu0 %v9655_v27  ;;  %v9712_v27 = vld [vmem:[%s10721_s26 + $0x168] ss:$16 sps:$4 sm:$0xff]  }
 0x4b2   : > { %4815 = vmatprep.subr.bf16.mxu0 %v9663_v32  ;;  %v9720_v32 = vld [vmem:[%s10721_s26 + $0x14c] ss:$16 sps:$4 sm:$0xff]  }
 0x4b5   : > { %4816 = vmatpush1.bf16.msra.mxu0 %v9661_v33  ;;  %v9718_v33 = vld [vmem:[%s10721_s26 + $0x148] ss:$16 sps:$4 sm:$0xff]  }
 0x4b6   : > { %4817 = vmatprep.subr.bf16.mxu0 %v9669_v34  ;;  %v9723_v34 = vld [vmem:[%s10721_s26 + $0x124] ss:$16 sps:$4 sm:$0xff]  }
 0x4b9   : > { %4818 = vmatpush1.bf16.msra.mxu0 %v9667_v11  ;;  %v9726_v11 = vld [vmem:[%s10721_s26 + $0x12c] ss:$16 sps:$4 sm:$0xff]  }
 0x4ba   : > { %4819 = vmatprep.subr.bf16.mxu0 %v9675_v23  ;;  %v9721_v23 = vld [vmem:[%s10721_s26 + $0x120] ss:$16 sps:$4 sm:$0xff]  }
 0x4bd   : > { %4820 = vmatpush1.bf16.msra.mxu0 %v9673_v35  ;;  %v9724_v35 = vld [vmem:[%s10721_s26 + $0x128] ss:$16 sps:$4 sm:$0xff]  }
 0x4be   : > { %4821 = vmatprep.subr.bf16.mxu0 %v9681_v36  ;;  %v9729_v36 = vld [vmem:[%s10721_s26 + $0x104] ss:$16 sps:$4 sm:$0xff]  }
 0x4c1   : > { %4822 = vmatpush1.bf16.msra.mxu0 %v9679_v38  ;;  %v9732_v38 = vld [vmem:[%s10721_s26 + $0x10c] ss:$16 sps:$4 sm:$0xff]  }
 0x4c2   : > { %4823 = vmatprep.subr.bf16.mxu0 %v9687_v39  ;;  %v9727_v39 = vld [vmem:[%s10721_s26 + $0x100] ss:$16 sps:$4 sm:$0xff]  }
 0x4c5   : > { %4824 = vmatpush2.bf16.msra.mxu0 %v9685_v2  ;;  %v9730_v2 = vld [vmem:[%s10721_s26 + $0x108] ss:$16 sps:$4 sm:$0xff]  }
 0x4c6   : > { %4825 = vmatprep.subr.bf16.mxu0 %v9693_v40  ;;  %v4949_v40 = vld [vmem:[%s10723_s15 + $0x1c0] sm:$0xff] }
 0x4c9   : > { %4826 = vmatpush2.bf16.msra.mxu0 %v9691_v6  ;;  %v4953_v6 = vld [vmem:[%s10723_s15 + $0x1e0] sm:$0xff] }
 0x4ca   : > { %4827 = vmatprep.subr.bf16.mxu0 %v9699_v41  ;;  %v5077_v41 = vld [vmem:[%s10723_s15 + $0x5c0] sm:$0xff] }
 0x4cd   : > { %4828 = vmatpush2.bf16.msra.mxu0 %v9697_v46  ;;  %v8665_v46 = vcombine.low %v4949_v40, %v4953_v6 }
 0x4ce   : > { %4829 = vmatprep.subr.bf16.mxu0 %v9705_v4  ;;  %v8666_v4 = vcombine.high %v4949_v40, %v4953_v6 }
 0x4d1   : > { %4830 = vmatpush2.bf16.msra.mxu0 %v9703_v3  ;;  %v5081_v3 = vld [vmem:[%s10723_s15 + $0x5e0] sm:$0xff] }
 0x4d2   : > { %4831 = vmatprep.subr.bf16.mxu0 %v9711_v42  ;;  %v8793_v42 = vcombine.low %v5077_v41, %v5081_v3 }
 0x4d5   : > { %4832 = vmatpush2.bf16.msra.mxu0 %v9709_v8  ;;  %v8794_v8 = vcombine.high %v5077_v41, %v5081_v3  ;;  %v4905_v3 = vld [vmem:[%s10723_s15 + $0x60] sm:$0xff] }
 0x4d6   : > { %4833 = vmatprep.subr.bf16.mxu0 %v9717_v43  ;;  %v4266_v43 = vld [vmem:[%s10686_s24 + $0xf] sm:$0x3] }
 0x4d9   : > { %4834 = vmatpush2.bf16.msra.mxu0 %v9715_v44  ;;  %v4351_v44 = vrot.slane %v4266_v43, %v10959_v28 }
 0x4da   : > { %4835 = vmatprep.subr.bf16.mxu0 %v9723_v34 }
 0x4dd   : > { %4836 = vmatpush2.bf16.msra.mxu0 %v9721_v23 }
 0x4de   : > { %4837 = vmatprep.subr.bf16.mxu0 %v9729_v36  ;;  %v4909_v36 = vld [vmem:[%s10723_s15 + $0x80] sm:$0xff] }
 0x4e1   : > { %4838 = vmatpush2.bf16.msra.mxu0 %v9727_v39  ;;  %v5037_v39 = vld [vmem:[%s10723_s15 + $0x480] sm:$0xff] }
 0x4e2   : > { %6471 = vmatprep.subr.bf16.mxu0 %v8666_v4  ;;  %v4901_v4 = vld [vmem:[%s10723_s15 + $0x40] sm:$0xff] }
 0x564   : > { %v9019_v48 = vpop.f32.mrf.mxu0 }
 0x566   : > { %v9020_v51 = vpop.f32.mrf.mxu0 }
 0x567   : > { %v9021_v52 = vadd.f32 %v9020_v51, %v9019_v48  ;;  %v4355_v48 = vrot.slane %v4266_v43, %v10968_v31 }
 0x568   : > { %v9022_v53 = vpop.f32.mrf.mxu0 }
 0x569   : > { %v4244_v54 = vadd.f32 %v9021_v52, %v4112_v49  ;;  %v4941_v53 = vld [vmem:[%s10723_s15 + $0x180] sm:$0xff] }
 0x56a   : > { %v9023_v58 = vpop.f32.mrf.mxu0 }
 0x56b   : > { %v4249_v50 = vpack.c.bf16 %v4244_v54, %v4244_v54  ;;  %v4945_v58 = vld [vmem:[%s10723_s15 + $0x1a0] sm:$0xff] }
 0x56d   : > { %4391 = vmatmul.mubr.bf16.vlgmr.msra.gmra.mxu1 %v4249_v50  ;;  %v5073_v50 = vld [vmem:[%s10723_s15 + $0x5a0] sm:$0xff] }
 0x56e   : > { %4849 = vmatpush1.bf16.msra.mxu1 %v9640_v62  ;;  %v5069_v62 = vld [vmem:[%s10723_s15 + $0x580] sm:$0xff] }
 0x56f   : > { %4850 = vmatprep.subr.bf16.mxu1 %v9648_v45 }
 0x572   : > { %4851 = vmatpush1.bf16.msra.mxu1 %v9646_v63 }
 0x573   : > { %4852 = vmatprep.subr.bf16.mxu1 %v9654_v20 }
 0x576   : > { %4853 = vmatpush1.bf16.msra.mxu1 %v9652_v0 }
 0x577   : > { %4854 = vmatprep.subr.bf16.mxu1 %v9660_v25  ;;  %v8658_v25 = vcombine.high %v4941_v53, %v4945_v58 }
 0x57a   : > { %4855 = vmatpush1.bf16.msra.mxu1 %v9658_v1  ;;  %v8786_v1 = vcombine.high %v5069_v62, %v5073_v50 }
 0x57b   : > { %4856 = vmatprep.subr.bf16.mxu1 %v9666_v5  ;;  %v4933_v5 = vld [vmem:[%s10723_s15 + $0x140] sm:$0xff] }
 0x57e   : > { %4857 = vmatpush1.bf16.msra.mxu1 %v9664_v7  ;;  %v4937_v7 = vld [vmem:[%s10723_s15 + $0x160] sm:$0xff] }
 0x57f   : > { %4858 = vmatprep.subr.bf16.mxu1 %v9672_v24  ;;  %v5061_v24 = vld [vmem:[%s10723_s15 + $0x540] sm:$0xff] }
 0x582   : > { %4859 = vmatpush1.bf16.msra.mxu1 %v9670_v9  ;;  %v5065_v9 = vld [vmem:[%s10723_s15 + $0x560] sm:$0xff] }
 0x583   : > { %4860 = vmatprep.subr.bf16.mxu1 %v9678_v30  ;;  %v8657_v30 = vcombine.low %v4941_v53, %v4945_v58  ;;  %v5021_v53 = vld [vmem:[%s10723_s15 + $0x400] sm:$0xff]  ;;  %v8617_v58 = vcombine.low %v4901_v4, %v4905_v3 }
 0x586   : > { %4861 = vmatpush1.bf16.msra.mxu1 %v9676_v10  ;;  %v8785_v10 = vcombine.low %v5069_v62, %v5073_v50 }
 0x587   : > { %4862 = vmatprep.subr.bf16.mxu1 %v9684_v12  ;;  %v8650_v12 = vcombine.high %v4933_v5, %v4937_v7 }
 0x58a   : > { %4863 = vmatpush1.bf16.msra.mxu1 %v9682_v13  ;;  %v8778_v13 = vcombine.high %v5061_v24, %v5065_v9 }
 0x58b   : > { %4864 = vmatprep.subr.bf16.mxu1 %v9690_v14  ;;  %v4925_v14 = vld [vmem:[%s10723_s15 + $0x100] sm:$0xff] }
 0x58e   : > { %4865 = vmatpush2.bf16.msra.mxu1 %v9688_v15  ;;  %v4929_v15 = vld [vmem:[%s10723_s15 + $0x120] sm:$0xff] }
 0x58f   : > { %4866 = vmatprep.subr.bf16.mxu1 %v9696_v16  ;;  %v5053_v16 = vld [vmem:[%s10723_s15 + $0x500] sm:$0xff]  ;;  %v8641_v34 = vcombine.low %v4925_v14, %v4929_v15 }
 0x592   : > { %4867 = vmatpush2.bf16.msra.mxu1 %v9694_v17  ;;  %v5057_v17 = vld [vmem:[%s10723_s15 + $0x520] sm:$0xff] }
 0x593   : > { %4868 = vmatprep.subr.bf16.mxu1 %v9702_v18  ;;  %v8649_v18 = vcombine.low %v4933_v5, %v4937_v7 }
 0x596   : > { %4869 = vmatpush2.bf16.msra.mxu1 %v9700_v19  ;;  %v8777_v19 = vcombine.low %v5061_v24, %v5065_v9  ;;  %v5005_v9 = vld [vmem:[%s10723_s15 + $0x380] sm:$0xff] }
 0x597   : > { %4870 = vmatprep.subr.bf16.mxu1 %v9708_v21  ;;  %v8642_v21 = vcombine.high %v4925_v14, %v4929_v15 }
 0x59a   : > { %4871 = vmatpush2.bf16.msra.mxu1 %v9706_v22  ;;  %v8770_v22 = vcombine.high %v5053_v16, %v5057_v17 }
 0x59b   : > { %4872 = vmatprep.subr.bf16.mxu1 %v9714_v26  ;;  %v4917_v26 = vld [vmem:[%s10723_s15 + $0xc0] sm:$0xff] }
 0x59e   : > { %4873 = vmatpush2.bf16.msra.mxu1 %v9712_v27  ;;  %v4921_v27 = vld [vmem:[%s10723_s15 + $0xe0] sm:$0xff] }
 0x59f   : > { %4874 = vmatprep.subr.bf16.mxu1 %v9720_v32  ;;  %v5045_v32 = vld [vmem:[%s10723_s15 + $0x4c0] sm:$0xff]  ;;  %v8634_v23 = vcombine.high %v4917_v26, %v4921_v27  ;;  %v8633_v40 = vcombine.low %v4917_v26, %v4921_v27 }
 0x5a2   : > { %4875 = vmatpush2.bf16.msra.mxu1 %v9718_v33  ;;  %v5049_v33 = vld [vmem:[%s10723_s15 + $0x4e0] sm:$0xff] }
 0x5a3   : > { %4876 = vmatprep.subr.bf16.mxu1 %v9726_v11  ;;  %v8769_v11 = vcombine.low %v5053_v16, %v5057_v17  ;;  %v8761_v6 = vcombine.low %v5045_v32, %v5049_v33  ;;  %v4997_v17 = vld [vmem:[%s10723_s15 + $0x340] sm:$0xff] }
 0x5a6   : > { %4877 = vmatpush2.bf16.msra.mxu1 %v9724_v35  ;;  %v8762_v35 = vcombine.high %v5045_v32, %v5049_v33  ;;  %v4989_v33 = vld [vmem:[%s10723_s15 + $0x300] sm:$0xff] }
 0x5a7   : > { %4878 = vmatprep.subr.bf16.mxu1 %v9732_v38  ;;  %v4913_v38 = vld [vmem:[%s10723_s15 + $0xa0] sm:$0xff] }
 0x5a8   : > { %v8626_v41 = vcombine.high %v4909_v36, %v4913_v38  ;;  %v8625_v43 = vcombine.low %v4909_v36, %v4913_v38 }
 0x5aa   : > { %4879 = vmatpush2.bf16.msra.mxu1 %v9730_v2  ;;  %v5041_v2 = vld [vmem:[%s10723_s15 + $0x4a0] sm:$0xff] }
 0x5ab   : > { %6512 = vmatprep.subr.bf16.mxu1 %v8794_v8  ;;  %v5033_v8 = vld [vmem:[%s10723_s15 + $0x460] sm:$0xff] }
 0x62d   : > { %v4392_v49 = vpop.f32.mrf.mxu1 }
 0x62e   : > { %v4393_v51 = vadd.f32 %v4392_v49, %v4351_v44  ;;  %v8753_v44 = vcombine.low %v5037_v39, %v5041_v2 }
 0x62f   : > { %v4394_v52 = vpop.f32.mrf.mxu1 }
 0x630   : > { %v4395_v54 = vadd.f32 %v4394_v52, %v4355_v48  ;;  %v4399_v20 = vpack.c.bf16 %v4393_v51, %v4393_v51  ;;  %v8618_v48 = vcombine.high %v4901_v4, %v4905_v3  ;;  %v4893_v51 = vld [vmem:[%s10723_s15] sm:$0xff] }
 0x631   : > { %v4396_v45 = vpop.f32.mrf.mxu1  ;;  %v4897_v52 = vld [vmem:[%s10723_s15 + $0x20] sm:$0xff] }
 0x632   : > { %v4400_v63 = vpack.c.bf16 %v4395_v54, %v4395_v54  ;;  %v5025_v54 = vld [vmem:[%s10723_s15 + $0x420] sm:$0xff]  ;;  %v8610_v50 = vcombine.high %v4893_v51, %v4897_v52 }
 0x633   : > { %v4397_v0 = vpop.f32.mrf.mxu1  ;;  %v8738_v45 = vcombine.high %v5021_v53, %v5025_v54  ;;  %v8737_v5 = vcombine.low %v5021_v53, %v5025_v54  ;;  %v4965_v54 = vld [vmem:[%s10723_s15 + $0x240] sm:$0xff] }
 0x634   : > { %4839 = vmatprep.mubr.bf16.mxu0 %v4400_v63  ;;  %4880 = vmatprep.mubr.bf16.mxu1 %v4400_v63  ;;  %v5013_v63 = vld [vmem:[%s10723_s15 + $0x3c0] sm:$0xff] }
 0x635   : > { %4840 = vmatmul.mubr.bf16.vlgmr.msra.gmra.mxu0 %v4399_v20  ;;  %4881 = vmatmul.mubr.bf16.vlgmr.msra.gmra.mxu1 %v4399_v20  ;;  %v5017_v20 = vld [vmem:[%s10723_s15 + $0x3e0] sm:$0xff] }
 0x636   : > { %6472 = vmatpush1.bf16.msra.mxu0 %v8665_v46  ;;  %6513 = vmatpush1.bf16.msra.mxu1 %v8793_v42  ;;  %v8754_v46 = vcombine.high %v5037_v39, %v5041_v2  ;;  %v5029_v42 = vld [vmem:[%s10723_s15 + $0x440] sm:$0xff]  ;;  %v8730_v7 = vcombine.high %v5013_v63, %v5017_v20 }
 0x637   : > { %6473 = vmatprep.subr.bf16.mxu0 %v8658_v25  ;;  %6514 = vmatprep.subr.bf16.mxu1 %v8786_v1  ;;  %v8746_v49 = vcombine.high %v5029_v42, %v5033_v8  ;;  %v8745_v62 = vcombine.low %v5029_v42, %v5033_v8  ;;  %v5141_v0 = vld [vmem:[%s10723_s15 + $0x7c0] sm:$0xff]  ;;  %v8609_v1 = vcombine.low %v4893_v51, %v4897_v52 }
 0x638   : > { %v5145_v25 = vld [vmem:[%s10723_s15 + $0x7e0] sm:$0xff] }
 0x639   : > { %v8858_v24 = vcombine.high %v5141_v0, %v5145_v25  ;;  %v8857_v14 = vcombine.low %v5141_v0, %v5145_v25  ;;  %v4981_v2 = vld [vmem:[%s10723_s15 + $0x2c0] sm:$0xff] }
 0x63a   : > { %6474 = vmatpush1.bf16.msra.mxu0 %v8657_v30  ;;  %6515 = vmatpush1.bf16.msra.mxu1 %v8785_v10  ;;  %v5009_v30 = vld [vmem:[%s10723_s15 + $0x3a0] sm:$0xff] }
 0x63b   : > { %6475 = vmatprep.subr.bf16.mxu0 %v8650_v12  ;;  %6516 = vmatprep.subr.bf16.mxu1 %v8778_v13  ;;  %v5133_v10 = vld [vmem:[%s10723_s15 + $0x780] sm:$0xff]  ;;  %v8729_v13 = vcombine.low %v5013_v63, %v5017_v20  ;;  %v8722_v15 = vcombine.high %v5005_v9, %v5009_v30 }
 0x63c   : > { %v5137_v12 = vld [vmem:[%s10723_s15 + $0x7a0] sm:$0xff] }
 0x63d   : > { %v8850_v16 = vcombine.high %v5133_v10, %v5137_v12  ;;  %v8849_v26 = vcombine.low %v5133_v10, %v5137_v12  ;;  %v4973_v8 = vld [vmem:[%s10723_s15 + $0x280] sm:$0xff] }
 0x63e   : > { %6476 = vmatpush1.bf16.msra.mxu0 %v8649_v18  ;;  %6517 = vmatpush1.bf16.msra.mxu1 %v8777_v19  ;;  %v5001_v18 = vld [vmem:[%s10723_s15 + $0x360] sm:$0xff] }
 0x63f   : > { %6477 = vmatprep.subr.bf16.mxu0 %v8642_v21  ;;  %6518 = vmatprep.subr.bf16.mxu1 %v8770_v22  ;;  %v5125_v19 = vld [vmem:[%s10723_s15 + $0x740] sm:$0xff]  ;;  %v8721_v22 = vcombine.low %v5005_v9, %v5009_v30  ;;  %v8714_v27 = vcombine.high %v4997_v17, %v5001_v18 }
 0x640   : > { %v5129_v21 = vld [vmem:[%s10723_s15 + $0x760] sm:$0xff] }
 0x641   : > { %v8842_v32 = vcombine.high %v5125_v19, %v5129_v21  ;;  %v8841_v36 = vcombine.low %v5125_v19, %v5129_v21  ;;  %v5089_v30 = vld [vmem:[%s10723_s15 + $0x620] sm:$0xff]  ;;  %v5082_v19 = vld [vmem:[%s10723_s15 + $0x5e8] sm:$0xff] }
 0x642   : > { %6478 = vmatpush1.bf16.msra.mxu0 %v8641_v34  ;;  %6519 = vmatpush1.bf16.msra.mxu1 %v8769_v11  ;;  %v4993_v34 = vld [vmem:[%s10723_s15 + $0x320] sm:$0xff] }
 0x643   : > { %6479 = vmatprep.subr.bf16.mxu0 %v8634_v23  ;;  %6520 = vmatprep.subr.bf16.mxu1 %v8762_v35  ;;  %v5117_v11 = vld [vmem:[%s10723_s15 + $0x700] sm:$0xff]  ;;  %v8713_v35 = vcombine.low %v4997_v17, %v5001_v18  ;;  %v8706_v38 = vcombine.high %v4989_v33, %v4993_v34 }
 0x644   : > { %v5121_v23 = vld [vmem:[%s10723_s15 + $0x720] sm:$0xff] }
 0x645   : > { %v8834_v39 = vcombine.high %v5117_v11, %v5121_v23  ;;  %v8833_v4 = vcombine.low %v5117_v11, %v5121_v23 }
 0x646   : > { %6480 = vmatpush1.bf16.msra.mxu0 %v8633_v40  ;;  %6521 = vmatpush1.bf16.msra.mxu1 %v8761_v6  ;;  %v4985_v40 = vld [vmem:[%s10723_s15 + $0x2e0] sm:$0xff] }
 0x647   : > { %6481 = vmatprep.subr.bf16.mxu0 %v8626_v41  ;;  %6522 = vmatprep.subr.bf16.mxu1 %v8754_v46  ;;  %v5109_v6 = vld [vmem:[%s10723_s15 + $0x6c0] sm:$0xff]  ;;  %v8705_v46 = vcombine.low %v4989_v33, %v4993_v34  ;;  %v8698_v3 = vcombine.high %v4981_v2, %v4985_v40 }
 0x648   : > { %v5113_v41 = vld [vmem:[%s10723_s15 + $0x6e0] sm:$0xff] }
 0x649   : > { %v8826_v42 = vcombine.high %v5109_v6, %v5113_v41  ;;  %v8825_v51 = vcombine.low %v5109_v6, %v5113_v41  ;;  %v4942_v6 = vld [vmem:[%s10723_s15 + $0x188] sm:$0xff] }
 0x64a   : > { %6482 = vmatpush1.bf16.msra.mxu0 %v8625_v43  ;;  %6523 = vmatpush1.bf16.msra.mxu1 %v8753_v44  ;;  %v4977_v43 = vld [vmem:[%s10723_s15 + $0x2a0] sm:$0xff] }
 0x64b   : > { %6483 = vmatprep.subr.bf16.mxu0 %v8618_v48  ;;  %6524 = vmatprep.subr.bf16.mxu1 %v8746_v49  ;;  %v5101_v44 = vld [vmem:[%s10723_s15 + $0x680] sm:$0xff]  ;;  %v8697_v49 = vcombine.low %v4981_v2, %v4985_v40  ;;  %v8690_v52 = vcombine.high %v4973_v8, %v4977_v43 }
 0x64c   : > { %v5105_v48 = vld [vmem:[%s10723_s15 + $0x6a0] sm:$0xff] }
 0x64d   : > { %v8818_v53 = vcombine.high %v5101_v44, %v5105_v48  ;;  %v8817_v63 = vcombine.low %v5101_v44, %v5105_v48 }
 0x64e   : > { %6484 = vmatpush1.bf16.msra.mxu0 %v8617_v58  ;;  %6525 = vmatpush1.bf16.msra.mxu1 %v8745_v62  ;;  %v4969_v58 = vld [vmem:[%s10723_s15 + $0x260] sm:$0xff] }
 0x64f   : > { %6485 = vmatprep.subr.bf16.mxu0 %v8610_v50  ;;  %6526 = vmatprep.subr.bf16.mxu1 %v8738_v45  ;;  %v5093_v62 = vld [vmem:[%s10723_s15 + $0x640] sm:$0xff]  ;;  %v8689_v45 = vcombine.low %v4973_v8, %v4977_v43  ;;  %v8682_v20 = vcombine.high %v4965_v54, %v4969_v58  ;;  %v8681_v25 = vcombine.low %v4965_v54, %v4969_v58  ;;  %v4938_v58 = vld [vmem:[%s10723_s15 + $0x168] sm:$0xff] }
 0x650   : > { %v5097_v50 = vld [vmem:[%s10723_s15 + $0x660] sm:$0xff] }
 0x651   : > { %v8810_v0 = vcombine.high %v5093_v62, %v5097_v50 }
 0x652   : > { %6486 = vmatpush1.bf16.msra.mxu0 %v8609_v1  ;;  %6527 = vmatpush1.bf16.msra.mxu1 %v8737_v5  ;;  %v8809_v1 = vcombine.low %v5093_v62, %v5097_v50  ;;  %v4957_v5 = vld [vmem:[%s10723_s15 + $0x200] sm:$0xff]  ;;  %v5062_v62 = vld [vmem:[%s10723_s15 + $0x548] sm:$0xff] }
 0x653   : > { %6487 = vmatprep.subr.bf16.mxu0 %v8730_v7  ;;  %6528 = vmatprep.subr.bf16.mxu1 %v8858_v24  ;;  %v4961_v7 = vld [vmem:[%s10723_s15 + $0x220] sm:$0xff]  ;;  %v5066_v50 = vld [vmem:[%s10723_s15 + $0x568] sm:$0xff] }
 0x654   : > { %v5085_v24 = vld [vmem:[%s10723_s15 + $0x600] sm:$0xff]  ;;  %v8674_v9 = vcombine.high %v4957_v5, %v4961_v7  ;;  %v8673_v10 = vcombine.low %v4957_v5, %v4961_v7  ;;  %v5054_v5 = vld [vmem:[%s10723_s15 + $0x508] sm:$0xff] }
 0x655   : > { %v8801_v12 = vcombine.low %v5085_v24, %v5089_v30  ;;  %v5058_v7 = vld [vmem:[%s10723_s15 + $0x528] sm:$0xff] }
 0x656   : > { %6488 = vmatpush2.bf16.msra.mxu0 %v8729_v13  ;;  %6529 = vmatpush2.bf16.msra.mxu1 %v8857_v14  ;;  %v8802_v13 = vcombine.high %v5085_v24, %v5089_v30  ;;  %v4950_v14 = vld [vmem:[%s10723_s15 + $0x1c8] sm:$0xff] }
 0x657   : > { %6489 = vmatprep.subr.bf16.mxu0 %v8722_v15  ;;  %6530 = vmatprep.subr.bf16.mxu1 %v8850_v16  ;;  %v4954_v15 = vld [vmem:[%s10723_s15 + $0x1e8] sm:$0xff] }
 0x658   : > { %v5078_v16 = vld [vmem:[%s10723_s15 + $0x5c8] sm:$0xff]  ;;  %v8667_v17 = vcombine.low %v4950_v14, %v4954_v15  ;;  %v8668_v18 = vcombine.high %v4950_v14, %v4954_v15 }
 0x659   : > { %v8795_v21 = vcombine.low %v5078_v16, %v5082_v19  ;;  %v5046_v14 = vld [vmem:[%s10723_s15 + $0x4c8] sm:$0xff] }
 0x65a   : > { %6490 = vmatpush2.bf16.msra.mxu0 %v8721_v22  ;;  %6531 = vmatpush2.bf16.msra.mxu1 %v8849_v26  ;;  %v8796_v22 = vcombine.high %v5078_v16, %v5082_v19  ;;  %v4465_v26 = vld [vmem:[%s10686_s24 + $0x11] sm:$0xf]  ;;  %v5050_v15 = vld [vmem:[%s10723_s15 + $0x4e8] sm:$0xff] }
 0x65b   : > { %6491 = vmatprep.subr.bf16.mxu0 %v8714_v27  ;;  %6532 = vmatprep.subr.bf16.mxu1 %v8842_v32  ;;  %v4790_v27 = vrot.slane %v4465_v26, %v10959_v28  ;;  %v4798_v32 = vrot.slane %v4465_v26, %v10962_v29  ;;  %v4794_v33 = vrot.slane %v4465_v26, %v10968_v31 }
 0x65c   : > { %v4802_v34 = vrot.slane %v4465_v26, %v10971_v59  ;;  %v8764_v19 = vcombine.high %v5046_v14, %v5050_v15  ;;  %v5038_v26 = vld [vmem:[%s10723_s15 + $0x488] sm:$0xff] }
 0x65e   : > { %6492 = vmatpush2.bf16.msra.mxu0 %v8713_v35  ;;  %6533 = vmatpush2.bf16.msra.mxu1 %v8841_v36 }
 0x65f   : > { %6493 = vmatprep.subr.bf16.mxu0 %v8706_v38  ;;  %6534 = vmatprep.subr.bf16.mxu1 %v8834_v39 }
 0x662   : > { %6494 = vmatpush2.bf16.msra.mxu0 %v8705_v46  ;;  %6535 = vmatpush2.bf16.msra.mxu1 %v8833_v4  ;;  %v4946_v4 = vld [vmem:[%s10723_s15 + $0x1a8] sm:$0xff] }
 0x663   : > { %6495 = vmatprep.subr.bf16.mxu0 %v8698_v3  ;;  %6536 = vmatprep.subr.bf16.mxu1 %v8826_v42  ;;  %v5070_v3 = vld [vmem:[%s10723_s15 + $0x588] sm:$0xff] }
 0x664   : > { %v5074_v42 = vld [vmem:[%s10723_s15 + $0x5a8] sm:$0xff] }
 0x665   : > { %v8788_v54 = vcombine.high %v5070_v3, %v5074_v42 }
 0x666   : > { %6496 = vmatpush2.bf16.msra.mxu0 %v8697_v49  ;;  %6537 = vmatpush2.bf16.msra.mxu1 %v8825_v51 }
 0x667   : > { %6497 = vmatprep.subr.bf16.mxu0 %v8690_v52  ;;  %6538 = vmatprep.subr.bf16.mxu1 %v8818_v53  ;;  %v4934_v52 = vld [vmem:[%s10723_s15 + $0x148] sm:$0xff]  ;;  %v8660_v53 = vcombine.high %v4942_v6, %v4946_v4 }
 0x668   : > { %v8651_v24 = vcombine.low %v4934_v52, %v4938_v58 }
 0x66a   : > { %6498 = vmatpush2.bf16.msra.mxu0 %v8689_v45  ;;  %6539 = vmatpush2.bf16.msra.mxu1 %v8817_v63  ;;  %v8659_v45 = vcombine.low %v4942_v6, %v4946_v4  ;;  %v8787_v63 = vcombine.low %v5070_v3, %v5074_v42  ;;  %v5022_v4 = vld [vmem:[%s10723_s15 + $0x408] sm:$0xff] }
 0x66b   : > { %6499 = vmatprep.subr.bf16.mxu0 %v8682_v20  ;;  %6540 = vmatprep.subr.bf16.mxu1 %v8810_v0  ;;  %v8652_v20 = vcombine.high %v4934_v52, %v4938_v58  ;;  %v8780_v0 = vcombine.high %v5062_v62, %v5066_v50  ;;  %v5026_v3 = vld [vmem:[%s10723_s15 + $0x428] sm:$0xff] }
 0x66c   : > { %v8740_v52 = vcombine.high %v5022_v4, %v5026_v3  ;;  %v5142_v58 = vld [vmem:[%s10723_s15 + $0x7c8] sm:$0xff] }
 0x66e   : > { %6500 = vmatpush2.bf16.msra.mxu0 %v8681_v25  ;;  %6541 = vmatpush2.bf16.msra.mxu1 %v8809_v1  ;;  %v4926_v25 = vld [vmem:[%s10723_s15 + $0x108] sm:$0xff] }
 0x66f   : > { %6501 = vmatprep.subr.bf16.mxu0 %v8674_v9  ;;  %6542 = vmatprep.subr.bf16.mxu1 %v8802_v13  ;;  %v4930_v1 = vld [vmem:[%s10723_s15 + $0x128] sm:$0xff]  ;;  %v8779_v9 = vcombine.low %v5062_v62, %v5066_v50 }
 0x670   : > { %v8644_v30 = vcombine.high %v4926_v25, %v4930_v1  ;;  %v4922_v13 = vld [vmem:[%s10723_s15 + $0xe8] sm:$0xff]  ;;  %v8643_v16 = vcombine.low %v4926_v25, %v4930_v1 }
 0x671   : > { %v5146_v62 = vld [vmem:[%s10723_s15 + $0x7e8] sm:$0xff] }
 0x672   : > { %6502 = vmatpush2.bf16.msra.mxu0 %v8673_v10  ;;  %6543 = vmatpush2.bf16.msra.mxu1 %v8801_v12  ;;  %v8772_v10 = vcombine.high %v5054_v5, %v5058_v7  ;;  %v4918_v12 = vld [vmem:[%s10723_s15 + $0xc8] sm:$0xff] }
 0x673   : > { %6553 = vmatprep.subr.bf16.mxu0 %v8668_v18  ;;  %6594 = vmatprep.subr.bf16.mxu1 %v8796_v22  ;;  %v8636_v18 = vcombine.high %v4918_v12, %v4922_v13  ;;  %v4914_v22 = vld [vmem:[%s10723_s15 + $0xa8] sm:$0xff] }
 0x674   : > { %v5010_v25 = vld [vmem:[%s10723_s15 + $0x3a8] sm:$0xff] }
 0x675   : > { %v5134_v1 = vld [vmem:[%s10723_s15 + $0x788] sm:$0xff] }
 0x6f5   : > { %v4841_v11 = vpop.f32.mrf.mxu0  ;;  %v4882_v23 = vpop.f32.mrf.mxu1 }
 0x6f6   : > { %v4842_v35 = vadd.f32 %v4841_v11, %v4790_v27  ;;  %v4883_v36 = vadd.f32 %v4882_v23, %v4798_v32  ;;  %v5042_v27 = vld [vmem:[%s10723_s15 + $0x4a8] sm:$0xff]  ;;  %v8635_v32 = vcombine.low %v4918_v12, %v4922_v13 }
 0x6f7   : > { %v4843_v38 = vpop.f32.mrf.mxu0  ;;  %v4884_v39 = vpop.f32.mrf.mxu1  ;;  %v8756_v11 = vcombine.high %v5038_v26, %v5042_v27  ;;  %v4902_v23 = vld [vmem:[%s10723_s15 + $0x48] sm:$0xff] }
 0x6f8   : > { %v4844_v2 = vadd.f32 %v4843_v38, %v4794_v33  ;;  %v4885_v40 = vadd.f32 %v4884_v39, %v4802_v34  ;;  %v11490_v44 = vpack.c.bf16 %v4842_v35, %v4842_v35  ;;  %v11492_v48 = vpack.c.bf16 %v4883_v36, %v4883_v36  ;;  %v4906_v35 = vld [vmem:[%s10723_s15 + $0x68] sm:$0xff] }
 0x6f9   : > { %v4845_v41 = vpop.f32.mrf.mxu0  ;;  %v4886_v46 = vpop.f32.mrf.mxu1  ;;  %v8763_v33 = vcombine.low %v5046_v14, %v5050_v15  ;;  %v5030_v36 = vld [vmem:[%s10723_s15 + $0x448] sm:$0xff]  ;;  %v8619_v42 = vcombine.low %v4902_v23, %v4906_v35 }
 0x6fa   : > { %v11486_v8 = vpack.c.bf16 %v4844_v2, %v4844_v2  ;;  %v11488_v43 = vpack.c.bf16 %v4885_v40, %v4885_v40  ;;  %v5034_v38 = vld [vmem:[%s10723_s15 + $0x468] sm:$0xff]  ;;  %v8755_v2 = vcombine.low %v5038_v26, %v5042_v27  ;;  %v8620_v40 = vcombine.high %v4902_v23, %v4906_v35 }
 0x6fb   : > { %v4846_v49 = vpop.f32.mrf.mxu0  ;;  %v4887_v51 = vpop.f32.mrf.mxu1  ;;  %v8748_v6 = vcombine.high %v5030_v36, %v5034_v38  ;;  %v4894_v41 = vld [vmem:[%s10723_s15 + $0x8] sm:$0xff] }
 0x6fc   : > { %6503 = vmatprep.mubr.bf16.mxu0 %v11486_v8  ;;  %6544 = vmatprep.mubr.bf16.mxu1 %v11488_v43  ;;  %v4898_v46 = vld [vmem:[%s10723_s15 + $0x28] sm:$0xff]  ;;  %v8747_v49 = vcombine.low %v5030_v36, %v5034_v38 }
 0x6fd   : > { %6504 = vmatmul.mubr.bf16.vlgmr.msra.gmra.mxu0 %v11490_v44  ;;  %6545 = vmatmul.mubr.bf16.vlgmr.msra.gmra.mxu1 %v11492_v48  ;;  %v8612_v51 = vcombine.high %v4894_v41, %v4898_v46  ;;  %v8611_v50 = vcombine.low %v4894_v41, %v4898_v46  ;;  %v5002_v12 = vld [vmem:[%s10723_s15 + $0x368] sm:$0xff] }
 0x6fe   : > { %6554 = vmatpush1.bf16.msra.mxu0 %v8667_v17  ;;  %6595 = vmatpush1.bf16.msra.mxu1 %v8795_v21  ;;  %v8771_v17 = vcombine.low %v5054_v5, %v5058_v7  ;;  %v4910_v21 = vld [vmem:[%s10723_s15 + $0x88] sm:$0xff] }
 0x6ff   : > { %6585 = vmatprep.mubr.bf16.mxu0 %v11486_v8  ;;  %6626 = vmatprep.mubr.bf16.mxu1 %v11488_v43  ;;  %v8628_v34 = vcombine.high %v4910_v21, %v4914_v22  ;;  %v8627_v39 = vcombine.low %v4910_v21, %v4914_v22  ;;  %v5138_v5 = vld [vmem:[%s10723_s15 + $0x7a8] sm:$0xff] }
 0x700   : > { %6555 = vmatprep.subr.bf16.mxu0 %v8660_v53  ;;  %6596 = vmatprep.subr.bf16.mxu1 %v8788_v54  ;;  %v5014_v53 = vld [vmem:[%s10723_s15 + $0x3c8] sm:$0xff] }
 0x701   : > { %v5018_v54 = vld [vmem:[%s10723_s15 + $0x3e8] sm:$0xff] }
 0x702   : > { %6556 = vmatpush1.bf16.msra.mxu0 %v8659_v45  ;;  %6597 = vmatpush1.bf16.msra.mxu1 %v8787_v63  ;;  %v8739_v45 = vcombine.low %v5022_v4, %v5026_v3  ;;  %v8732_v63 = vcombine.high %v5014_v53, %v5018_v54  ;;  %v8731_v7 = vcombine.low %v5014_v53, %v5018_v54  ;;  %v5126_v13 = vld [vmem:[%s10723_s15 + $0x748] sm:$0xff] }
 0x703   : > { %6557 = vmatprep.subr.bf16.mxu0 %v8652_v20  ;;  %6598 = vmatprep.subr.bf16.mxu1 %v8780_v0  ;;  %v8860_v20 = vcombine.high %v5142_v58, %v5146_v62  ;;  %v5006_v0 = vld [vmem:[%s10723_s15 + $0x388] sm:$0xff] }
 0x704   : > { %v5130_v14 = vld [vmem:[%s10723_s15 + $0x768] sm:$0xff]  ;;  %v8723_v15 = vcombine.low %v5006_v0, %v5010_v25 }
 0x705   : > { %v4994_v21 = vld [vmem:[%s10723_s15 + $0x328] sm:$0xff] }
 0x706   : > { %6558 = vmatpush1.bf16.msra.mxu0 %v8651_v24  ;;  %6599 = vmatpush1.bf16.msra.mxu1 %v8779_v9  ;;  %v8859_v24 = vcombine.low %v5142_v58, %v5146_v62  ;;  %v8724_v9 = vcombine.high %v5006_v0, %v5010_v25  ;;  %v5118_v22 = vld [vmem:[%s10723_s15 + $0x708] sm:$0xff] }
 0x707   : > { %6559 = vmatprep.subr.bf16.mxu0 %v8644_v30  ;;  %6600 = vmatprep.subr.bf16.mxu1 %v8772_v10  ;;  %v8852_v30 = vcombine.high %v5134_v1, %v5138_v5  ;;  %v4998_v10 = vld [vmem:[%s10723_s15 + $0x348] sm:$0xff] }
 0x708   : > { %v5122_v26 = vld [vmem:[%s10723_s15 + $0x728] sm:$0xff]  ;;  %v8715_v27 = vcombine.low %v4998_v10, %v5002_v12 }
 0x709   : > { %v4986_v23 = vld [vmem:[%s10723_s15 + $0x2e8] sm:$0xff] }
 0x70a   : > { %6560 = vmatpush1.bf16.msra.mxu0 %v8643_v16  ;;  %6601 = vmatpush1.bf16.msra.mxu1 %v8771_v17  ;;  %v8851_v16 = vcombine.low %v5134_v1, %v5138_v5  ;;  %v8716_v17 = vcombine.high %v4998_v10, %v5002_v12  ;;  %v5110_v35 = vld [vmem:[%s10723_s15 + $0x6c8] sm:$0xff]  ;;  %v4955_v10 = vld [vmem:[%s10723_s15 + $0x1f0] sm:$0xff] }
 0x70b   : > { %6561 = vmatprep.subr.bf16.mxu0 %v8636_v18  ;;  %6602 = vmatprep.subr.bf16.mxu1 %v8764_v19  ;;  %v8844_v18 = vcombine.high %v5126_v13, %v5130_v14  ;;  %v4990_v19 = vld [vmem:[%s10723_s15 + $0x308] sm:$0xff]  ;;  %v5079_v12 = vld [vmem:[%s10723_s15 + $0x5d0] sm:$0xff] }
 0x70c   : > { %v5114_v36 = vld [vmem:[%s10723_s15 + $0x6e8] sm:$0xff]  ;;  %v8707_v38 = vcombine.low %v4990_v19, %v4994_v21 }
 0x70d   : > { %v4978_v41 = vld [vmem:[%s10723_s15 + $0x2a8] sm:$0xff] }
 0x70e   : > { %6562 = vmatpush1.bf16.msra.mxu0 %v8635_v32  ;;  %6603 = vmatpush1.bf16.msra.mxu1 %v8763_v33  ;;  %v8843_v32 = vcombine.low %v5126_v13, %v5130_v14  ;;  %v8708_v33 = vcombine.high %v4990_v19, %v4994_v21  ;;  %v5102_v46 = vld [vmem:[%s10723_s15 + $0x688] sm:$0xff]  ;;  %v5083_v13 = vld [vmem:[%s10723_s15 + $0x5f0] sm:$0xff] }
 0x70f   : > { %6563 = vmatprep.subr.bf16.mxu0 %v8628_v34  ;;  %6604 = vmatprep.subr.bf16.mxu1 %v8756_v11  ;;  %v8836_v34 = vcombine.high %v5118_v22, %v5122_v26  ;;  %v4982_v11 = vld [vmem:[%s10723_s15 + $0x2c8] sm:$0xff]  ;;  %v4947_v19 = vld [vmem:[%s10723_s15 + $0x1b0] sm:$0xff] }
 0x710   : > { %v5106_v4 = vld [vmem:[%s10723_s15 + $0x6a8] sm:$0xff]  ;;  %v8699_v3 = vcombine.low %v4982_v11, %v4986_v23  ;;  %v5071_v21 = vld [vmem:[%s10723_s15 + $0x590] sm:$0xff] }
 0x711   : > { %v4970_v53 = vld [vmem:[%s10723_s15 + $0x268] sm:$0xff] }
 0x712   : > { %6564 = vmatpush1.bf16.msra.mxu0 %v8627_v39  ;;  %6605 = vmatpush1.bf16.msra.mxu1 %v8755_v2  ;;  %v8835_v39 = vcombine.low %v5118_v22, %v5122_v26  ;;  %v8700_v2 = vcombine.high %v4982_v11, %v4986_v23  ;;  %v5094_v54 = vld [vmem:[%s10723_s15 + $0x648] sm:$0xff]  ;;  %v5075_v22 = vld [vmem:[%s10723_s15 + $0x5b0] sm:$0xff] }
 0x713   : > { %6565 = vmatprep.subr.bf16.mxu0 %v8620_v40  ;;  %6606 = vmatprep.subr.bf16.mxu1 %v8748_v6  ;;  %v8828_v40 = vcombine.high %v5110_v35, %v5114_v36  ;;  %v4974_v6 = vld [vmem:[%s10723_s15 + $0x288] sm:$0xff]  ;;  %v4939_v11 = vld [vmem:[%s10723_s15 + $0x170] sm:$0xff] }
 0x714   : > { %v5098_v58 = vld [vmem:[%s10723_s15 + $0x668] sm:$0xff]  ;;  %v8691_v62 = vcombine.low %v4974_v6, %v4978_v41  ;;  %v5063_v23 = vld [vmem:[%s10723_s15 + $0x550] sm:$0xff] }
 0x715   : > { %v4962_v0 = vld [vmem:[%s10723_s15 + $0x228] sm:$0xff] }
 0x716   : > { %6566 = vmatpush1.bf16.msra.mxu0 %v8619_v42  ;;  %6607 = vmatpush1.bf16.msra.mxu1 %v8747_v49  ;;  %v8827_v42 = vcombine.low %v5110_v35, %v5114_v36  ;;  %v8692_v49 = vcombine.high %v4974_v6, %v4978_v41  ;;  %v5086_v25 = vld [vmem:[%s10723_s15 + $0x608] sm:$0xff]  ;;  %v5067_v35 = vld [vmem:[%s10723_s15 + $0x570] sm:$0xff] }
 0x717   : > { %6567 = vmatprep.subr.bf16.mxu0 %v8612_v51  ;;  %6608 = vmatprep.subr.bf16.mxu1 %v8740_v52  ;;  %v8820_v51 = vcombine.high %v5102_v46, %v5106_v4  ;;  %v4966_v52 = vld [vmem:[%s10723_s15 + $0x248] sm:$0xff]  ;;  %v5055_v6 = vld [vmem:[%s10723_s15 + $0x510] sm:$0xff]  ;;  %v8782_v41 = vcombine.high %v5063_v23, %v5067_v35 }
 0x718   : > { %v5090_v1 = vld [vmem:[%s10723_s15 + $0x628] sm:$0xff]  ;;  %v8683_v5 = vcombine.low %v4966_v52, %v4970_v53 }
 0x71a   : > { %6568 = vmatpush1.bf16.msra.mxu0 %v8611_v50  ;;  %6609 = vmatpush1.bf16.msra.mxu1 %v8739_v45  ;;  %v8819_v50 = vcombine.low %v5102_v46, %v5106_v4  ;;  %v8684_v45 = vcombine.high %v4966_v52, %v4970_v53  ;;  %v5059_v46 = vld [vmem:[%s10723_s15 + $0x530] sm:$0xff] }
 0x71b   : > { %6569 = vmatprep.subr.bf16.mxu0 %v8732_v63  ;;  %6610 = vmatprep.subr.bf16.mxu1 %v8860_v20  ;;  %v8812_v63 = vcombine.high %v5094_v54, %v5098_v58  ;;  %v4958_v20 = vld [vmem:[%s10723_s15 + $0x208] sm:$0xff]  ;;  %v8774_v52 = vcombine.high %v5055_v6, %v5059_v46  ;;  %v5047_v53 = vld [vmem:[%s10723_s15 + $0x4d0] sm:$0xff] }
 0x71c   : > { %v8675_v14 = vcombine.low %v4958_v20, %v4962_v0 }
 0x71e   : > { %6570 = vmatpush2.bf16.msra.mxu0 %v8731_v7  ;;  %6611 = vmatpush2.bf16.msra.mxu1 %v8859_v24  ;;  %v8811_v7 = vcombine.low %v5094_v54, %v5098_v58  ;;  %v8676_v24 = vcombine.high %v4958_v20, %v4962_v0  ;;  %v5051_v54 = vld [vmem:[%s10723_s15 + $0x4f0] sm:$0xff] }
 0x71f   : > { %6571 = vmatprep.subr.bf16.mxu0 %v8724_v9  ;;  %6612 = vmatprep.subr.bf16.mxu1 %v8852_v30  ;;  %v8804_v9 = vcombine.high %v5086_v25, %v5090_v1  ;;  %v4951_v30 = vld [vmem:[%s10723_s15 + $0x1d0] sm:$0xff] }
 0x720   : > { %v8669_v26 = vcombine.low %v4951_v30, %v4955_v10  ;;  %v5039_v20 = vld [vmem:[%s10723_s15 + $0x490] sm:$0xff] }
 0x721   : > { %v5043_v0 = vld [vmem:[%s10723_s15 + $0x4b0] sm:$0xff] }
 0x722   : > { %6572 = vmatpush2.bf16.msra.mxu0 %v8723_v15  ;;  %6613 = vmatpush2.bf16.msra.mxu1 %v8851_v16  ;;  %v8803_v15 = vcombine.low %v5086_v25, %v5090_v1  ;;  %v8670_v16 = vcombine.high %v4951_v30, %v4955_v10  ;;  %v8766_v25 = vcombine.high %v5047_v53, %v5051_v54  ;;  %v5031_v30 = vld [vmem:[%s10723_s15 + $0x450] sm:$0xff] }
 0x723   : > { %6573 = vmatprep.subr.bf16.mxu0 %v8716_v17  ;;  %6614 = vmatprep.subr.bf16.mxu1 %v8844_v18  ;;  %v8798_v17 = vcombine.high %v5079_v12, %v5083_v13  ;;  %v4943_v18 = vld [vmem:[%s10723_s15 + $0x190] sm:$0xff] }
 0x724   : > { %v8661_v36 = vcombine.low %v4943_v18, %v4947_v19  ;;  %v5035_v10 = vld [vmem:[%s10723_s15 + $0x470] sm:$0xff] }
 0x726   : > { %6574 = vmatpush2.bf16.msra.mxu0 %v8715_v27  ;;  %6615 = vmatpush2.bf16.msra.mxu1 %v8843_v32  ;;  %v8797_v27 = vcombine.low %v5079_v12, %v5083_v13  ;;  %v8662_v32 = vcombine.high %v4943_v18, %v4947_v19  ;;  %v8758_v12 = vcombine.high %v5039_v20, %v5043_v0  ;;  %v5023_v18 = vld [vmem:[%s10723_s15 + $0x410] sm:$0xff] }
 0x727   : > { %6575 = vmatprep.subr.bf16.mxu0 %v8708_v33  ;;  %6616 = vmatprep.subr.bf16.mxu1 %v8836_v34  ;;  %v8790_v33 = vcombine.high %v5071_v21, %v5075_v22  ;;  %v4935_v34 = vld [vmem:[%s10723_s15 + $0x150] sm:$0xff] }
 0x728   : > { %v8653_v4 = vcombine.low %v4935_v34, %v4939_v11  ;;  %v5027_v19 = vld [vmem:[%s10723_s15 + $0x430] sm:$0xff] }
 0x72a   : > { %6576 = vmatpush2.bf16.msra.mxu0 %v8707_v38  ;;  %6617 = vmatpush2.bf16.msra.mxu1 %v8835_v39  ;;  %v4927_v38 = vld [vmem:[%s10723_s15 + $0x110] sm:$0xff] }
 0x72b   : > { %6577 = vmatprep.subr.bf16.mxu0 %v8700_v2  ;;  %6618 = vmatprep.subr.bf16.mxu1 %v8828_v40  ;;  %v4931_v39 = vld [vmem:[%s10723_s15 + $0x130] sm:$0xff]  ;;  %v8789_v2 = vcombine.low %v5071_v21, %v5075_v22  ;;  %v8654_v40 = vcombine.high %v4935_v34, %v4939_v11  ;;  %v8750_v21 = vcombine.high %v5031_v30, %v5035_v10 }
 0x72c   : > { %v8645_v58 = vcombine.low %v4927_v38, %v4931_v39  ;;  %v5143_v34 = vld [vmem:[%s10723_s15 + $0x7d0] sm:$0xff] }
 0x72d   : > { %v5147_v11 = vld [vmem:[%s10723_s15 + $0x7f0] sm:$0xff] }
 0x72e   : > { %6578 = vmatpush2.bf16.msra.mxu0 %v8699_v3  ;;  %6619 = vmatpush2.bf16.msra.mxu1 %v8827_v42  ;;  %v4919_v3 = vld [vmem:[%s10723_s15 + $0xd0] sm:$0xff] }
 0x72f   : > { %6579 = vmatprep.subr.bf16.mxu0 %v8692_v49  ;;  %6620 = vmatprep.subr.bf16.mxu1 %v8820_v51  ;;  %v4923_v42 = vld [vmem:[%s10723_s15 + $0xf0] sm:$0xff]  ;;  %v8781_v49 = vcombine.low %v5063_v23, %v5067_v35  ;;  %v8646_v51 = vcombine.high %v4927_v38, %v4931_v39  ;;  %v8742_v23 = vcombine.high %v5023_v18, %v5027_v19 }
 0x730   : > { %v8637_v1 = vcombine.low %v4919_v3, %v4923_v42  ;;  %v5011_v38 = vld [vmem:[%s10723_s15 + $0x3b0] sm:$0xff]  ;;  %v8741_v39 = vcombine.low %v5023_v18, %v5027_v19 }
 0x731   : > { %v5107_v18 = vld [vmem:[%s10723_s15 + $0x6b0] sm:$0xff] }
 0x732   : > { %6580 = vmatpush2.bf16.msra.mxu0 %v8691_v62  ;;  %6621 = vmatpush2.bf16.msra.mxu1 %v8819_v50  ;;  %v4911_v62 = vld [vmem:[%s10723_s15 + $0x90] sm:$0xff] }
 0x733   : > { %6581 = vmatprep.subr.bf16.mxu0 %v8684_v45  ;;  %6622 = vmatprep.subr.bf16.mxu1 %v8812_v63  ;;  %v4915_v50 = vld [vmem:[%s10723_s15 + $0xb0] sm:$0xff]  ;;  %v8773_v45 = vcombine.low %v5055_v6, %v5059_v46  ;;  %v8638_v63 = vcombine.high %v4919_v3, %v4923_v42  ;;  %v8861_v42 = vcombine.low %v5143_v34, %v5147_v11 }
 0x734   : > { %v8629_v13 = vcombine.low %v4911_v62, %v4915_v50  ;;  %v5139_v6 = vld [vmem:[%s10723_s15 + $0x7b0] sm:$0xff] }
 0x735   : > { %v5003_v3 = vld [vmem:[%s10723_s15 + $0x370] sm:$0xff] }
 0x736   : > { %6582 = vmatpush2.bf16.msra.mxu0 %v8683_v5  ;;  %6623 = vmatpush2.bf16.msra.mxu1 %v8811_v7  ;;  %v4903_v5 = vld [vmem:[%s10723_s15 + $0x50] sm:$0xff] }
 0x737   : > { %6583 = vmatprep.subr.bf16.mxu0 %v8676_v24  ;;  %6624 = vmatprep.subr.bf16.mxu1 %v8804_v9  ;;  %v4907_v7 = vld [vmem:[%s10723_s15 + $0x70] sm:$0xff]  ;;  %v8765_v24 = vcombine.low %v5047_v53, %v5051_v54  ;;  %v8630_v9 = vcombine.high %v4911_v62, %v4915_v50 }
 0x738   : > { %v8621_v22 = vcombine.low %v4903_v5, %v4907_v7  ;;  %v4995_v62 = vld [vmem:[%s10723_s15 + $0x330] sm:$0xff] }
 0x73a   : > { %6584 = vmatpush2.bf16.msra.mxu0 %v8675_v14  ;;  %6625 = vmatpush2.bf16.msra.mxu1 %v8803_v15  ;;  %v4895_v14 = vld [vmem:[%s10723_s15 + $0x10] sm:$0xff] }
 0x73b   : > { %6635 = vmatprep.subr.bf16.mxu0 %v8670_v16  ;;  %6676 = vmatprep.subr.bf16.mxu1 %v8798_v17  ;;  %v4899_v15 = vld [vmem:[%s10723_s15 + $0x30] sm:$0xff]  ;;  %v8757_v16 = vcombine.low %v5039_v20, %v5043_v0  ;;  %v8622_v17 = vcombine.high %v4903_v5, %v4907_v7 }
 0x73c   : > { %v8613_v35 = vcombine.low %v4895_v14, %v4899_v15  ;;  %v5123_v20 = vld [vmem:[%s10723_s15 + $0x730] sm:$0xff] }
 0x73d   : > { %6586 = vmatmul.mubr.bf16.vlgmr.msra.gmra.mxu0 %v11490_v44  ;;  %6627 = vmatmul.mubr.bf16.vlgmr.msra.gmra.mxu1 %v11492_v48  ;;  %v4987_v5 = vld [vmem:[%s10723_s15 + $0x2f0] sm:$0xff] }
 0x73e   : > { %6636 = vmatpush1.bf16.msra.mxu0 %v8669_v26  ;;  %6667 = vmatprep.mubr.bf16.mxu0 %v11486_v8  ;;  %v5015_v26 = vld [vmem:[%s10723_s15 + $0x3d0] sm:$0xff] }
 0x73f   : > { %6677 = vmatpush1.bf16.msra.mxu1 %v8797_v27  ;;  %6708 = vmatprep.mubr.bf16.mxu1 %v11488_v43  ;;  %v5019_v27 = vld [vmem:[%s10723_s15 + $0x3f0] sm:$0xff] }
 0x740   : > { %6637 = vmatprep.subr.bf16.mxu0 %v8662_v32  ;;  %6678 = vmatprep.subr.bf16.mxu1 %v8790_v33  ;;  %v8749_v32 = vcombine.low %v5031_v30, %v5035_v10  ;;  %v8614_v33 = vcombine.high %v4895_v14, %v4899_v15  ;;  %v8733_v46 = vcombine.low %v5015_v26, %v5019_v27  ;;  %v5115_v30 = vld [vmem:[%s10723_s15 + $0x6f0] sm:$0xff] }
 0x741   : > { %v4979_v14 = vld [vmem:[%s10723_s15 + $0x2b0] sm:$0xff] }
 0x742   : > { %6638 = vmatpush1.bf16.msra.mxu0 %v8661_v36  ;;  %v5007_v36 = vld [vmem:[%s10723_s15 + $0x390] sm:$0xff] }
 0x743   : > { %6679 = vmatpush1.bf16.msra.mxu1 %v8789_v2  ;;  %6639 = vmatprep.subr.bf16.mxu0 %v8654_v40  ;;  %v8734_v2 = vcombine.high %v5015_v26, %v5019_v27  ;;  %v5135_v40 = vld [vmem:[%s10723_s15 + $0x790] sm:$0xff]  ;;  %v8725_v54 = vcombine.low %v5007_v36, %v5011_v38 }
 0x744   : > { %6680 = vmatprep.subr.bf16.mxu1 %v8782_v41  ;;  %v8862_v41 = vcombine.high %v5143_v34, %v5147_v11  ;;  %v8854_v53 = vcombine.high %v5135_v40, %v5139_v6  ;;  %v8853_v50 = vcombine.low %v5135_v40, %v5139_v6  ;;  %v4971_v26 = vld [vmem:[%s10723_s15 + $0x270] sm:$0xff] }
 0x745   : > { %v5099_v34 = vld [vmem:[%s10723_s15 + $0x670] sm:$0xff] }
 0x746   : > { %6640 = vmatpush1.bf16.msra.mxu0 %v8653_v4  ;;  %v4999_v4 = vld [vmem:[%s10723_s15 + $0x350] sm:$0xff] }
 0x747   : > { %6681 = vmatpush1.bf16.msra.mxu1 %v8781_v49  ;;  %6641 = vmatprep.subr.bf16.mxu0 %v8646_v51  ;;  %v8726_v49 = vcombine.high %v5007_v36, %v5011_v38  ;;  %v5127_v51 = vld [vmem:[%s10723_s15 + $0x750] sm:$0xff] }
 0x748   : > { %6682 = vmatprep.subr.bf16.mxu1 %v8774_v52  ;;  %v5131_v52 = vld [vmem:[%s10723_s15 + $0x770] sm:$0xff] }
 0x749   : > { %v8846_v0 = vcombine.high %v5127_v51, %v5131_v52  ;;  %v8845_v7 = vcombine.low %v5127_v51, %v5131_v52  ;;  %v4963_v36 = vld [vmem:[%s10723_s15 + $0x230] sm:$0xff]  ;;  %v5084_v51 = vld [vmem:[%s10723_s15 + $0x5f8] sm:$0xff] }
 0x74a   : > { %6642 = vmatpush1.bf16.msra.mxu0 %v8645_v58  ;;  %v4991_v58 = vld [vmem:[%s10723_s15 + $0x310] sm:$0xff] }
 0x74b   : > { %6683 = vmatpush1.bf16.msra.mxu1 %v8773_v45  ;;  %6643 = vmatprep.subr.bf16.mxu0 %v8638_v63  ;;  %v8718_v45 = vcombine.high %v4999_v4, %v5003_v3  ;;  %v5119_v63 = vld [vmem:[%s10723_s15 + $0x710] sm:$0xff] }
 0x74c   : > { %6684 = vmatprep.subr.bf16.mxu1 %v8766_v25  ;;  %v8717_v25 = vcombine.low %v4999_v4, %v5003_v3  ;;  %v8838_v10 = vcombine.high %v5119_v63, %v5123_v20  ;;  %v8837_v15 = vcombine.low %v5119_v63, %v5123_v20  ;;  %v5091_v40 = vld [vmem:[%s10723_s15 + $0x630] sm:$0xff]  ;;  %v4956_v4 = vld [vmem:[%s10723_s15 + $0x1f8] sm:$0xff] }
 0x74d   : > { %v5072_v20 = vld [vmem:[%s10723_s15 + $0x598] sm:$0xff] }
 0x74e   : > { %6644 = vmatpush1.bf16.msra.mxu0 %v8637_v1  ;;  %v4983_v1 = vld [vmem:[%s10723_s15 + $0x2d0] sm:$0xff] }
 0x74f   : > { %6685 = vmatpush1.bf16.msra.mxu1 %v8765_v24  ;;  %6645 = vmatprep.subr.bf16.mxu0 %v8630_v9  ;;  %v8710_v24 = vcombine.high %v4991_v58, %v4995_v62  ;;  %v5111_v9 = vld [vmem:[%s10723_s15 + $0x6d0] sm:$0xff] }
 0x750   : > { %6686 = vmatprep.subr.bf16.mxu1 %v8758_v12  ;;  %v8709_v12 = vcombine.low %v4991_v58, %v4995_v62  ;;  %v8830_v19 = vcombine.high %v5111_v9, %v5115_v30  ;;  %v8829_v27 = vcombine.low %v5111_v9, %v5115_v30  ;;  %v4944_v62 = vld [vmem:[%s10723_s15 + $0x198] sm:$0xff] }
 0x751   : > { %v5064_v9 = vld [vmem:[%s10723_s15 + $0x558] sm:$0xff] }
 0x752   : > { %6646 = vmatpush1.bf16.msra.mxu0 %v8629_v13  ;;  %v4975_v13 = vld [vmem:[%s10723_s15 + $0x290] sm:$0xff]  ;;  %v5068_v30 = vld [vmem:[%s10723_s15 + $0x578] sm:$0xff] }
 0x753   : > { %6687 = vmatpush1.bf16.msra.mxu1 %v8757_v16  ;;  %6647 = vmatprep.subr.bf16.mxu0 %v8622_v17  ;;  %v8702_v16 = vcombine.high %v4983_v1, %v4987_v5  ;;  %v5103_v17 = vld [vmem:[%s10723_s15 + $0x690] sm:$0xff] }
 0x754   : > { %6688 = vmatprep.subr.bf16.mxu1 %v8750_v21  ;;  %v8701_v21 = vcombine.low %v4983_v1, %v4987_v5  ;;  %v8822_v11 = vcombine.high %v5103_v17, %v5107_v18  ;;  %v8821_v38 = vcombine.low %v5103_v17, %v5107_v18  ;;  %v4936_v5 = vld [vmem:[%s10723_s15 + $0x158] sm:$0xff] }
 0x755   : > { %v5056_v17 = vld [vmem:[%s10723_s15 + $0x518] sm:$0xff] }
 0x756   : > { %6648 = vmatpush1.bf16.msra.mxu0 %v8621_v22  ;;  %v4967_v22 = vld [vmem:[%s10723_s15 + $0x250] sm:$0xff]  ;;  %v5060_v18 = vld [vmem:[%s10723_s15 + $0x538] sm:$0xff] }
 0x757   : > { %6689 = vmatpush1.bf16.msra.mxu1 %v8749_v32  ;;  %6649 = vmatprep.subr.bf16.mxu0 %v8614_v33  ;;  %v8694_v32 = vcombine.high %v4975_v13, %v4979_v14  ;;  %v5095_v33 = vld [vmem:[%s10723_s15 + $0x650] sm:$0xff] }
 0x758   : > { %6690 = vmatprep.subr.bf16.mxu1 %v8742_v23  ;;  %v8693_v23 = vcombine.low %v4975_v13, %v4979_v14  ;;  %v8814_v6 = vcombine.high %v5095_v33, %v5099_v34  ;;  %v8813_v3 = vcombine.low %v5095_v33, %v5099_v34  ;;  %v8784_v14 = vcombine.high %v5064_v9, %v5068_v30 }
 0x759   : > { %v8775_v34 = vcombine.low %v5056_v17, %v5060_v18 }
 0x75a   : > { %6650 = vmatpush1.bf16.msra.mxu0 %v8613_v35  ;;  %v4959_v35 = vld [vmem:[%s10723_s15 + $0x210] sm:$0xff] }
 0x75b   : > { %6691 = vmatpush1.bf16.msra.mxu1 %v8741_v39  ;;  %6651 = vmatprep.subr.bf16.mxu0 %v8734_v2  ;;  %v8686_v39 = vcombine.high %v4967_v22, %v4971_v26  ;;  %v5087_v2 = vld [vmem:[%s10723_s15 + $0x610] sm:$0xff] }
 0x75c   : > { %6692 = vmatprep.subr.bf16.mxu1 %v8862_v41  ;;  %v8685_v41 = vcombine.low %v4967_v22, %v4971_v26  ;;  %v8806_v52 = vcombine.high %v5087_v2, %v5091_v40  ;;  %v4920_v22 = vld [vmem:[%s10723_s15 + $0xd8] sm:$0xff] }
 0x75d   : > { %v4924_v26 = vld [vmem:[%s10723_s15 + $0xf8] sm:$0xff] }
 0x75e   : > { %6652 = vmatpush2.bf16.msra.mxu0 %v8733_v46  ;;  %v4952_v46 = vld [vmem:[%s10723_s15 + $0x1d8] sm:$0xff] }
 0x75f   : > { %6693 = vmatpush2.bf16.msra.mxu1 %v8861_v42  ;;  %6653 = vmatprep.subr.bf16.mxu0 %v8726_v49  ;;  %v8678_v42 = vcombine.high %v4959_v35, %v4963_v36  ;;  %v5080_v49 = vld [vmem:[%s10723_s15 + $0x5d8] sm:$0xff]  ;;  %v8672_v58 = vcombine.high %v4952_v46, %v4956_v4  ;;  %v8671_v63 = vcombine.low %v4952_v46, %v4956_v4 }
 0x760   : > { %6694 = vmatprep.subr.bf16.mxu1 %v8854_v53  ;;  %v8677_v53 = vcombine.low %v4959_v35, %v4963_v36  ;;  %v4912_v35 = vld [vmem:[%s10723_s15 + $0x98] sm:$0xff] }
 0x761   : > { %v4916_v36 = vld [vmem:[%s10723_s15 + $0xb8] sm:$0xff] }
 0x762   : > { %6654 = vmatpush2.bf16.msra.mxu0 %v8725_v54  ;;  %v8805_v54 = vcombine.low %v5087_v2, %v5091_v40  ;;  %v8639_v2 = vcombine.low %v4920_v22, %v4924_v26  ;;  %v4904_v46 = vld [vmem:[%s10723_s15 + $0x58] sm:$0xff] }
 0x763   : > { %6695 = vmatpush2.bf16.msra.mxu1 %v8853_v50  ;;  %6655 = vmatprep.subr.bf16.mxu0 %v8718_v45  ;;  %v4948_v50 = vld [vmem:[%s10723_s15 + $0x1b8] sm:$0xff]  ;;  %v8800_v45 = vcombine.high %v5080_v49, %v5084_v51 }
 0x764   : > { %6696 = vmatprep.subr.bf16.mxu1 %v8846_v0  ;;  %v5076_v0 = vld [vmem:[%s10723_s15 + $0x5b8] sm:$0xff]  ;;  %v8664_v1 = vcombine.high %v4944_v62, %v4948_v50 }
 0x765   : > { %v4908_v4 = vld [vmem:[%s10723_s15 + $0x78] sm:$0xff] }
 0x766   : > { %6656 = vmatpush2.bf16.msra.mxu0 %v8717_v25  ;;  %v8799_v25 = vcombine.low %v5080_v49, %v5084_v51  ;;  %v8631_v49 = vcombine.low %v4912_v35, %v4916_v36 }
 0x767   : > { %6697 = vmatpush2.bf16.msra.mxu1 %v8845_v7  ;;  %6657 = vmatprep.subr.bf16.mxu0 %v8710_v24  ;;  %v4940_v7 = vld [vmem:[%s10723_s15 + $0x178] sm:$0xff]  ;;  %v8792_v24 = vcombine.high %v5072_v20, %v5076_v0 }
 0x768   : > { %6698 = vmatprep.subr.bf16.mxu1 %v8838_v10  ;;  %v8663_v10 = vcombine.low %v4944_v62, %v4948_v50  ;;  %v8656_v13 = vcombine.high %v4936_v5, %v4940_v7  ;;  %v5024_v62 = vld [vmem:[%s10723_s15 + $0x418] sm:$0xff] }
 0x769   : > { %v5028_v50 = vld [vmem:[%s10723_s15 + $0x438] sm:$0xff] }
 0x76a   : > { %6658 = vmatpush2.bf16.msra.mxu0 %v8709_v12  ;;  %v8791_v12 = vcombine.low %v5072_v20, %v5076_v0  ;;  %v8744_v0 = vcombine.high %v5024_v62, %v5028_v50 }
 0x76b   : > { %6699 = vmatpush2.bf16.msra.mxu1 %v8837_v15  ;;  %6659 = vmatprep.subr.bf16.mxu0 %v8702_v16  ;;  %v4928_v15 = vld [vmem:[%s10723_s15 + $0x118] sm:$0xff] }
 0x76c   : > { %6700 = vmatprep.subr.bf16.mxu1 %v8830_v19  ;;  %v4932_v16 = vld [vmem:[%s10723_s15 + $0x138] sm:$0xff]  ;;  %v8655_v19 = vcombine.low %v4936_v5, %v4940_v7 }
 0x76d   : > { %v8647_v33 = vcombine.low %v4928_v15, %v4932_v16  ;;  %v5144_v5 = vld [vmem:[%s10723_s15 + $0x7d8] sm:$0xff] }
 0x76e   : > { %6660 = vmatpush2.bf16.msra.mxu0 %v8701_v21  ;;  %v8648_v21 = vcombine.high %v4928_v15, %v4932_v16  ;;  %v5148_v7 = vld [vmem:[%s10723_s15 + $0x7f8] sm:$0xff] }
 0x76f   : > { %6701 = vmatpush2.bf16.msra.mxu1 %v8829_v27  ;;  %6661 = vmatprep.subr.bf16.mxu0 %v8694_v32  ;;  %v5048_v27 = vld [vmem:[%s10723_s15 + $0x4d8] sm:$0xff] }
 0x770   : > { %6702 = vmatprep.subr.bf16.mxu1 %v8822_v11  ;;  %v5052_v32 = vld [vmem:[%s10723_s15 + $0x4f8] sm:$0xff]  ;;  %v8640_v11 = vcombine.high %v4920_v22, %v4924_v26 }
 0x771   : > { %v8767_v40 = vcombine.low %v5048_v27, %v5052_v32  ;;  %v5140_v15 = vld [vmem:[%s10723_s15 + $0x7b8] sm:$0xff] }
 0x772   : > { %6662 = vmatpush2.bf16.msra.mxu0 %v8693_v23  ;;  %v8768_v23 = vcombine.high %v5048_v27, %v5052_v32  ;;  %v5132_v22 = vld [vmem:[%s10723_s15 + $0x778] sm:$0xff] }
 0x773   : > { %6703 = vmatpush2.bf16.msra.mxu1 %v8821_v38  ;;  %6663 = vmatprep.subr.bf16.mxu0 %v8686_v39  ;;  %v5040_v38 = vld [vmem:[%s10723_s15 + $0x498] sm:$0xff] }
 0x774   : > { %6704 = vmatprep.subr.bf16.mxu1 %v8814_v6  ;;  %v5044_v39 = vld [vmem:[%s10723_s15 + $0x4b8] sm:$0xff]  ;;  %v8632_v6 = vcombine.high %v4912_v35, %v4916_v36 }
 0x775   : > { %v8759_v51 = vcombine.low %v5040_v38, %v5044_v39  ;;  %v5124_v35 = vld [vmem:[%s10723_s15 + $0x738] sm:$0xff] }
 0x776   : > { %6664 = vmatpush2.bf16.msra.mxu0 %v8685_v41  ;;  %v8760_v41 = vcombine.high %v5040_v38, %v5044_v39 }
 0x777   : > { %6705 = vmatpush2.bf16.msra.mxu1 %v8813_v3  ;;  %6665 = vmatprep.subr.bf16.mxu0 %v8678_v42  ;;  %v5032_v3 = vld [vmem:[%s10723_s15 + $0x458] sm:$0xff] }
 0x778   : > { %6706 = vmatprep.subr.bf16.mxu1 %v8806_v52  ;;  %v5036_v42 = vld [vmem:[%s10723_s15 + $0x478] sm:$0xff]  ;;  %v8624_v52 = vcombine.high %v4904_v46, %v4908_v4 }
 0x77a   : > { %6666 = vmatpush2.bf16.msra.mxu0 %v8677_v53  ;;  %v8752_v53 = vcombine.high %v5032_v3, %v5036_v42 }
 0x77b   : > { %6707 = vmatpush2.bf16.msra.mxu1 %v8805_v54  ;;  %6717 = vmatprep.subr.bf16.mxu0 %v8672_v58  ;;  %v4896_v54 = vld [vmem:[%s10723_s15 + $0x18] sm:$0xff] }
 0x77c   : > { %6758 = vmatprep.subr.bf16.mxu1 %v8800_v45  ;;  %v4900_v58 = vld [vmem:[%s10723_s15 + $0x38] sm:$0xff]  ;;  %v8623_v45 = vcombine.low %v4904_v46, %v4908_v4 }
 0x77d   : > { %6668 = vmatmul.mubr.bf16.vlgmr.msra.gmra.mxu0 %v11490_v44  ;;  %v8616_v20 = vcombine.high %v4896_v54, %v4900_v58  ;;  %v5116_v46 = vld [vmem:[%s10723_s15 + $0x6f8] sm:$0xff] }
 0x77e   : > { %6709 = vmatmul.mubr.bf16.vlgmr.msra.gmra.mxu1 %v11492_v48  ;;  %6718 = vmatpush1.bf16.msra.mxu0 %v8671_v63  ;;  %v8751_v63 = vcombine.low %v5032_v3, %v5036_v42 }
 0x77f   : > { %6749 = vmatprep.mubr.bf16.mxu0 %v11486_v8  ;;  %6759 = vmatpush1.bf16.msra.mxu1 %v8799_v25  ;;  %v8783_v8 = vcombine.low %v5064_v9, %v5068_v30  ;;  %v5016_v25 = vld [vmem:[%s10723_s15 + $0x3d8] sm:$0xff]  ;;  %v8743_v9 = vcombine.low %v5024_v62, %v5028_v50 }
 0x780   : > { %6790 = vmatprep.mubr.bf16.mxu1 %v11488_v43  ;;  %6719 = vmatprep.subr.bf16.mxu0 %v8664_v1  ;;  %v8776_v43 = vcombine.high %v5056_v17, %v5060_v18  ;;  %v5020_v1 = vld [vmem:[%s10723_s15 + $0x3f8] sm:$0xff]  ;;  %v8863_v17 = vcombine.low %v5144_v5, %v5148_v7 }
 0x781   : > { %6760 = vmatprep.subr.bf16.mxu1 %v8792_v24  ;;  %v8615_v24 = vcombine.low %v4896_v54, %v4900_v58  ;;  %v8736_v30 = vcombine.high %v5016_v25, %v5020_v1  ;;  %v8735_v16 = vcombine.low %v5016_v25, %v5020_v1  ;;  %v5108_v54 = vld [vmem:[%s10723_s15 + $0x6b8] sm:$0xff] }
 0x782   : > { %6720 = vmatpush1.bf16.msra.mxu0 %v8663_v10  ;;  %v8864_v10 = vcombine.high %v5144_v5, %v5148_v7  ;;  %v5100_v25 = vld [vmem:[%s10723_s15 + $0x678] sm:$0xff] }
 0x783   : > { %6761 = vmatpush1.bf16.msra.mxu1 %v8791_v12  ;;  %6721 = vmatprep.subr.bf16.mxu0 %v8656_v13  ;;  %v5008_v12 = vld [vmem:[%s10723_s15 + $0x398] sm:$0xff] }
 0x784   : > { %6762 = vmatprep.subr.bf16.mxu1 %v8784_v14  ;;  %v5012_v13 = vld [vmem:[%s10723_s15 + $0x3b8] sm:$0xff] }
 0x785   : > { %v5136_v14 = vld [vmem:[%s10723_s15 + $0x798] sm:$0xff]  ;;  %v8728_v18 = vcombine.high %v5008_v12, %v5012_v13  ;;  %v8727_v26 = vcombine.low %v5008_v12, %v5012_v13 }
 0x786   : > { %6722 = vmatpush1.bf16.msra.mxu0 %v8655_v19  ;;  %v8856_v19 = vcombine.high %v5136_v14, %v5140_v15  ;;  %v8855_v27 = vcombine.low %v5136_v14, %v5140_v15  ;;  %v5092_v12 = vld [vmem:[%s10723_s15 + $0x638] sm:$0xff] }
 0x787   : > { %6763 = vmatpush1.bf16.msra.mxu1 %v8783_v8  ;;  %6723 = vmatprep.subr.bf16.mxu0 %v8648_v21  ;;  %v5000_v8 = vld [vmem:[%s10723_s15 + $0x358] sm:$0xff] }
 0x788   : > { %6764 = vmatprep.subr.bf16.mxu1 %v8776_v43  ;;  %v5004_v21 = vld [vmem:[%s10723_s15 + $0x378] sm:$0xff] }
 0x789   : > { %v5128_v43 = vld [vmem:[%s10723_s15 + $0x758] sm:$0xff]  ;;  %v8720_v32 = vcombine.high %v5000_v8, %v5004_v21  ;;  %v8719_v36 = vcombine.low %v5000_v8, %v5004_v21 }
 0x78a   : > { %6724 = vmatpush1.bf16.msra.mxu0 %v8647_v33  ;;  %v8848_v33 = vcombine.high %v5128_v43, %v5132_v22  ;;  %v8847_v38 = vcombine.low %v5128_v43, %v5132_v22  ;;  %v9744_v8 = vld [vmem:[%s11572_s6 + $0x174] ss:$8 sps:$4 sm:$0xff]   ;;  %v9733_v21 = vld [vmem:[%s11572_s6 + $0x70] ss:$8 sps:$4 sm:$0xff]   ;;  %v9738_v22 = vld [vmem:[%s11572_s6 + $0x64] ss:$8 sps:$4 sm:$0xff]  }
 0x78b   : > { %6765 = vmatpush1.bf16.msra.mxu1 %v8775_v34  ;;  %6725 = vmatprep.subr.bf16.mxu0 %v8640_v11  ;;  %v4992_v34 = vld [vmem:[%s10723_s15 + $0x318] sm:$0xff] }
 0x78c   : > { %6766 = vmatprep.subr.bf16.mxu1 %v8768_v23  ;;  %v4996_v11 = vld [vmem:[%s10723_s15 + $0x338] sm:$0xff] }
 0x78d   : > { %v5120_v23 = vld [vmem:[%s10723_s15 + $0x718] sm:$0xff]  ;;  %v8712_v39 = vcombine.high %v4992_v34, %v4996_v11  ;;  %v8711_v4 = vcombine.low %v4992_v34, %v4996_v11  ;;  %v9736_v11 = vld [vmem:[%s11572_s6 + $0x60] ss:$8 sps:$4 sm:$0xff]  }
 0x78e   : > { %6726 = vmatpush1.bf16.msra.mxu0 %v8639_v2  ;;  %v8840_v2 = vcombine.high %v5120_v23, %v5124_v35  ;;  %v8839_v3 = vcombine.low %v5120_v23, %v5124_v35  ;;  %v11700_v43 = vld [vmem:[%s10686_s24 + $0x15] sm:$0xff] }
 0x78f   : > { %6767 = vmatpush1.bf16.msra.mxu1 %v8767_v40  ;;  %6727 = vmatprep.subr.bf16.mxu0 %v8632_v6  ;;  %v4984_v40 = vld [vmem:[%s10723_s15 + $0x2d8] sm:$0xff] }
 0x790   : > { %6768 = vmatprep.subr.bf16.mxu1 %v8760_v41  ;;  %v4988_v6 = vld [vmem:[%s10723_s15 + $0x2f8] sm:$0xff] }
 0x791   : > { %v5112_v41 = vld [vmem:[%s10723_s15 + $0x6d8] sm:$0xff]  ;;  %v8704_v42 = vcombine.high %v4984_v40, %v4988_v6  ;;  %v8703_v58 = vcombine.low %v4984_v40, %v4988_v6 }
 0x792   : > { %6728 = vmatpush1.bf16.msra.mxu0 %v8631_v49  ;;  %v8832_v49 = vcombine.high %v5112_v41, %v5116_v46  ;;  %v8831_v62 = vcombine.low %v5112_v41, %v5116_v46 }
 0x793   : > { %6769 = vmatpush1.bf16.msra.mxu1 %v8759_v51  ;;  %6729 = vmatprep.subr.bf16.mxu0 %v8624_v52  ;;  %v4976_v51 = vld [vmem:[%s10723_s15 + $0x298] sm:$0xff] }
 0x794   : > { %6770 = vmatprep.subr.bf16.mxu1 %v8752_v53  ;;  %v4980_v52 = vld [vmem:[%s10723_s15 + $0x2b8] sm:$0xff] }
 0x795   : > { %v5104_v53 = vld [vmem:[%s10723_s15 + $0x698] sm:$0xff]  ;;  %v8696_v50 = vcombine.high %v4976_v51, %v4980_v52  ;;  %v8695_v1 = vcombine.low %v4976_v51, %v4980_v52  ;;  %v9745_v51 = vld [vmem:[%s11572_s6 + $0x40] ss:$8 sps:$4 sm:$0xff]  }
 0x796   : > { %6730 = vmatpush1.bf16.msra.mxu0 %v8623_v45  ;;  %v8824_v45 = vcombine.high %v5104_v53, %v5108_v54  ;;  %v8823_v5 = vcombine.low %v5104_v53, %v5108_v54  ;;  %v9753_v52 = vld [vmem:[%s11572_s6 + $0x34] ss:$8 sps:$4 sm:$0xff]   ;;  %v9760_v53 = vld [vmem:[%s11572_s6 + $0x140] ss:$8 sps:$4 sm:$0xff]  }
 0x797   : > { %6771 = vmatpush1.bf16.msra.mxu1 %v8751_v63  ;;  %6731 = vmatprep.subr.bf16.mxu0 %v8616_v20  ;;  %v4968_v63 = vld [vmem:[%s10723_s15 + $0x258] sm:$0xff] }
 0x798   : > { %6772 = vmatprep.subr.bf16.mxu1 %v8744_v0  ;;  %v4972_v20 = vld [vmem:[%s10723_s15 + $0x278] sm:$0xff] }
 0x799   : > { %v5096_v0 = vld [vmem:[%s10723_s15 + $0x658] sm:$0xff]  ;;  %v8688_v7 = vcombine.high %v4968_v63, %v4972_v20  ;;  %v8687_v13 = vcombine.low %v4968_v63, %v4972_v20  ;;  %v9757_v63 = vld [vmem:[%s11572_s6 + $0x20] ss:$8 sps:$4 sm:$0xff]  }
 0x79a   : > { %6732 = vmatpush1.bf16.msra.mxu0 %v8615_v24  ;;  %v8816_v24 = vcombine.high %v5096_v0, %v5100_v25  ;;  %v8815_v14 = vcombine.low %v5096_v0, %v5100_v25  ;;  %v9768_v54 = vld [vmem:[%s11572_s6 + $0x134] ss:$8 sps:$4 sm:$0xff]   ;;  %v9772_v0 = vld [vmem:[%s11572_s6 + $0x120] ss:$8 sps:$4 sm:$0xff]  }
 0x79b   : > { %6773 = vmatpush1.bf16.msra.mxu1 %v8743_v9  ;;  %6733 = vmatprep.subr.bf16.mxu0 %v8736_v30  ;;  %v4960_v9 = vld [vmem:[%s10723_s15 + $0x218] sm:$0xff] }
 0x79c   : > { %6774 = vmatprep.subr.bf16.mxu1 %v8864_v10  ;;  %v4964_v30 = vld [vmem:[%s10723_s15 + $0x238] sm:$0xff] }
 0x79d   : > { %v5088_v10 = vld [vmem:[%s10723_s15 + $0x618] sm:$0xff]  ;;  %v8680_v15 = vcombine.high %v4960_v9, %v4964_v30 }
 0x79e   : > { %6734 = vmatpush2.bf16.msra.mxu0 %v8735_v16  ;;  %v8808_v16 = vcombine.high %v5088_v10, %v5092_v12  ;;  %v9765_v20 = vld [vmem:[%s11572_s6 + $0x14] ss:$8 sps:$4 sm:$0xff]  }
 0x79f   : > { %6775 = vmatpush2.bf16.msra.mxu1 %v8863_v17  ;;  %6735 = vmatprep.subr.bf16.mxu0 %v8728_v18  ;;  %v8679_v17 = vcombine.low %v4960_v9, %v4964_v30  ;;  %v8807_v18 = vcombine.low %v5088_v10, %v5092_v12  ;;  %v9780_v25 = vld [vmem:[%s11572_s6 + $0x114] ss:$8 sps:$4 sm:$0xff]   ;;  %v9769_v9 = vld [vmem:[%s11572_s6] ss:$8 sps:$4 sm:$0xff]  }
 0x7a0   : > { %6776 = vmatprep.subr.bf16.mxu1 %v8856_v19  ;;  %v9735_v19 = vld [vmem:[%s11572_s6 + $0x74] ss:$8 sps:$4 sm:$0xff]   ;;  %v9784_v10 = vld [vmem:[%s11572_s6 + $0x100] ss:$8 sps:$4 sm:$0xff]  }
 0x7a1   : > { %v9777_v30 = vld [vmem:[%s11572_s6 + $0xf4] ss:$8 sps:$4 sm:$0xff]  }
 0x7a2   : > { %6736 = vmatpush2.bf16.msra.mxu0 %v8727_v26  ;;  %v9742_v26 = vld [vmem:[%s11572_s6 + $0x170] ss:$8 sps:$4 sm:$0xff]   ;;  %v9792_v12 = vld [vmem:[%s11572_s6 + $0x1f4] ss:$8 sps:$4 sm:$0xff]  }
 0x7a3   : > { %6777 = vmatpush2.bf16.msra.mxu1 %v8855_v27  ;;  %6737 = vmatprep.subr.bf16.mxu0 %v8720_v32  ;;  %v6438_v27 = vrot.slane %v11700_v43, %v10968_v31  ;;  %v9750_v32 = vld [vmem:[%s11572_s6 + $0x164] ss:$8 sps:$4 sm:$0xff]  }
 0x7a4   : > { %6778 = vmatprep.subr.bf16.mxu1 %v8848_v33 }
 0x7a6   : > { %6738 = vmatpush2.bf16.msra.mxu0 %v8719_v36  ;;  %v9741_v36 = vld [vmem:[%s11572_s6 + $0x54] ss:$8 sps:$4 sm:$0xff]  }
 0x7a7   : > { %6779 = vmatpush2.bf16.msra.mxu1 %v8847_v38  ;;  %6739 = vmatprep.subr.bf16.mxu0 %v8712_v39  ;;  %v9748_v38 = vld [vmem:[%s11572_s6 + $0x160] ss:$8 sps:$4 sm:$0xff]  }
 0x7a8   : > { %6780 = vmatprep.subr.bf16.mxu1 %v8840_v2 }
 0x7aa   : > { %6740 = vmatpush2.bf16.msra.mxu0 %v8711_v4  ;;  %v9747_v4 = vld [vmem:[%s11572_s6 + $0x44] ss:$8 sps:$4 sm:$0xff]  }
 0x7ab   : > { %6781 = vmatpush2.bf16.msra.mxu1 %v8839_v3  ;;  %6741 = vmatprep.subr.bf16.mxu0 %v8704_v42  ;;  %v9754_v3 = vld [vmem:[%s11572_s6 + $0x150] ss:$8 sps:$4 sm:$0xff]  }
 0x7ac   : > { %6782 = vmatprep.subr.bf16.mxu1 %v8832_v49  ;;  %v9762_v49 = vld [vmem:[%s11572_s6 + $0x144] ss:$8 sps:$4 sm:$0xff]  }
 0x7ae   : > { %6742 = vmatpush2.bf16.msra.mxu0 %v8703_v58  ;;  %v9751_v58 = vld [vmem:[%s11572_s6 + $0x30] ss:$8 sps:$4 sm:$0xff]  }
 0x7af   : > { %6783 = vmatpush2.bf16.msra.mxu1 %v8831_v62  ;;  %6743 = vmatprep.subr.bf16.mxu0 %v8696_v50  ;;  %v9759_v62 = vld [vmem:[%s11572_s6 + $0x24] ss:$8 sps:$4 sm:$0xff]   ;;  %v9766_v50 = vld [vmem:[%s11572_s6 + $0x130] ss:$8 sps:$4 sm:$0xff]  }
 0x7b0   : > { %6784 = vmatprep.subr.bf16.mxu1 %v8824_v45  ;;  %v9774_v45 = vld [vmem:[%s11572_s6 + $0x124] ss:$8 sps:$4 sm:$0xff]  }
 0x7b2   : > { %6744 = vmatpush2.bf16.msra.mxu0 %v8695_v1  ;;  %v9763_v1 = vld [vmem:[%s11572_s6 + $0x10] ss:$8 sps:$4 sm:$0xff]  }
 0x7b3   : > { %6785 = vmatpush2.bf16.msra.mxu1 %v8823_v5  ;;  %6745 = vmatprep.subr.bf16.mxu0 %v8688_v7  ;;  %v9771_v5 = vld [vmem:[%s11572_s6 + $0x4] ss:$8 sps:$4 sm:$0xff]   ;;  %v9778_v7 = vld [vmem:[%s11572_s6 + $0x110] ss:$8 sps:$4 sm:$0xff]  }
 0x7b4   : > { %6786 = vmatprep.subr.bf16.mxu1 %v8816_v24  ;;  %v9786_v24 = vld [vmem:[%s11572_s6 + $0x104] ss:$8 sps:$4 sm:$0xff]  }
 0x7b6   : > { %6746 = vmatpush2.bf16.msra.mxu0 %v8687_v13  ;;  %v9775_v13 = vld [vmem:[%s11572_s6 + $0xf0] ss:$8 sps:$4 sm:$0xff]  }
 0x7b7   : > { %6787 = vmatpush2.bf16.msra.mxu1 %v8815_v14  ;;  %6747 = vmatprep.subr.bf16.mxu0 %v8680_v15  ;;  %v9783_v14 = vld [vmem:[%s11572_s6 + $0xe4] ss:$8 sps:$4 sm:$0xff]   ;;  %v9790_v15 = vld [vmem:[%s11572_s6 + $0x1f0] ss:$8 sps:$4 sm:$0xff]  }
 0x7b8   : > { %6788 = vmatprep.subr.bf16.mxu1 %v8808_v16  ;;  %v9798_v16 = vld [vmem:[%s11572_s6 + $0x1e4] ss:$8 sps:$4 sm:$0xff]  }
 0x7ba   : > { %6748 = vmatpush2.bf16.msra.mxu0 %v8679_v17  ;;  %v9781_v17 = vld [vmem:[%s11572_s6 + $0xe0] ss:$8 sps:$4 sm:$0xff]  }
 0x7bb   : > { %6789 = vmatpush2.bf16.msra.mxu1 %v8807_v18  ;;  %7587 = vmatprep.subr.bf16.mxu0 %v9735_v19  ;;  %v9789_v18 = vld [vmem:[%s11572_s6 + $0xd4] ss:$8 sps:$4 sm:$0xff]   ;;  %v9796_v19 = vld [vmem:[%s11572_s6 + $0x1e0] ss:$8 sps:$4 sm:$0xff]  }
 0x7bc   : > { %7628 = vmatprep.subr.bf16.mxu1 %v9744_v8  ;;  %v9804_v8 = vld [vmem:[%s11572_s6 + $0x1d4] ss:$8 sps:$4 sm:$0xff]  }
 0x7bd   : > { %6750 = vmatmul.mubr.bf16.vlgmr.msra.gmra.mxu0 %v11490_v44  ;;  %v11708_v33 = vpop.f32.mrf.mxu0  ;;  %v11710_v34 = vpop.f32.mrf.mxu1  ;;  %v9756_v44 = vld [vmem:[%s11572_s6 + $0x154] ss:$8 sps:$4 sm:$0xff]  }
 0x7be   : > { %6791 = vmatmul.mubr.bf16.vlgmr.msra.gmra.mxu1 %v11492_v48  ;;  %7588 = vmatpush1.bf16.msra.mxu0 %v9733_v21  ;;  %v9739_v48 = vld [vmem:[%s11572_s6 + $0x50] ss:$8 sps:$4 sm:$0xff]  }
 0x7bf   : > { %v6507_v23 = vpop.f32.mrf.mxu0  ;;  %v6548_v35 = vpop.f32.mrf.mxu1  ;;  %7589 = vmatprep.subr.bf16.mxu0 %v9738_v22  ;;  %7629 = vmatpush1.bf16.msra.mxu1 %v9742_v26  ;;  %v9787_v21 = vld [vmem:[%s11572_s6 + $0xd0] ss:$8 sps:$4 sm:$0xff]   ;;  %v9795_v22 = vld [vmem:[%s11572_s6 + $0xc4] ss:$8 sps:$4 sm:$0xff]  }
 0x7c0   : > { %v6508_v39 = vadd.f32 %v6507_v23, %v6438_v27  ;;  %7630 = vmatprep.subr.bf16.mxu1 %v9750_v32  ;;  %v9802_v26 = vld [vmem:[%s11572_s6 + $0x1d0] ss:$8 sps:$4 sm:$0xff]   ;;  %v9810_v27 = vld [vmem:[%s11572_s6 + $0x1c4] ss:$8 sps:$4 sm:$0xff]   ;;  %v9793_v32 = vld [vmem:[%s11572_s6 + $0xc0] ss:$8 sps:$4 sm:$0xff]  }
 0x7c1   : > { %v6509_v2 = vpop.f32.mrf.mxu0  ;;  %v6550_v40 = vpop.f32.mrf.mxu1  ;;  %v9808_v23 = vld [vmem:[%s11572_s6 + $0x1c0] ss:$8 sps:$4 sm:$0xff]  }
 0x7c2   : > { %v6549_v6 = vadd.f32 %v6548_v35, %v6508_v39  ;;  %7590 = vmatpush1.bf16.msra.mxu0 %v9736_v11  ;;  %v9801_v11 = vld [vmem:[%s11572_s6 + $0xb4] ss:$8 sps:$4 sm:$0xff]   ;;  %v9814_v39 = vld [vmem:[%s11572_s6 + $0x1b0] ss:$8 sps:$4 sm:$0xff]   ;;  %v9805_v2 = vld [vmem:[%s11572_s6 + $0xa0] ss:$8 sps:$4 sm:$0xff]   ;;  %v6434_v40 = vrot.slane %v11700_v43, %v10959_v28 }
 0x7c3   : > { %v6510_v41 = vpop.f32.mrf.mxu0  ;;  %v6551_v46 = vpop.f32.mrf.mxu1  ;;  %7591 = vmatprep.subr.bf16.mxu0 %v9741_v36  ;;  %7631 = vmatpush1.bf16.msra.mxu1 %v9748_v38  ;;  %v9816_v35 = vld [vmem:[%s11572_s6 + $0x1b4] ss:$8 sps:$4 sm:$0xff]   ;;  %v9799_v36 = vld [vmem:[%s11572_s6 + $0xb0] ss:$8 sps:$4 sm:$0xff]   ;;  %v9807_v38 = vld [vmem:[%s11572_s6 + $0xa4] ss:$8 sps:$4 sm:$0xff]  }
 0x7c4   : > { %v6800_v42 = vpack.c.bf16 %v6549_v6, %v6549_v6  ;;  %7632 = vmatprep.subr.bf16.mxu1 %v9756_v44  ;;  %v9822_v44 = vld [vmem:[%s11572_s6 + $0x1a4] ss:$8 sps:$4 sm:$0xff]   ;;  %v9813_v6 = vld [vmem:[%s11572_s6 + $0x94] ss:$8 sps:$4 sm:$0xff]   ;;  %v9811_v46 = vld [vmem:[%s11572_s6 + $0x90] ss:$8 sps:$4 sm:$0xff]  }
 0x7c5   : > { %v9825_v41 = vld [vmem:[%s11572_s6 + $0x194] ss:$8 sps:$4 sm:$0xff]  }
 0x7c6   : > { %7592 = vmatpush1.bf16.msra.mxu0 %v9739_v48  ;;  %7619 = vmatprep.mubr.bf16.mxu0 %v6800_v42  ;;  %v9820_v48 = vld [vmem:[%s11572_s6 + $0x1a0] ss:$8 sps:$4 sm:$0xff]   ;;  %v9823_v42 = vld [vmem:[%s11572_s6 + $0x190] ss:$8 sps:$4 sm:$0xff]  }
 0x7c7   : > { %7593 = vmatprep.subr.bf16.mxu0 %v9747_v4  ;;  %7633 = vmatpush1.bf16.msra.mxu1 %v9754_v3  ;;  %v6506_v4 = vadd.f32 %v11708_v33, %v6434_v40  ;;  %v9819_v3 = vld [vmem:[%s11572_s6 + $0x84] ss:$8 sps:$4 sm:$0xff]   ;;  %v6442_v33 = vrot.slane %v11700_v43, %v10962_v29 }
 0x7c8   : > { %7634 = vmatprep.subr.bf16.mxu1 %v9762_v49  ;;  %v9828_v49 = vld [vmem:[%s11572_s6 + $0x184] ss:$8 sps:$4 sm:$0xff]  }
 0x7c9   : > { %v9894_v40 = vld [vmem:[%s11572_s6 + $0x324] ss:$8 sps:$4 sm:$0xff]  }
 0x7ca   : > { %7594 = vmatpush1.bf16.msra.mxu0 %v9745_v51  ;;  %v9817_v51 = vld [vmem:[%s11572_s6 + $0x80] ss:$8 sps:$4 sm:$0xff]  }
 0x7cb   : > { %7595 = vmatprep.subr.bf16.mxu0 %v9753_v52  ;;  %7635 = vmatpush1.bf16.msra.mxu1 %v9760_v53  ;;  %v6547_v52 = vadd.f32 %v11710_v34, %v6506_v4  ;;  %v9826_v53 = vld [vmem:[%s11572_s6 + $0x180] ss:$8 sps:$4 sm:$0xff]   ;;  %v6446_v34 = vrot.slane %v11700_v43, %v10971_v59  ;;  %v9853_v4 = vld [vmem:[%s11572_s6 + $0x2f0] ss:$8 sps:$4 sm:$0xff]  }
 0x7cc   : > { %7636 = vmatprep.subr.bf16.mxu1 %v9768_v54  ;;  %v9831_v54 = vld [vmem:[%s11572_s6 + $0x274] ss:$8 sps:$4 sm:$0xff]  }
 0x7ce   : > { %7596 = vmatpush1.bf16.msra.mxu0 %v9751_v58  ;;  %v9879_v58 = vld [vmem:[%s11572_s6 + $0x374] ss:$8 sps:$4 sm:$0xff]  }
 0x7cf   : > { %7597 = vmatprep.subr.bf16.mxu0 %v9759_v62  ;;  %7637 = vmatpush1.bf16.msra.mxu1 %v9766_v50  ;;  %v9829_v62 = vld [vmem:[%s11572_s6 + $0x270] ss:$8 sps:$4 sm:$0xff]   ;;  %v6799_v50 = vpack.c.bf16 %v6547_v52, %v6547_v52  ;;  %v9861_v52 = vld [vmem:[%s11572_s6 + $0x2d4] ss:$8 sps:$4 sm:$0xff]  }
 0x7d0   : > { %7638 = vmatprep.subr.bf16.mxu1 %v9774_v45  ;;  %v9834_v45 = vld [vmem:[%s11572_s6 + $0x264] ss:$8 sps:$4 sm:$0xff]  }
 0x7d2   : > { %7598 = vmatpush1.bf16.msra.mxu0 %v9757_v63 }
 0x7d3   : > { %7599 = vmatprep.subr.bf16.mxu0 %v9765_v20  ;;  %7639 = vmatpush1.bf16.msra.mxu1 %v9772_v0 }
 0x7d4   : > { %7640 = vmatprep.subr.bf16.mxu1 %v9780_v25  ;;  %v9832_v25 = vld [vmem:[%s11572_s6 + $0x260] ss:$8 sps:$4 sm:$0xff]  }
 0x7d6   : > { %7600 = vmatpush1.bf16.msra.mxu0 %v9763_v1 }
 0x7d7   : > { %7601 = vmatprep.subr.bf16.mxu0 %v9771_v5  ;;  %7641 = vmatpush1.bf16.msra.mxu1 %v9778_v7  ;;  %v9837_v5 = vld [vmem:[%s11572_s6 + $0x254] ss:$8 sps:$4 sm:$0xff]  }
 0x7d8   : > { %7642 = vmatprep.subr.bf16.mxu1 %v9786_v24 }
 0x7da   : > { %7602 = vmatpush1.bf16.msra.mxu0 %v9769_v9 }
 0x7db   : > { %7603 = vmatprep.subr.bf16.mxu0 %v9777_v30  ;;  %7643 = vmatpush1.bf16.msra.mxu1 %v9784_v10  ;;  %v9835_v10 = vld [vmem:[%s11572_s6 + $0x250] ss:$8 sps:$4 sm:$0xff]  }
 0x7dc   : > { %7644 = vmatprep.subr.bf16.mxu1 %v9792_v12 }
 0x7de   : > { %7604 = vmatpush2.bf16.msra.mxu0 %v9775_v13 }
 0x7df   : > { %7605 = vmatprep.subr.bf16.mxu0 %v9783_v14  ;;  %7645 = vmatpush2.bf16.msra.mxu1 %v9790_v15  ;;  %v9840_v14 = vld [vmem:[%s11572_s6 + $0x244] ss:$8 sps:$4 sm:$0xff]  }
 0x7e0   : > { %7646 = vmatprep.subr.bf16.mxu1 %v9798_v16  ;;  %v9877_v16 = vld [vmem:[%s11572_s6 + $0x370] ss:$8 sps:$4 sm:$0xff]  }
 0x7e2   : > { %7606 = vmatpush2.bf16.msra.mxu0 %v9781_v17 }
 0x7e3   : > { %7607 = vmatprep.subr.bf16.mxu0 %v9789_v18  ;;  %7647 = vmatpush2.bf16.msra.mxu1 %v9796_v19  ;;  %v9882_v18 = vld [vmem:[%s11572_s6 + $0x364] ss:$8 sps:$4 sm:$0xff]   ;;  %v9838_v19 = vld [vmem:[%s11572_s6 + $0x240] ss:$8 sps:$4 sm:$0xff]  }
 0x7e4   : > { %7648 = vmatprep.subr.bf16.mxu1 %v9804_v8  ;;  %v9843_v8 = vld [vmem:[%s11572_s6 + $0x234] ss:$8 sps:$4 sm:$0xff]  }
 0x7e6   : > { %7608 = vmatpush2.bf16.msra.mxu0 %v9787_v21  ;;  %v9880_v21 = vld [vmem:[%s11572_s6 + $0x360] ss:$8 sps:$4 sm:$0xff]  }
 0x7e7   : > { %7609 = vmatprep.subr.bf16.mxu0 %v9795_v22  ;;  %7649 = vmatpush2.bf16.msra.mxu1 %v9802_v26  ;;  %v9885_v22 = vld [vmem:[%s11572_s6 + $0x354] ss:$8 sps:$4 sm:$0xff]   ;;  %v9841_v26 = vld [vmem:[%s11572_s6 + $0x230] ss:$8 sps:$4 sm:$0xff]  }
 0x7e8   : > { %7650 = vmatprep.subr.bf16.mxu1 %v9810_v27  ;;  %v9846_v27 = vld [vmem:[%s11572_s6 + $0x224] ss:$8 sps:$4 sm:$0xff]  }
 0x7ea   : > { %7610 = vmatpush2.bf16.msra.mxu0 %v9793_v32  ;;  %v9883_v32 = vld [vmem:[%s11572_s6 + $0x350] ss:$8 sps:$4 sm:$0xff]  }
 0x7eb   : > { %7611 = vmatprep.subr.bf16.mxu0 %v9801_v11  ;;  %7651 = vmatpush2.bf16.msra.mxu1 %v9808_v23  ;;  %v9888_v11 = vld [vmem:[%s11572_s6 + $0x344] ss:$8 sps:$4 sm:$0xff]   ;;  %v9844_v23 = vld [vmem:[%s11572_s6 + $0x220] ss:$8 sps:$4 sm:$0xff]  }
 0x7ec   : > { %7652 = vmatprep.subr.bf16.mxu1 %v9816_v35  ;;  %v9849_v35 = vld [vmem:[%s11572_s6 + $0x214] ss:$8 sps:$4 sm:$0xff]  }
 0x7ee   : > { %7612 = vmatpush2.bf16.msra.mxu0 %v9799_v36  ;;  %v9886_v36 = vld [vmem:[%s11572_s6 + $0x340] ss:$8 sps:$4 sm:$0xff]  }
 0x7ef   : > { %7613 = vmatprep.subr.bf16.mxu0 %v9807_v38  ;;  %7653 = vmatpush2.bf16.msra.mxu1 %v9814_v39  ;;  %v9891_v38 = vld [vmem:[%s11572_s6 + $0x334] ss:$8 sps:$4 sm:$0xff]   ;;  %v9847_v39 = vld [vmem:[%s11572_s6 + $0x210] ss:$8 sps:$4 sm:$0xff]  }
 0x7f0   : > { %7654 = vmatprep.subr.bf16.mxu1 %v9822_v44  ;;  %v9852_v44 = vld [vmem:[%s11572_s6 + $0x204] ss:$8 sps:$4 sm:$0xff]  }
 0x7f2   : > { %7614 = vmatpush2.bf16.msra.mxu0 %v9805_v2  ;;  %v9889_v2 = vld [vmem:[%s11572_s6 + $0x330] ss:$8 sps:$4 sm:$0xff]  }
 0x7f3   : > { %7615 = vmatprep.subr.bf16.mxu0 %v9813_v6  ;;  %7655 = vmatpush2.bf16.msra.mxu1 %v9820_v48  ;;  %v9850_v6 = vld [vmem:[%s11572_s6 + $0x200] ss:$8 sps:$4 sm:$0xff]   ;;  %v9855_v48 = vld [vmem:[%s11572_s6 + $0x2f4] ss:$8 sps:$4 sm:$0xff]  }
 0x7f4   : > { %7656 = vmatprep.subr.bf16.mxu1 %v9825_v41  ;;  %v9892_v41 = vld [vmem:[%s11572_s6 + $0x320] ss:$8 sps:$4 sm:$0xff]  }
 0x7f6   : > { %7616 = vmatpush2.bf16.msra.mxu0 %v9811_v46  ;;  %v9897_v46 = vld [vmem:[%s11572_s6 + $0x314] ss:$8 sps:$4 sm:$0xff]  }
 0x7f7   : > { %7617 = vmatprep.subr.bf16.mxu0 %v9819_v3  ;;  %7657 = vmatpush2.bf16.msra.mxu1 %v9823_v42  ;;  %v9858_v3 = vld [vmem:[%s11572_s6 + $0x2e4] ss:$8 sps:$4 sm:$0xff]   ;;  %v9895_v42 = vld [vmem:[%s11572_s6 + $0x310] ss:$8 sps:$4 sm:$0xff]  }
 0x7f8   : > { %7658 = vmatprep.subr.bf16.mxu1 %v9828_v49  ;;  %v9900_v49 = vld [vmem:[%s11572_s6 + $0x304] ss:$8 sps:$4 sm:$0xff]  }
 0x7fa   : > { %7618 = vmatpush2.bf16.msra.mxu0 %v9817_v51  ;;  %v9856_v51 = vld [vmem:[%s11572_s6 + $0x2e0] ss:$8 sps:$4 sm:$0xff]  }
 0x7fb   : > { %7659 = vmatpush2.bf16.msra.mxu1 %v9826_v53  ;;  %7669 = vmatprep.subr.bf16.mxu0 %v9831_v54  ;;  %v9898_v53 = vld [vmem:[%s11572_s6 + $0x300] ss:$8 sps:$4 sm:$0xff]   ;;  %v9903_v54 = vld [vmem:[%s11572_s6 + $0x3f4] ss:$8 sps:$4 sm:$0xff]  }
 0x7fc   : > { %7710 = vmatprep.subr.bf16.mxu1 %v9879_v58  ;;  %v9859_v58 = vld [vmem:[%s11572_s6 + $0x2d0] ss:$8 sps:$4 sm:$0xff]  }
 0x7fd   : > { %v6587_v63 = vpop.f32.mrf.mxu0  ;;  %v6628_v20 = vpop.f32.mrf.mxu1  ;;  %7620 = vmatmul.mubr.bf16.vlgmr.msra.gmra.mxu0 %v6799_v50  ;;  %v9906_v50 = vld [vmem:[%s11572_s6 + $0x3e4] ss:$8 sps:$4 sm:$0xff]  }
 0x7fe   : > { %v6588_v0 = vadd.f32 %v6587_v63, %v6442_v33  ;;  %7670 = vmatpush1.bf16.msra.mxu0 %v9829_v62  ;;  %v9864_v33 = vld [vmem:[%s11572_s6 + $0x2c4] ss:$8 sps:$4 sm:$0xff]   ;;  %v9901_v62 = vld [vmem:[%s11572_s6 + $0x3f0] ss:$8 sps:$4 sm:$0xff]   ;;  %v9904_v63 = vld [vmem:[%s11572_s6 + $0x3e0] ss:$8 sps:$4 sm:$0xff]  }
 0x7ff   : > { %v6589_v1 = vpop.f32.mrf.mxu0  ;;  %v6630_v29 = vpop.f32.mrf.mxu1  ;;  %7671 = vmatprep.subr.bf16.mxu0 %v9834_v45  ;;  %v9862_v45 = vld [vmem:[%s11572_s6 + $0x2c0] ss:$8 sps:$4 sm:$0xff]  }
 0x800   : > { %v6590_v7 = vadd.f32 %v6589_v1, %v6446_v34  ;;  %v6629_v24 = vadd.f32 %v6628_v20, %v6588_v0  ;;  %v9867_v34 = vld [vmem:[%s11572_s6 + $0x2b4] ss:$8 sps:$4 sm:$0xff]   ;;  %v9865_v0 = vld [vmem:[%s11572_s6 + $0x2b0] ss:$8 sps:$4 sm:$0xff]  }
 0x801   : > { %v6591_v9 = vpop.f32.mrf.mxu0  ;;  %v6632_v59 = vpop.f32.mrf.mxu1  ;;  %v9909_v20 = vld [vmem:[%s11572_s6 + $0x3d4] ss:$8 sps:$4 sm:$0xff]   ;;  %v9907_v1 = vld [vmem:[%s11572_s6 + $0x3d0] ss:$8 sps:$4 sm:$0xff]  }
 0x802   : > { %v6631_v30 = vadd.f32 %v6630_v29, %v6590_v7  ;;  %7672 = vmatpush1.bf16.msra.mxu0 %v9832_v25  ;;  %v6801_v17 = vpack.c.bf16 %v6629_v24, %v6629_v24  ;;  %v9870_v25 = vld [vmem:[%s11572_s6 + $0x2a4] ss:$8 sps:$4 sm:$0xff]   ;;  %v9873_v7 = vld [vmem:[%s11572_s6 + $0x294] ss:$8 sps:$4 sm:$0xff]   ;;  %v9910_v24 = vld [vmem:[%s11572_s6 + $0x3c0] ss:$8 sps:$4 sm:$0xff]  }
 0x803   : > { %v6592_v12 = vpop.f32.mrf.mxu0  ;;  %v6633_v13 = vpop.f32.mrf.mxu1  ;;  %7673 = vmatprep.subr.bf16.mxu0 %v9837_v5  ;;  %v9912_v29 = vld [vmem:[%s11572_s6 + $0x3c4] ss:$8 sps:$4 sm:$0xff]   ;;  %v9868_v5 = vld [vmem:[%s11572_s6 + $0x2a0] ss:$8 sps:$4 sm:$0xff]   ;;  %v9915_v9 = vld [vmem:[%s11572_s6 + $0x3b4] ss:$8 sps:$4 sm:$0xff]  }
 0x804   : > { %v6802_v15 = vpack.c.bf16 %v6631_v30, %v6631_v30  ;;  %v9871_v59 = vld [vmem:[%s11572_s6 + $0x290] ss:$8 sps:$4 sm:$0xff]   ;;  %v9876_v30 = vld [vmem:[%s11572_s6 + $0x284] ss:$8 sps:$4 sm:$0xff]   ;;  %v9874_v13 = vld [vmem:[%s11572_s6 + $0x280] ss:$8 sps:$4 sm:$0xff]  }
 0x805   : > { %v9918_v12 = vld [vmem:[%s11572_s6 + $0x3a4] ss:$8 sps:$4 sm:$0xff]  }
 0x806   : > { %7660 = vmatprep.mubr.bf16.mxu1 %v6802_v15  ;;  %7674 = vmatpush1.bf16.msra.mxu0 %v9835_v10  ;;  %v9913_v10 = vld [vmem:[%s11572_s6 + $0x3b0] ss:$8 sps:$4 sm:$0xff]   ;;  %v9921_v15 = vld [vmem:[%s11572_s6 + $0x394] ss:$8 sps:$4 sm:$0xff]  }
 0x807   : > { %7661 = vmatmul.mubr.bf16.vlgmr.msra.gmra.mxu1 %v6801_v17  ;;  %7675 = vmatprep.subr.bf16.mxu0 %v9840_v14  ;;  %v9916_v14 = vld [vmem:[%s11572_s6 + $0x3a0] ss:$8 sps:$4 sm:$0xff]   ;;  %v6454_v17 = vrot.slane %v11700_v43, %v1520_v60 }
 0x808   : > { %7711 = vmatpush1.bf16.msra.mxu1 %v9877_v16  ;;  %v6450_v16 = vrot.slane %v11700_v43, %v1516_v55 }
 0x809   : > { %7712 = vmatprep.subr.bf16.mxu1 %v9882_v18  ;;  %v9919_v18 = vld [vmem:[%s11572_s6 + $0x390] ss:$8 sps:$4 sm:$0xff]  }
 0x80a   : > { %7676 = vmatpush1.bf16.msra.mxu0 %v9838_v19 }
 0x80b   : > { %7677 = vmatprep.subr.bf16.mxu0 %v9843_v8  ;;  %v9924_v8 = vld [vmem:[%s11572_s6 + $0x384] ss:$8 sps:$4 sm:$0xff]  }
 0x80c   : > { %7713 = vmatpush1.bf16.msra.mxu1 %v9880_v21 }
 0x80d   : > { %7714 = vmatprep.subr.bf16.mxu1 %v9885_v22 }
 0x80e   : > { %7678 = vmatpush1.bf16.msra.mxu0 %v9841_v26 }
 0x80f   : > { %7679 = vmatprep.subr.bf16.mxu0 %v9846_v27 }
 0x810   : > { %7715 = vmatpush1.bf16.msra.mxu1 %v9883_v32 }
 0x811   : > { %7716 = vmatprep.subr.bf16.mxu1 %v9888_v11  ;;  %v9922_v11 = vld [vmem:[%s11572_s6 + $0x380] ss:$8 sps:$4 sm:$0xff]  }
 0x812   : > { %7680 = vmatpush1.bf16.msra.mxu0 %v9844_v23 }
 0x813   : > { %7681 = vmatprep.subr.bf16.mxu0 %v9849_v35 }
 0x814   : > { %7717 = vmatpush1.bf16.msra.mxu1 %v9886_v36 }
 0x815   : > { %7718 = vmatprep.subr.bf16.mxu1 %v9891_v38 }
 0x816   : > { %7682 = vmatpush1.bf16.msra.mxu0 %v9847_v39 }
 0x817   : > { %7683 = vmatprep.subr.bf16.mxu0 %v9852_v44 }
 0x818   : > { %7719 = vmatpush1.bf16.msra.mxu1 %v9889_v2  ;;  %v6458_v2 = vrot.slane %v11700_v43, %v1524_v57  ;;  %v6935_v57 = vld [vmem:[%s10686_s24 + $0x1d] sm:$0x3] }
 0x819   : > { %7720 = vmatprep.subr.bf16.mxu1 %v9894_v40  ;;  %v6462_v40 = vrot.slane %v11700_v43, %v1528_v61 }
 0x81a   : > { %7684 = vmatpush1.bf16.msra.mxu0 %v9850_v6 }
 0x81b   : > { %7685 = vmatprep.subr.bf16.mxu0 %v9855_v48 }
 0x81c   : > { %7721 = vmatpush1.bf16.msra.mxu1 %v9892_v41 }
 0x81d   : > { %7722 = vmatprep.subr.bf16.mxu1 %v9897_v46 }
 0x81e   : > { %7686 = vmatpush2.bf16.msra.mxu0 %v9853_v4 }
 0x81f   : > { %7687 = vmatprep.subr.bf16.mxu0 %v9858_v3 }
 0x820   : > { %7723 = vmatpush1.bf16.msra.mxu1 %v9895_v42 }
 0x821   : > { %7724 = vmatprep.subr.bf16.mxu1 %v9900_v49 }
 0x822   : > { %7688 = vmatpush2.bf16.msra.mxu0 %v9856_v51 }
 0x823   : > { %7689 = vmatprep.subr.bf16.mxu0 %v9861_v52 }
 0x824   : > { %7725 = vmatpush1.bf16.msra.mxu1 %v9898_v53 }
 0x825   : > { %7726 = vmatprep.subr.bf16.mxu1 %v9903_v54 }
 0x826   : > { %7690 = vmatpush2.bf16.msra.mxu0 %v9859_v58 }
 0x827   : > { %7691 = vmatprep.subr.bf16.mxu0 %v9864_v33 }
 0x828   : > { %7727 = vmatpush2.bf16.msra.mxu1 %v9901_v62  ;;  %v7580_v62 = vrot.slane %v6935_v57, %v10959_v28 }
 0x829   : > { %7728 = vmatprep.subr.bf16.mxu1 %v9906_v50 }
 0x82a   : > { %7692 = vmatpush2.bf16.msra.mxu0 %v9862_v45  ;;  %v7584_v45 = vrot.slane %v6935_v57, %v10968_v31 }
 0x82b   : > { %7693 = vmatprep.subr.bf16.mxu0 %v9867_v34 }
 0x82c   : > { %7729 = vmatpush2.bf16.msra.mxu1 %v9904_v63 }
 0x82d   : > { %7730 = vmatprep.subr.bf16.mxu1 %v9909_v20 }
 0x82e   : > { %7694 = vmatpush2.bf16.msra.mxu0 %v9865_v0 }
 0x82f   : > { %7695 = vmatprep.subr.bf16.mxu0 %v9870_v25 }
 0x830   : > { %7731 = vmatpush2.bf16.msra.mxu1 %v9907_v1 }
 0x831   : > { %7732 = vmatprep.subr.bf16.mxu1 %v9912_v29 }
 0x832   : > { %7696 = vmatpush2.bf16.msra.mxu0 %v9868_v5 }
 0x833   : > { %7697 = vmatprep.subr.bf16.mxu0 %v9873_v7 }
 0x834   : > { %7733 = vmatpush2.bf16.msra.mxu1 %v9910_v24 }
 0x835   : > { %7734 = vmatprep.subr.bf16.mxu1 %v9915_v9 }
 0x836   : > { %7698 = vmatpush2.bf16.msra.mxu0 %v9871_v59 }
 0x837   : > { %7699 = vmatprep.subr.bf16.mxu0 %v9876_v30 }
 0x838   : > { %7735 = vmatpush2.bf16.msra.mxu1 %v9913_v10 }
 0x839   : > { %7736 = vmatprep.subr.bf16.mxu1 %v9918_v12 }
 0x83a   : > { %7700 = vmatpush2.bf16.msra.mxu0 %v9874_v13 }
 0x83c   : > { %7737 = vmatpush2.bf16.msra.mxu1 %v9916_v14 }
 0x83d   : > { %v6669_v19 = vpop.f32.mrf.mxu0  ;;  %7738 = vmatprep.subr.bf16.mxu1 %v9921_v15 }
 0x83e   : > { %v6670_v21 = vadd.f32 %v6669_v19, %v6450_v16  ;;  %v6710_v22 = vpop.f32.mrf.mxu1 }
 0x83f   : > { %v6671_v26 = vpop.f32.mrf.mxu0 }
 0x840   : > { %v6672_v27 = vadd.f32 %v6671_v26, %v6454_v17  ;;  %v6712_v32 = vpop.f32.mrf.mxu1  ;;  %7739 = vmatpush2.bf16.msra.mxu1 %v9919_v18  ;;  %v6711_v23 = vadd.f32 %v6710_v22, %v6670_v21 }
 0x841   : > { %v6673_v35 = vpop.f32.mrf.mxu0  ;;  %7740 = vmatprep.subr.bf16.mxu1 %v9924_v8 }
 0x842   : > { %v6713_v55 = vadd.f32 %v6712_v32, %v6672_v27  ;;  %v6714_v36 = vpop.f32.mrf.mxu1  ;;  %v6803_v44 = vpack.c.bf16 %v6711_v23, %v6711_v23 }
 0x843   : > { %v6674_v38 = vpop.f32.mrf.mxu0 }
 0x844   : > { %v6804_v39 = vpack.c.bf16 %v6713_v55, %v6713_v55  ;;  %v6715_v60 = vpop.f32.mrf.mxu1  ;;  %7741 = vmatpush2.bf16.msra.mxu1 %v9922_v11 }
 0x846   : > { %7701 = vmatprep.mubr.bf16.mxu0 %v6804_v39 }
 0x847   : > { %7702 = vmatmul.mubr.bf16.vlgmr.msra.gmra.mxu0 %v6803_v44 }
 0x87d   : > { %v6751_v6 = vpop.f32.mrf.mxu0 }
 0x87e   : > { %v6752_v48 = vadd.f32 %v6751_v6, %v6458_v2  ;;  %v6792_v41 = vpop.f32.mrf.mxu1 }
 0x87f   : > { %v6753_v46 = vpop.f32.mrf.mxu0 }
 0x880   : > { %v6754_v4 = vadd.f32 %v6753_v46, %v6462_v40  ;;  %v6794_v3 = vpop.f32.mrf.mxu1  ;;  %v6793_v42 = vadd.f32 %v6792_v41, %v6752_v48 }
 0x881   : > { %v6755_v49 = vpop.f32.mrf.mxu0 }
 0x882   : > { %v6795_v51 = vadd.f32 %v6794_v3, %v6754_v4  ;;  %v6796_v52 = vpop.f32.mrf.mxu1  ;;  %v6805_v33 = vpack.c.bf16 %v6793_v42, %v6793_v42 }
 0x883   : > { %v6756_v53 = vpop.f32.mrf.mxu0 }
 0x884   : > { %v6806_v54 = vpack.c.bf16 %v6795_v51, %v6795_v51  ;;  %v6797_v58 = vpop.f32.mrf.mxu1 }
 0x886   : > { %7742 = vmatprep.mubr.bf16.mxu1 %v6806_v54 }
 0x887   : > { %7743 = vmatmul.mubr.bf16.vlgmr.msra.gmra.mxu1 %v6805_v33 }
 0x8bd   : > { %v7621_v47 = vpop.f32.mrf.mxu0 }
 0x8be   : > { %v7622_v34 = vadd.f32 %v7621_v47, %v7580_v62 }
 0x8bf   : > { %v7623_v61 = vpop.f32.mrf.mxu0 }
 0x8c0   : > { %v7624_v20 = vadd.f32 %v7623_v61, %v7584_v45 }
 0x8c1   : > { %v7625_v43 = vpop.f32.mrf.mxu0 }
 0x8c3   : > { %v7626_v50 = vpop.f32.mrf.mxu0 }
 0x8c7   : > { %v7662_v63 = vpop.f32.mrf.mxu1 }
 0x8c8   : > { %v7663_v0 = vadd.f32 %v7662_v63, %v7622_v34 }
 0x8c9   : > { %v7664_v25 = vpop.f32.mrf.mxu1 }
 0x8ca   : > { %v7665_v1 = vadd.f32 %v7664_v25, %v7624_v20 }
 0x8cb   : > { %v7666_v29 = vpop.f32.mrf.mxu1 }
 0x8cd   : > { %v7667_v5 = vpop.f32.mrf.mxu1 }
 0x907   : > { %v7703_v7 = vpop.f32.mrf.mxu0 }
 0x908   : > { %v7704_v24 = vadd.f32 %v7703_v7, %v7663_v0 }
 0x909   : > { %v7705_v9 = vpop.f32.mrf.mxu0 }
 0x90a   : > { %v7706_v12 = vadd.f32 %v7705_v9, %v7665_v1 }
 0x90b   : > { %v7707_v59 = vpop.f32.mrf.mxu0 }
 0x90d   : > { %v7708_v30 = vpop.f32.mrf.mxu0 }
 0x947   : > { %v7744_v10 = vpop.f32.mrf.mxu1 }
 0x948   : > { %v7745_v28 = vadd.f32 %v7744_v10, %v7704_v24 }
 0x949   : > { %v7746_v13 = vpop.f32.mrf.mxu1 }
 0x94a   : > { %v7747_v14 = vadd.f32 %v7746_v13, %v7706_v12  ;;  %9925 = vtanh.f32 %v7745_v28 }
 0x94b   : > { %v7748_v31 = vpop.f32.mrf.mxu1 }
 0x94c   : > { %9927 = vtanh.f32 %v7747_v14 }
 0x94d   : > { %v7749_v15 = vpop.f32.mrf.mxu1 }
 0x957   : > { %v9926_v16 = vpop.eup %9925 }
 0x959   : > { %v9928_v17 = vpop.eup %9927 }
 0x95a   : > { %v7755_v18 = vcombine.low %v9926_v16, %v9928_v17 }
 0x95c   : > { %v7762_v19 = vrot.slane %v7755_v18, %v10771_v56 }
 0x95e   : > { %v7769_v8 = vrot.slane %v7762_v19, %v10771_v56 }
 0x960   : > { %7775 = vst.msk [vmem:[%s700_s14] sm:$0x3] %vm7773_vm0, %v7769_v8 }
 0x961 PF: > { %s11964_s16 = sld [smem:[#allocation24_spill]] }
 0x962   : > { %s11965_s13 = sld [smem:[#allocation21_spill]] }
 0x963   : > { %s11966_s14 = sld [smem:[#allocation22_spill]] }
 0x964   : > { %s11967_s15 = sld [smem:[#allocation25_spill]] }
 0x967   : > { %p32_p4 = scmp.ge.s32.totalorder %s11964_s16, 4  }
 0x969   :  { %34 = sbr.rel (!%p32_p4) target bundleno = 20 (0x14), region = 199 }
 0x96e   :  { %7795 = vsyncpa [#allocation3], 1 }
 0x96f   :  { %7797 = vsyncpa [#allocation3 + $0x1], 1 }
 0x970   :  { %7798 = vsyncpa [#allocation5], 1 }
 0x971   :  { %7800 = vsyncpa [#allocation5 + $0x1], 1 }
 0x972   :  { %7801 = vsyncpa [#allocation8], 1 }
 0x973   :  { %7803 = vsyncpa [#allocation8 + $0x1], 1 }
 0x974   :  { %7804 = vsyncpa [#allocation11], 1 }
 0x975   :  { %7806 = vsyncpa [#allocation11 + $0x1], 1 }
 0x976   :  { %7807 = vsyncpa [#allocation14], 1 }
 0x977   :  { %7809 = vsyncpa [#allocation14 + $0x1], 1 }

</bundles_post_ra>
